<compile_context>
chip_gen: v5e
topology: v5e:2x2
jax: 0.10.0
libtpu: 0.0.40
codegen_flags: <defaults>
</compile_context>

<pallas_src>
import jax
import jax.numpy as jnp
import numpy as np
from jax.experimental import pallas as pl
from jax.experimental.pallas import tpu as pltpu


# ----------------------------------------------------------------------------
# Fused Pallas kernel: conv1 -> conv2 -> conv3 -> dueling head, all in VMEM.
# ----------------------------------------------------------------------------
def _fused_dqn_kernel(a1_ref, w1_ref, b1_ref,
                      p2_ref, w2_ref, b2_ref,
                      p3_ref, w3_ref, b3_ref,
                      wh1_ref, bh1_ref, wh2_ref, bh2_ref,
                      o_ref):
    f32 = jnp.float32

    # conv1: im2col rows (N*OH1*OW1, C*8*8) @ (C*8*8, 32). The 1/256 input scale is
    # already folded into w1 at prepare time.
    h1 = jnp.dot(a1_ref[...], w1_ref[...], preferred_element_type=f32) + b1_ref[...]
    h1 = jnp.maximum(h1, 0.0)                                   # (N*OH1*OW1, 32)

    # conv2 (4x4, stride 2): patch gather expressed as matmul with constant 0/1
    # selector matrices; accumulate over the 16 kernel taps.
    n_taps2 = p2_ref.shape[0]
    acc2 = jnp.zeros((p2_ref.shape[1], w2_ref.shape[2]), f32)
    for t in range(n_taps2):
        patch = jnp.dot(p2_ref[t], h1, preferred_element_type=f32)        # (N*9, 32)
        acc2 = acc2 + jnp.dot(patch, w2_ref[t], preferred_element_type=f32)
    h2 = jnp.maximum(acc2 + b2_ref[...], 0.0)                   # (N*9, 64)

    # conv3 (3x3, stride 1, output 1x1): same selector trick, 9 taps.
    n_taps3 = p3_ref.shape[0]
    acc3 = jnp.zeros((p3_ref.shape[1], w3_ref.shape[2]), f32)
    for t in range(n_taps3):
        rows = jnp.dot(p3_ref[t], h2, preferred_element_type=f32)         # (N, 64)
        acc3 = acc3 + jnp.dot(rows, w3_ref[t], preferred_element_type=f32)
    h3 = jnp.maximum(acc3 + b3_ref[...], 0.0)                   # (N, 64) == conv_out

    # Dueling head: one lane-dense (conv_out, 1024) hidden matmul for [value|adv],
    # then a block-diagonal (1024, 1 + A) output matmul.
    hh = jnp.dot(h3, wh1_ref[...], preferred_element_type=f32) + bh1_ref[...]
    hh = jnp.maximum(hh, 0.0)                                   # (N, 1024)
    out2 = jnp.dot(hh, wh2_ref[...], preferred_element_type=f32) + bh2_ref[...]
    value = out2[:, 0:1]                                        # (N, 1)
    adv = out2[:, 1:]                                           # (N, A)
    # torch semantics: advantage.mean() is a scalar mean over ALL elements.
    o_ref[...] = value + adv - jnp.mean(adv)


def _fused_call(a1, f, p2, p3, n, n_actions):
    args = (a1, f["w1"], f["b1"], p2, f["w2"], f["b2"],
            p3, f["w3"], f["b3"], f["wh1"], f["bh1"], f["wh2"], f["bh2"])
    in_specs = [
        pl.BlockSpec(a.shape, (lambda i, nd=a.ndim: (0,) * nd)) for a in args
    ]
    return pl.pallas_call(
        _fused_dqn_kernel,
        out_shape=jax.ShapeDtypeStruct((n, n_actions), jnp.float32),
        grid=(1,),
        in_specs=in_specs,
        out_specs=pl.BlockSpec((n, n_actions), lambda i: (0, 0)),
        compiler_params=pltpu.CompilerParams(dimension_semantics=("arbitrary",)),
    )(*args)


# ----------------------------------------------------------------------------
# Host-side glue: conv1 im2col, selector constants, parameter init / packing.
# ----------------------------------------------------------------------------
def im2col_nchw(x, kh, kw, stride):
    """x: (N, C, H, W) -> (N*OH*OW, C*KH*KW), column order (c, kh, kw)."""
    n, c, h, w = x.shape
    oh = (h - kh) // stride + 1
    ow = (w - kw) // stride + 1
    cols = []
    for i in range(kh):
        for j in range(kw):
            cols.append(x[:, :, i:i + stride * oh:stride, j:j + stride * ow:stride])
    p = jnp.stack(cols, axis=2)              # (n, c, kh*kw, oh, ow)
    p = jnp.transpose(p, (0, 3, 4, 1, 2))    # (n, oh, ow, c, kh*kw)
    return p.reshape(n * oh * ow, c * kh * kw), oh, ow


def _build_selectors(n, oh1, ow1, oh2, ow2):
    """Constant 0/1 gather matrices for conv2 (4x4 s2) and conv3 (3x3 s1 -> 1x1)."""
    p2 = np.zeros((16, n * oh2 * ow2, n * oh1 * ow1), np.float32)
    for i in range(4):
        for j in range(4):
            t = i * 4 + j
            for b in range(n):
                for oh in range(oh2):
                    for ow in range(ow2):
                        r_out = b * oh2 * ow2 + oh * ow2 + ow
                        r_in = b * oh1 * ow1 + (oh * 2 + i) * ow1 + (ow * 2 + j)
                        p2[t, r_out, r_in] = 1.0
    # conv3: 3x3 stride 1 over a 3x3 map -> single output position; tap t reads row t.
    p3 = np.zeros((oh2 * ow2, n, n * oh2 * ow2), np.float32)
    for t in range(oh2 * ow2):
        for b in range(n):
            p3[t, b, b * oh2 * ow2 + t] = 1.0
    return jnp.asarray(p2), jnp.asarray(p3)


def _uniform(key, shape, fan_in):
    bound = 1.0 / np.sqrt(fan_in)
    return jax.random.uniform(key, shape, jnp.float32, -bound, bound)


def init_params(key, in_ch, n_actions, conv_out_size):
    """Torch-layout parameters (conv: (OC, IC, KH, KW); linear: (out, in))."""
    ks = jax.random.split(key, 14)
    p = {}
    p["conv1_w"] = _uniform(ks[0], (32, in_ch, 8, 8), in_ch * 64)
    p["conv1_b"] = _uniform(ks[1], (32,), in_ch * 64)
    p["conv2_w"] = _uniform(ks[2], (64, 32, 4, 4), 32 * 16)
    p["conv2_b"] = _uniform(ks[3], (64,), 32 * 16)
    p["conv3_w"] = _uniform(ks[4], (64, 64, 3, 3), 64 * 9)
    p["conv3_b"] = _uniform(ks[5], (64,), 64 * 9)
    p["fcv1_w"] = _uniform(ks[6], (512, conv_out_size), conv_out_size)
    p["fcv1_b"] = _uniform(ks[7], (512,), conv_out_size)
    p["fcv2_w"] = _uniform(ks[8], (1, 512), 512)
    p["fcv2_b"] = _uniform(ks[9], (1,), 512)
    p["fca1_w"] = _uniform(ks[10], (512, conv_out_size), conv_out_size)
    p["fca1_b"] = _uniform(ks[11], (512,), conv_out_size)
    p["fca2_w"] = _uniform(ks[12], (n_actions, 512), 512)
    p["fca2_b"] = _uniform(ks[13], (n_actions,), 512)
    return p


def prepare_fused_params(p):
    """One-time packing of torch-layout params into kernel-friendly matrices."""
    f = {}
    # conv1: rows ordered (c, kh, kw); fold the 1/256 input scale into the weight.
    f["w1"] = jnp.transpose(p["conv1_w"], (1, 2, 3, 0)).reshape(-1, 32) / 256.0
    f["b1"] = p["conv1_b"][None, :]
    # conv2/conv3: per-tap (IC, OC) blocks, tap index = kh*KW + kw.
    f["w2"] = jnp.transpose(p["conv2_w"], (2, 3, 1, 0)).reshape(16, 32, 64)
    f["b2"] = p["conv2_b"][None, :]
    f["w3"] = jnp.transpose(p["conv3_w"], (2, 3, 1, 0)).reshape(9, 64, 64)
    f["b3"] = p["conv3_b"][None, :]
    # Dueling head: concatenated hidden weight (lane-dense 1024) + block-diagonal
    # second stage producing [value | advantage] in one matmul.
    f["wh1"] = jnp.concatenate([p["fcv1_w"].T, p["fca1_w"].T], axis=1)      # (co, 1024)
    f["bh1"] = jnp.concatenate([p["fcv1_b"], p["fca1_b"]])[None, :]         # (1, 1024)
    n_actions = p["fca2_w"].shape[0]
    wh2 = jnp.zeros((1024, 1 + n_actions), jnp.float32)
    wh2 = wh2.at[:512, 0:1].set(p["fcv2_w"].T)
    wh2 = wh2.at[512:, 1:].set(p["fca2_w"].T)
    f["wh2"] = wh2
    f["bh2"] = jnp.concatenate([p["fcv2_b"], p["fca2_b"]])[None, :]         # (1, 1+A)
    return f


def network_forward(x_nchw, packed):
    """x_nchw: (N, C, H, W) raw (un-scaled) input, like the PyTorch module."""
    n, _, h, w = x_nchw.shape
    oh1, ow1 = (h - 8) // 4 + 1, (w - 8) // 4 + 1
    oh2, ow2 = (oh1 - 4) // 2 + 1, (ow1 - 4) // 2 + 1
    oh3, ow3 = oh2 - 3 + 1, ow2 - 3 + 1
    # TODO(synk): generalize the head-input fold for conv3 spatial output > 1x1
    # (requires folding the channel-major flatten into wh1 row order).
    assert (oh3, ow3) == (1, 1), "fused kernel assumes conv3 output is 1x1"

    # Only XLA-level preprocessing left: im2col of the raw input for conv1.
    a1, _, _ = im2col_nchw(x_nchw.astype(jnp.float32), 8, 8, 4)
    p2, p3 = _build_selectors(n, oh1, ow1, oh2, ow2)
    n_actions = packed["bh2"].shape[1] - 1
    return _fused_call(a1, packed, p2, p3, n, n_actions)


# ----------------------------------------------------------------------------
# Pure-JAX reference (independent path: real convolutions via lax.conv).
# ----------------------------------------------------------------------------
def reference_forward(x_nchw, p):
    fx = x_nchw.astype(jnp.float32) / 256.0

    def conv(h, w, b, stride):
        o = jax.lax.conv_general_dilated(
            h, w, (stride, stride), "VALID",
            dimension_numbers=("NCHW", "OIHW", "NCHW"))
        return jnp.maximum(o + b[None, :, None, None], 0.0)

    h = conv(fx, p["conv1_w"], p["conv1_b"], 4)
    h = conv(h, p["conv2_w"], p["conv2_b"], 2)
    h = conv(h, p["conv3_w"], p["conv3_b"], 1)
    co = h.reshape(h.shape[0], -1)
    hv = jnp.maximum(co @ p["fcv1_w"].T + p["fcv1_b"], 0.0)
    value = hv @ p["fcv2_w"].T + p["fcv2_b"]
    ha = jnp.maximum(co @ p["fca1_w"].T + p["fca1_b"], 0.0)
    adv = ha @ p["fca2_w"].T + p["fca2_b"]
    return value + adv - jnp.mean(adv)


if __name__ == "__main__":
    key = jax.random.PRNGKey(0)
    k_x, k_p = jax.random.split(key)

    # Small Atari-like config: input_shape = (4, 36, 36), n_actions = 6.
    # Conv output spatial: 36 -> 8 -> 3 -> 1, so conv_out_size = 64 * 1 * 1 = 64.
    in_ch, height, width, n_actions = 4, 36, 36, 6
    conv_out_size = 64

    x = jax.random.uniform(k_x, (2, in_ch, height, width), jnp.float32, 0.0, 255.0)
    params = init_params(k_p, in_ch, n_actions, conv_out_size)
    packed = prepare_fused_params(params)

    fwd = jax.jit(network_forward)
    out = jax.block_until_ready(fwd(x, packed))

    ref = reference_forward(x, params)
    np.testing.assert_allclose(np.asarray(out), np.asarray(ref), rtol=1e-3, atol=1e-3)
    assert out.shape == (2, n_actions)
    assert bool(jnp.all(jnp.isfinite(out)))

    print("KERNEL_OK")
</pallas_src>

<mosaic_0001>
module attributes {stable_mosaic.version = 11 : i64} {
  func.func @_fused_dqn_kernel(%arg0: i32, %arg1: memref<128x256xf32, #tpu.memory_space<vmem>>, %arg2: memref<256x32xf32, #tpu.memory_space<vmem>>, %arg3: memref<1x32xf32, #tpu.memory_space<vmem>>, %arg4: memref<16x18x128xf32, #tpu.memory_space<vmem>>, %arg5: memref<16x32x64xf32, #tpu.memory_space<vmem>>, %arg6: memref<1x64xf32, #tpu.memory_space<vmem>>, %arg7: memref<9x2x18xf32, #tpu.memory_space<vmem>>, %arg8: memref<9x64x64xf32, #tpu.memory_space<vmem>>, %arg9: memref<1x64xf32, #tpu.memory_space<vmem>>, %arg10: memref<64x1024xf32, #tpu.memory_space<vmem>>, %arg11: memref<1x1024xf32, #tpu.memory_space<vmem>>, %arg12: memref<1024x7xf32, #tpu.memory_space<vmem>>, %arg13: memref<1x7xf32, #tpu.memory_space<vmem>>, %arg14: memref<2x6xf32, #tpu.memory_space<vmem>>) attributes {dimension_semantics = [#tpu.dimension_semantics<arbitrary>], iteration_bounds = array<i64: 1>, scalar_prefetch = 0 : i64, scratch_operands = 0 : i64, tpu.core_type = #tpu.core_type<tc>, window_params = [{pipeline_mode = #tpu.pipeline_mode<synchronous>, transform_indices = @transform_0, window_bounds = array<i64: 128, 256>}, {pipeline_mode = #tpu.pipeline_mode<synchronous>, transform_indices = @transform_1, window_bounds = array<i64: 256, 32>}, {pipeline_mode = #tpu.pipeline_mode<synchronous>, transform_indices = @transform_2, window_bounds = array<i64: 1, 32>}, {pipeline_mode = #tpu.pipeline_mode<synchronous>, transform_indices = @transform_3, window_bounds = array<i64: 16, 18, 128>}, {pipeline_mode = #tpu.pipeline_mode<synchronous>, transform_indices = @transform_4, window_bounds = array<i64: 16, 32, 64>}, {pipeline_mode = #tpu.pipeline_mode<synchronous>, transform_indices = @transform_5, window_bounds = array<i64: 1, 64>}, {pipeline_mode = #tpu.pipeline_mode<synchronous>, transform_indices = @transform_6, window_bounds = array<i64: 9, 2, 18>}, {pipeline_mode = #tpu.pipeline_mode<synchronous>, transform_indices = @transform_7, window_bounds = array<i64: 9, 64, 64>}, {pipeline_mode = #tpu.pipeline_mode<synchronous>, transform_indices = @transform_8, window_bounds = array<i64: 1, 64>}, {pipeline_mode = #tpu.pipeline_mode<synchronous>, transform_indices = @transform_9, window_bounds = array<i64: 64, 1024>}, {pipeline_mode = #tpu.pipeline_mode<synchronous>, transform_indices = @transform_10, window_bounds = array<i64: 1, 1024>}, {pipeline_mode = #tpu.pipeline_mode<synchronous>, transform_indices = @transform_11, window_bounds = array<i64: 1024, 7>}, {pipeline_mode = #tpu.pipeline_mode<synchronous>, transform_indices = @transform_12, window_bounds = array<i64: 1, 7>}, {pipeline_mode = #tpu.pipeline_mode<synchronous>, transform_indices = @transform_13, window_bounds = array<i64: 2, 6>}]} {
    %c0 = arith.constant 0 : index
    %c0_0 = arith.constant 0 : index
    %0 = vector.load %arg1[%c0, %c0_0] : memref<128x256xf32, #tpu.memory_space<vmem>>, vector<128x256xf32>
    %c0_1 = arith.constant 0 : index
    %c0_2 = arith.constant 0 : index
    %1 = vector.load %arg2[%c0_1, %c0_2] : memref<256x32xf32, #tpu.memory_space<vmem>>, vector<256x32xf32>
    %cst = arith.constant dense<0.000000e+00> : vector<128x32xf32>
    %2 = tpu.matmul %0, %1, %cst {dimension_numbers = #tpu.dot_dimension_numbers<[1], [0], [0], [1], [0, 0, 1, 1], [], []>} : vector<128x256xf32>, vector<256x32xf32>, vector<128x32xf32> -> vector<128x32xf32>
    %c0_3 = arith.constant 0 : index
    %c0_4 = arith.constant 0 : index
    %3 = vector.load %arg3[%c0_3, %c0_4] : memref<1x32xf32, #tpu.memory_space<vmem>>, vector<1x32xf32>
    %4 = vector.broadcast %3 : vector<1x32xf32> to vector<128x32xf32>
    %5 = arith.addf %2, %4 : vector<128x32xf32>
    %cst_5 = arith.constant 0.000000e+00 : f32
    %6 = vector.broadcast %cst_5 : f32 to vector<128x32xf32>
    %7 = arith.maximumf %5, %6 : vector<128x32xf32>
    %cst_6 = arith.constant 0.000000e+00 : f32
    %8 = vector.broadcast %cst_6 : f32 to vector<18x64xf32>
    %c0_7 = arith.constant 0 : index
    %c0_8 = arith.constant 0 : index
    %c0_9 = arith.constant 0 : index
    %9 = vector.load %arg4[%c0_7, %c0_8, %c0_9] : memref<16x18x128xf32, #tpu.memory_space<vmem>>, vector<1x18x128xf32>
    %10 = vector.shape_cast %9 : vector<1x18x128xf32> to vector<18x128xf32>
    %cst_10 = arith.constant dense<0.000000e+00> : vector<18x32xf32>
    %11 = tpu.matmul %10, %7, %cst_10 {dimension_numbers = #tpu.dot_dimension_numbers<[1], [0], [0], [1], [0, 0, 1, 1], [], []>} : vector<18x128xf32>, vector<128x32xf32>, vector<18x32xf32> -> vector<18x32xf32>
    %c0_11 = arith.constant 0 : index
    %c0_12 = arith.constant 0 : index
    %c0_13 = arith.constant 0 : index
    %12 = vector.load %arg5[%c0_11, %c0_12, %c0_13] : memref<16x32x64xf32, #tpu.memory_space<vmem>>, vector<1x32x64xf32>
    %13 = vector.shape_cast %12 : vector<1x32x64xf32> to vector<32x64xf32>
    %cst_14 = arith.constant dense<0.000000e+00> : vector<18x64xf32>
    %14 = tpu.matmul %11, %13, %cst_14 {dimension_numbers = #tpu.dot_dimension_numbers<[1], [0], [0], [1], [0, 0, 1, 1], [], []>} : vector<18x32xf32>, vector<32x64xf32>, vector<18x64xf32> -> vector<18x64xf32>
    %15 = arith.addf %8, %14 : vector<18x64xf32>
    %c1 = arith.constant 1 : index
    %c0_15 = arith.constant 0 : index
    %c0_16 = arith.constant 0 : index
    %16 = vector.load %arg4[%c1, %c0_15, %c0_16] : memref<16x18x128xf32, #tpu.memory_space<vmem>>, vector<1x18x128xf32>
    %17 = vector.shape_cast %16 : vector<1x18x128xf32> to vector<18x128xf32>
    %cst_17 = arith.constant dense<0.000000e+00> : vector<18x32xf32>
    %18 = tpu.matmul %17, %7, %cst_17 {dimension_numbers = #tpu.dot_dimension_numbers<[1], [0], [0], [1], [0, 0, 1, 1], [], []>} : vector<18x128xf32>, vector<128x32xf32>, vector<18x32xf32> -> vector<18x32xf32>
    %c1_18 = arith.constant 1 : index
    %c0_19 = arith.constant 0 : index
    %c0_20 = arith.constant 0 : index
    %19 = vector.load %arg5[%c1_18, %c0_19, %c0_20] : memref<16x32x64xf32, #tpu.memory_space<vmem>>, vector<1x32x64xf32>
    %20 = vector.shape_cast %19 : vector<1x32x64xf32> to vector<32x64xf32>
    %cst_21 = arith.constant dense<0.000000e+00> : vector<18x64xf32>
    %21 = tpu.matmul %18, %20, %cst_21 {dimension_numbers = #tpu.dot_dimension_numbers<[1], [0], [0], [1], [0, 0, 1, 1], [], []>} : vector<18x32xf32>, vector<32x64xf32>, vector<18x64xf32> -> vector<18x64xf32>
    %22 = arith.addf %15, %21 : vector<18x64xf32>
    %c2 = arith.constant 2 : index
    %c0_22 = arith.constant 0 : index
    %c0_23 = arith.constant 0 : index
    %23 = vector.load %arg4[%c2, %c0_22, %c0_23] : memref<16x18x128xf32, #tpu.memory_space<vmem>>, vector<1x18x128xf32>
    %24 = vector.shape_cast %23 : vector<1x18x128xf32> to vector<18x128xf32>
    %cst_24 = arith.constant dense<0.000000e+00> : vector<18x32xf32>
    %25 = tpu.matmul %24, %7, %cst_24 {dimension_numbers = #tpu.dot_dimension_numbers<[1], [0], [0], [1], [0, 0, 1, 1], [], []>} : vector<18x128xf32>, vector<128x32xf32>, vector<18x32xf32> -> vector<18x32xf32>
    %c2_25 = arith.constant 2 : index
    %c0_26 = arith.constant 0 : index
    %c0_27 = arith.constant 0 : index
    %26 = vector.load %arg5[%c2_25, %c0_26, %c0_27] : memref<16x32x64xf32, #tpu.memory_space<vmem>>, vector<1x32x64xf32>
    %27 = vector.shape_cast %26 : vector<1x32x64xf32> to vector<32x64xf32>
    %cst_28 = arith.constant dense<0.000000e+00> : vector<18x64xf32>
    %28 = tpu.matmul %25, %27, %cst_28 {dimension_numbers = #tpu.dot_dimension_numbers<[1], [0], [0], [1], [0, 0, 1, 1], [], []>} : vector<18x32xf32>, vector<32x64xf32>, vector<18x64xf32> -> vector<18x64xf32>
    %29 = arith.addf %22, %28 : vector<18x64xf32>
    %c3 = arith.constant 3 : index
    %c0_29 = arith.constant 0 : index
    %c0_30 = arith.constant 0 : index
    %30 = vector.load %arg4[%c3, %c0_29, %c0_30] : memref<16x18x128xf32, #tpu.memory_space<vmem>>, vector<1x18x128xf32>
    %31 = vector.shape_cast %30 : vector<1x18x128xf32> to vector<18x128xf32>
    %cst_31 = arith.constant dense<0.000000e+00> : vector<18x32xf32>
    %32 = tpu.matmul %31, %7, %cst_31 {dimension_numbers = #tpu.dot_dimension_numbers<[1], [0], [0], [1], [0, 0, 1, 1], [], []>} : vector<18x128xf32>, vector<128x32xf32>, vector<18x32xf32> -> vector<18x32xf32>
    %c3_32 = arith.constant 3 : index
    %c0_33 = arith.constant 0 : index
    %c0_34 = arith.constant 0 : index
    %33 = vector.load %arg5[%c3_32, %c0_33, %c0_34] : memref<16x32x64xf32, #tpu.memory_space<vmem>>, vector<1x32x64xf32>
    %34 = vector.shape_cast %33 : vector<1x32x64xf32> to vector<32x64xf32>
    %cst_35 = arith.constant dense<0.000000e+00> : vector<18x64xf32>
    %35 = tpu.matmul %32, %34, %cst_35 {dimension_numbers = #tpu.dot_dimension_numbers<[1], [0], [0], [1], [0, 0, 1, 1], [], []>} : vector<18x32xf32>, vector<32x64xf32>, vector<18x64xf32> -> vector<18x64xf32>
    %36 = arith.addf %29, %35 : vector<18x64xf32>
    %c4 = arith.constant 4 : index
    %c0_36 = arith.constant 0 : index
    %c0_37 = arith.constant 0 : index
    %37 = vector.load %arg4[%c4, %c0_36, %c0_37] : memref<16x18x128xf32, #tpu.memory_space<vmem>>, vector<1x18x128xf32>
    %38 = vector.shape_cast %37 : vector<1x18x128xf32> to vector<18x128xf32>
    %cst_38 = arith.constant dense<0.000000e+00> : vector<18x32xf32>
    %39 = tpu.matmul %38, %7, %cst_38 {dimension_numbers = #tpu.dot_dimension_numbers<[1], [0], [0], [1], [0, 0, 1, 1], [], []>} : vector<18x128xf32>, vector<128x32xf32>, vector<18x32xf32> -> vector<18x32xf32>
    %c4_39 = arith.constant 4 : index
    %c0_40 = arith.constant 0 : index
    %c0_41 = arith.constant 0 : index
    %40 = vector.load %arg5[%c4_39, %c0_40, %c0_41] : memref<16x32x64xf32, #tpu.memory_space<vmem>>, vector<1x32x64xf32>
    %41 = vector.shape_cast %40 : vector<1x32x64xf32> to vector<32x64xf32>
    %cst_42 = arith.constant dense<0.000000e+00> : vector<18x64xf32>
    %42 = tpu.matmul %39, %41, %cst_42 {dimension_numbers = #tpu.dot_dimension_numbers<[1], [0], [0], [1], [0, 0, 1, 1], [], []>} : vector<18x32xf32>, vector<32x64xf32>, vector<18x64xf32> -> vector<18x64xf32>
    %43 = arith.addf %36, %42 : vector<18x64xf32>
    %c5 = arith.constant 5 : index
    %c0_43 = arith.constant 0 : index
    %c0_44 = arith.constant 0 : index
    %44 = vector.load %arg4[%c5, %c0_43, %c0_44] : memref<16x18x128xf32, #tpu.memory_space<vmem>>, vector<1x18x128xf32>
    %45 = vector.shape_cast %44 : vector<1x18x128xf32> to vector<18x128xf32>
    %cst_45 = arith.constant dense<0.000000e+00> : vector<18x32xf32>
    %46 = tpu.matmul %45, %7, %cst_45 {dimension_numbers = #tpu.dot_dimension_numbers<[1], [0], [0], [1], [0, 0, 1, 1], [], []>} : vector<18x128xf32>, vector<128x32xf32>, vector<18x32xf32> -> vector<18x32xf32>
    %c5_46 = arith.constant 5 : index
    %c0_47 = arith.constant 0 : index
    %c0_48 = arith.constant 0 : index
    %47 = vector.load %arg5[%c5_46, %c0_47, %c0_48] : memref<16x32x64xf32, #tpu.memory_space<vmem>>, vector<1x32x64xf32>
    %48 = vector.shape_cast %47 : vector<1x32x64xf32> to vector<32x64xf32>
    %cst_49 = arith.constant dense<0.000000e+00> : vector<18x64xf32>
    %49 = tpu.matmul %46, %48, %cst_49 {dimension_numbers = #tpu.dot_dimension_numbers<[1], [0], [0], [1], [0, 0, 1, 1], [], []>} : vector<18x32xf32>, vector<32x64xf32>, vector<18x64xf32> -> vector<18x64xf32>
    %50 = arith.addf %43, %49 : vector<18x64xf32>
    %c6 = arith.constant 6 : index
    %c0_50 = arith.constant 0 : index
    %c0_51 = arith.constant 0 : index
    %51 = vector.load %arg4[%c6, %c0_50, %c0_51] : memref<16x18x128xf32, #tpu.memory_space<vmem>>, vector<1x18x128xf32>
    %52 = vector.shape_cast %51 : vector<1x18x128xf32> to vector<18x128xf32>
    %cst_52 = arith.constant dense<0.000000e+00> : vector<18x32xf32>
    %53 = tpu.matmul %52, %7, %cst_52 {dimension_numbers = #tpu.dot_dimension_numbers<[1], [0], [0], [1], [0, 0, 1, 1], [], []>} : vector<18x128xf32>, vector<128x32xf32>, vector<18x32xf32> -> vector<18x32xf32>
    %c6_53 = arith.constant 6 : index
    %c0_54 = arith.constant 0 : index
    %c0_55 = arith.constant 0 : index
    %54 = vector.load %arg5[%c6_53, %c0_54, %c0_55] : memref<16x32x64xf32, #tpu.memory_space<vmem>>, vector<1x32x64xf32>
    %55 = vector.shape_cast %54 : vector<1x32x64xf32> to vector<32x64xf32>
    %cst_56 = arith.constant dense<0.000000e+00> : vector<18x64xf32>
    %56 = tpu.matmul %53, %55, %cst_56 {dimension_numbers = #tpu.dot_dimension_numbers<[1], [0], [0], [1], [0, 0, 1, 1], [], []>} : vector<18x32xf32>, vector<32x64xf32>, vector<18x64xf32> -> vector<18x64xf32>
    %57 = arith.addf %50, %56 : vector<18x64xf32>
    %c7 = arith.constant 7 : index
    %c0_57 = arith.constant 0 : index
    %c0_58 = arith.constant 0 : index
    %58 = vector.load %arg4[%c7, %c0_57, %c0_58] : memref<16x18x128xf32, #tpu.memory_space<vmem>>, vector<1x18x128xf32>
    %59 = vector.shape_cast %58 : vector<1x18x128xf32> to vector<18x128xf32>
    %cst_59 = arith.constant dense<0.000000e+00> : vector<18x32xf32>
    %60 = tpu.matmul %59, %7, %cst_59 {dimension_numbers = #tpu.dot_dimension_numbers<[1], [0], [0], [1], [0, 0, 1, 1], [], []>} : vector<18x128xf32>, vector<128x32xf32>, vector<18x32xf32> -> vector<18x32xf32>
    %c7_60 = arith.constant 7 : index
    %c0_61 = arith.constant 0 : index
    %c0_62 = arith.constant 0 : index
    %61 = vector.load %arg5[%c7_60, %c0_61, %c0_62] : memref<16x32x64xf32, #tpu.memory_space<vmem>>, vector<1x32x64xf32>
    %62 = vector.shape_cast %61 : vector<1x32x64xf32> to vector<32x64xf32>
    %cst_63 = arith.constant dense<0.000000e+00> : vector<18x64xf32>
    %63 = tpu.matmul %60, %62, %cst_63 {dimension_numbers = #tpu.dot_dimension_numbers<[1], [0], [0], [1], [0, 0, 1, 1], [], []>} : vector<18x32xf32>, vector<32x64xf32>, vector<18x64xf32> -> vector<18x64xf32>
    %64 = arith.addf %57, %63 : vector<18x64xf32>
    %c8 = arith.constant 8 : index
    %c0_64 = arith.constant 0 : index
    %c0_65 = arith.constant 0 : index
    %65 = vector.load %arg4[%c8, %c0_64, %c0_65] : memref<16x18x128xf32, #tpu.memory_space<vmem>>, vector<1x18x128xf32>
    %66 = vector.shape_cast %65 : vector<1x18x128xf32> to vector<18x128xf32>
    %cst_66 = arith.constant dense<0.000000e+00> : vector<18x32xf32>
    %67 = tpu.matmul %66, %7, %cst_66 {dimension_numbers = #tpu.dot_dimension_numbers<[1], [0], [0], [1], [0, 0, 1, 1], [], []>} : vector<18x128xf32>, vector<128x32xf32>, vector<18x32xf32> -> vector<18x32xf32>
    %c8_67 = arith.constant 8 : index
    %c0_68 = arith.constant 0 : index
    %c0_69 = arith.constant 0 : index
    %68 = vector.load %arg5[%c8_67, %c0_68, %c0_69] : memref<16x32x64xf32, #tpu.memory_space<vmem>>, vector<1x32x64xf32>
    %69 = vector.shape_cast %68 : vector<1x32x64xf32> to vector<32x64xf32>
    %cst_70 = arith.constant dense<0.000000e+00> : vector<18x64xf32>
    %70 = tpu.matmul %67, %69, %cst_70 {dimension_numbers = #tpu.dot_dimension_numbers<[1], [0], [0], [1], [0, 0, 1, 1], [], []>} : vector<18x32xf32>, vector<32x64xf32>, vector<18x64xf32> -> vector<18x64xf32>
    %71 = arith.addf %64, %70 : vector<18x64xf32>
    %c9 = arith.constant 9 : index
    %c0_71 = arith.constant 0 : index
    %c0_72 = arith.constant 0 : index
    %72 = vector.load %arg4[%c9, %c0_71, %c0_72] : memref<16x18x128xf32, #tpu.memory_space<vmem>>, vector<1x18x128xf32>
    %73 = vector.shape_cast %72 : vector<1x18x128xf32> to vector<18x128xf32>
    %cst_73 = arith.constant dense<0.000000e+00> : vector<18x32xf32>
    %74 = tpu.matmul %73, %7, %cst_73 {dimension_numbers = #tpu.dot_dimension_numbers<[1], [0], [0], [1], [0, 0, 1, 1], [], []>} : vector<18x128xf32>, vector<128x32xf32>, vector<18x32xf32> -> vector<18x32xf32>
    %c9_74 = arith.constant 9 : index
    %c0_75 = arith.constant 0 : index
    %c0_76 = arith.constant 0 : index
    %75 = vector.load %arg5[%c9_74, %c0_75, %c0_76] : memref<16x32x64xf32, #tpu.memory_space<vmem>>, vector<1x32x64xf32>
    %76 = vector.shape_cast %75 : vector<1x32x64xf32> to vector<32x64xf32>
    %cst_77 = arith.constant dense<0.000000e+00> : vector<18x64xf32>
    %77 = tpu.matmul %74, %76, %cst_77 {dimension_numbers = #tpu.dot_dimension_numbers<[1], [0], [0], [1], [0, 0, 1, 1], [], []>} : vector<18x32xf32>, vector<32x64xf32>, vector<18x64xf32> -> vector<18x64xf32>
    %78 = arith.addf %71, %77 : vector<18x64xf32>
    %c10 = arith.constant 10 : index
    %c0_78 = arith.constant 0 : index
    %c0_79 = arith.constant 0 : index
    %79 = vector.load %arg4[%c10, %c0_78, %c0_79] : memref<16x18x128xf32, #tpu.memory_space<vmem>>, vector<1x18x128xf32>
    %80 = vector.shape_cast %79 : vector<1x18x128xf32> to vector<18x128xf32>
    %cst_80 = arith.constant dense<0.000000e+00> : vector<18x32xf32>
    %81 = tpu.matmul %80, %7, %cst_80 {dimension_numbers = #tpu.dot_dimension_numbers<[1], [0], [0], [1], [0, 0, 1, 1], [], []>} : vector<18x128xf32>, vector<128x32xf32>, vector<18x32xf32> -> vector<18x32xf32>
    %c10_81 = arith.constant 10 : index
    %c0_82 = arith.constant 0 : index
    %c0_83 = arith.constant 0 : index
    %82 = vector.load %arg5[%c10_81, %c0_82, %c0_83] : memref<16x32x64xf32, #tpu.memory_space<vmem>>, vector<1x32x64xf32>
    %83 = vector.shape_cast %82 : vector<1x32x64xf32> to vector<32x64xf32>
    %cst_84 = arith.constant dense<0.000000e+00> : vector<18x64xf32>
    %84 = tpu.matmul %81, %83, %cst_84 {dimension_numbers = #tpu.dot_dimension_numbers<[1], [0], [0], [1], [0, 0, 1, 1], [], []>} : vector<18x32xf32>, vector<32x64xf32>, vector<18x64xf32> -> vector<18x64xf32>
    %85 = arith.addf %78, %84 : vector<18x64xf32>
    %c11 = arith.constant 11 : index
    %c0_85 = arith.constant 0 : index
    %c0_86 = arith.constant 0 : index
    %86 = vector.load %arg4[%c11, %c0_85, %c0_86] : memref<16x18x128xf32, #tpu.memory_space<vmem>>, vector<1x18x128xf32>
    %87 = vector.shape_cast %86 : vector<1x18x128xf32> to vector<18x128xf32>
    %cst_87 = arith.constant dense<0.000000e+00> : vector<18x32xf32>
    %88 = tpu.matmul %87, %7, %cst_87 {dimension_numbers = #tpu.dot_dimension_numbers<[1], [0], [0], [1], [0, 0, 1, 1], [], []>} : vector<18x128xf32>, vector<128x32xf32>, vector<18x32xf32> -> vector<18x32xf32>
    %c11_88 = arith.constant 11 : index
    %c0_89 = arith.constant 0 : index
    %c0_90 = arith.constant 0 : index
    %89 = vector.load %arg5[%c11_88, %c0_89, %c0_90] : memref<16x32x64xf32, #tpu.memory_space<vmem>>, vector<1x32x64xf32>
    %90 = vector.shape_cast %89 : vector<1x32x64xf32> to vector<32x64xf32>
    %cst_91 = arith.constant dense<0.000000e+00> : vector<18x64xf32>
    %91 = tpu.matmul %88, %90, %cst_91 {dimension_numbers = #tpu.dot_dimension_numbers<[1], [0], [0], [1], [0, 0, 1, 1], [], []>} : vector<18x32xf32>, vector<32x64xf32>, vector<18x64xf32> -> vector<18x64xf32>
    %92 = arith.addf %85, %91 : vector<18x64xf32>
    %c12 = arith.constant 12 : index
    %c0_92 = arith.constant 0 : index
    %c0_93 = arith.constant 0 : index
    %93 = vector.load %arg4[%c12, %c0_92, %c0_93] : memref<16x18x128xf32, #tpu.memory_space<vmem>>, vector<1x18x128xf32>
    %94 = vector.shape_cast %93 : vector<1x18x128xf32> to vector<18x128xf32>
    %cst_94 = arith.constant dense<0.000000e+00> : vector<18x32xf32>
    %95 = tpu.matmul %94, %7, %cst_94 {dimension_numbers = #tpu.dot_dimension_numbers<[1], [0], [0], [1], [0, 0, 1, 1], [], []>} : vector<18x128xf32>, vector<128x32xf32>, vector<18x32xf32> -> vector<18x32xf32>
    %c12_95 = arith.constant 12 : index
    %c0_96 = arith.constant 0 : index
    %c0_97 = arith.constant 0 : index
    %96 = vector.load %arg5[%c12_95, %c0_96, %c0_97] : memref<16x32x64xf32, #tpu.memory_space<vmem>>, vector<1x32x64xf32>
    %97 = vector.shape_cast %96 : vector<1x32x64xf32> to vector<32x64xf32>
    %cst_98 = arith.constant dense<0.000000e+00> : vector<18x64xf32>
    %98 = tpu.matmul %95, %97, %cst_98 {dimension_numbers = #tpu.dot_dimension_numbers<[1], [0], [0], [1], [0, 0, 1, 1], [], []>} : vector<18x32xf32>, vector<32x64xf32>, vector<18x64xf32> -> vector<18x64xf32>
    %99 = arith.addf %92, %98 : vector<18x64xf32>
    %c13 = arith.constant 13 : index
    %c0_99 = arith.constant 0 : index
    %c0_100 = arith.constant 0 : index
    %100 = vector.load %arg4[%c13, %c0_99, %c0_100] : memref<16x18x128xf32, #tpu.memory_space<vmem>>, vector<1x18x128xf32>
    %101 = vector.shape_cast %100 : vector<1x18x128xf32> to vector<18x128xf32>
    %cst_101 = arith.constant dense<0.000000e+00> : vector<18x32xf32>
    %102 = tpu.matmul %101, %7, %cst_101 {dimension_numbers = #tpu.dot_dimension_numbers<[1], [0], [0], [1], [0, 0, 1, 1], [], []>} : vector<18x128xf32>, vector<128x32xf32>, vector<18x32xf32> -> vector<18x32xf32>
    %c13_102 = arith.constant 13 : index
    %c0_103 = arith.constant 0 : index
    %c0_104 = arith.constant 0 : index
    %103 = vector.load %arg5[%c13_102, %c0_103, %c0_104] : memref<16x32x64xf32, #tpu.memory_space<vmem>>, vector<1x32x64xf32>
    %104 = vector.shape_cast %103 : vector<1x32x64xf32> to vector<32x64xf32>
    %cst_105 = arith.constant dense<0.000000e+00> : vector<18x64xf32>
    %105 = tpu.matmul %102, %104, %cst_105 {dimension_numbers = #tpu.dot_dimension_numbers<[1], [0], [0], [1], [0, 0, 1, 1], [], []>} : vector<18x32xf32>, vector<32x64xf32>, vector<18x64xf32> -> vector<18x64xf32>
    %106 = arith.addf %99, %105 : vector<18x64xf32>
    %c14 = arith.constant 14 : index
    %c0_106 = arith.constant 0 : index
    %c0_107 = arith.constant 0 : index
    %107 = vector.load %arg4[%c14, %c0_106, %c0_107] : memref<16x18x128xf32, #tpu.memory_space<vmem>>, vector<1x18x128xf32>
    %108 = vector.shape_cast %107 : vector<1x18x128xf32> to vector<18x128xf32>
    %cst_108 = arith.constant dense<0.000000e+00> : vector<18x32xf32>
    %109 = tpu.matmul %108, %7, %cst_108 {dimension_numbers = #tpu.dot_dimension_numbers<[1], [0], [0], [1], [0, 0, 1, 1], [], []>} : vector<18x128xf32>, vector<128x32xf32>, vector<18x32xf32> -> vector<18x32xf32>
    %c14_109 = arith.constant 14 : index
    %c0_110 = arith.constant 0 : index
    %c0_111 = arith.constant 0 : index
    %110 = vector.load %arg5[%c14_109, %c0_110, %c0_111] : memref<16x32x64xf32, #tpu.memory_space<vmem>>, vector<1x32x64xf32>
    %111 = vector.shape_cast %110 : vector<1x32x64xf32> to vector<32x64xf32>
    %cst_112 = arith.constant dense<0.000000e+00> : vector<18x64xf32>
    %112 = tpu.matmul %109, %111, %cst_112 {dimension_numbers = #tpu.dot_dimension_numbers<[1], [0], [0], [1], [0, 0, 1, 1], [], []>} : vector<18x32xf32>, vector<32x64xf32>, vector<18x64xf32> -> vector<18x64xf32>
    %113 = arith.addf %106, %112 : vector<18x64xf32>
    %c15 = arith.constant 15 : index
    %c0_113 = arith.constant 0 : index
    %c0_114 = arith.constant 0 : index
    %114 = vector.load %arg4[%c15, %c0_113, %c0_114] : memref<16x18x128xf32, #tpu.memory_space<vmem>>, vector<1x18x128xf32>
    %115 = vector.shape_cast %114 : vector<1x18x128xf32> to vector<18x128xf32>
    %cst_115 = arith.constant dense<0.000000e+00> : vector<18x32xf32>
    %116 = tpu.matmul %115, %7, %cst_115 {dimension_numbers = #tpu.dot_dimension_numbers<[1], [0], [0], [1], [0, 0, 1, 1], [], []>} : vector<18x128xf32>, vector<128x32xf32>, vector<18x32xf32> -> vector<18x32xf32>
    %c15_116 = arith.constant 15 : index
    %c0_117 = arith.constant 0 : index
    %c0_118 = arith.constant 0 : index
    %117 = vector.load %arg5[%c15_116, %c0_117, %c0_118] : memref<16x32x64xf32, #tpu.memory_space<vmem>>, vector<1x32x64xf32>
    %118 = vector.shape_cast %117 : vector<1x32x64xf32> to vector<32x64xf32>
    %cst_119 = arith.constant dense<0.000000e+00> : vector<18x64xf32>
    %119 = tpu.matmul %116, %118, %cst_119 {dimension_numbers = #tpu.dot_dimension_numbers<[1], [0], [0], [1], [0, 0, 1, 1], [], []>} : vector<18x32xf32>, vector<32x64xf32>, vector<18x64xf32> -> vector<18x64xf32>
    %120 = arith.addf %113, %119 : vector<18x64xf32>
    %c0_120 = arith.constant 0 : index
    %c0_121 = arith.constant 0 : index
    %121 = vector.load %arg6[%c0_120, %c0_121] : memref<1x64xf32, #tpu.memory_space<vmem>>, vector<1x64xf32>
    %122 = vector.broadcast %121 : vector<1x64xf32> to vector<18x64xf32>
    %123 = arith.addf %120, %122 : vector<18x64xf32>
    %cst_122 = arith.constant 0.000000e+00 : f32
    %124 = vector.broadcast %cst_122 : f32 to vector<18x64xf32>
    %125 = arith.maximumf %123, %124 : vector<18x64xf32>
    %cst_123 = arith.constant 0.000000e+00 : f32
    %126 = vector.broadcast %cst_123 : f32 to vector<2x64xf32>
    %c0_124 = arith.constant 0 : index
    %c0_125 = arith.constant 0 : index
    %c0_126 = arith.constant 0 : index
    %127 = vector.load %arg7[%c0_124, %c0_125, %c0_126] : memref<9x2x18xf32, #tpu.memory_space<vmem>>, vector<1x2x18xf32>
    %128 = vector.shape_cast %127 : vector<1x2x18xf32> to vector<2x18xf32>
    %cst_127 = arith.constant dense<0.000000e+00> : vector<2x64xf32>
    %129 = tpu.matmul %128, %125, %cst_127 {dimension_numbers = #tpu.dot_dimension_numbers<[1], [0], [0], [1], [0, 0, 1, 1], [], []>} : vector<2x18xf32>, vector<18x64xf32>, vector<2x64xf32> -> vector<2x64xf32>
    %c0_128 = arith.constant 0 : index
    %c0_129 = arith.constant 0 : index
    %c0_130 = arith.constant 0 : index
    %130 = vector.load %arg8[%c0_128, %c0_129, %c0_130] : memref<9x64x64xf32, #tpu.memory_space<vmem>>, vector<1x64x64xf32>
    %131 = vector.shape_cast %130 : vector<1x64x64xf32> to vector<64x64xf32>
    %cst_131 = arith.constant dense<0.000000e+00> : vector<2x64xf32>
    %132 = tpu.matmul %129, %131, %cst_131 {dimension_numbers = #tpu.dot_dimension_numbers<[1], [0], [0], [1], [0, 0, 1, 1], [], []>} : vector<2x64xf32>, vector<64x64xf32>, vector<2x64xf32> -> vector<2x64xf32>
    %133 = arith.addf %126, %132 : vector<2x64xf32>
    %c1_132 = arith.constant 1 : index
    %c0_133 = arith.constant 0 : index
    %c0_134 = arith.constant 0 : index
    %134 = vector.load %arg7[%c1_132, %c0_133, %c0_134] : memref<9x2x18xf32, #tpu.memory_space<vmem>>, vector<1x2x18xf32>
    %135 = vector.shape_cast %134 : vector<1x2x18xf32> to vector<2x18xf32>
    %cst_135 = arith.constant dense<0.000000e+00> : vector<2x64xf32>
    %136 = tpu.matmul %135, %125, %cst_135 {dimension_numbers = #tpu.dot_dimension_numbers<[1], [0], [0], [1], [0, 0, 1, 1], [], []>} : vector<2x18xf32>, vector<18x64xf32>, vector<2x64xf32> -> vector<2x64xf32>
    %c1_136 = arith.constant 1 : index
    %c0_137 = arith.constant 0 : index
    %c0_138 = arith.constant 0 : index
    %137 = vector.load %arg8[%c1_136, %c0_137, %c0_138] : memref<9x64x64xf32, #tpu.memory_space<vmem>>, vector<1x64x64xf32>
    %138 = vector.shape_cast %137 : vector<1x64x64xf32> to vector<64x64xf32>
    %cst_139 = arith.constant dense<0.000000e+00> : vector<2x64xf32>
    %139 = tpu.matmul %136, %138, %cst_139 {dimension_numbers = #tpu.dot_dimension_numbers<[1], [0], [0], [1], [0, 0, 1, 1], [], []>} : vector<2x64xf32>, vector<64x64xf32>, vector<2x64xf32> -> vector<2x64xf32>
    %140 = arith.addf %133, %139 : vector<2x64xf32>
    %c2_140 = arith.constant 2 : index
    %c0_141 = arith.constant 0 : index
    %c0_142 = arith.constant 0 : index
    %141 = vector.load %arg7[%c2_140, %c0_141, %c0_142] : memref<9x2x18xf32, #tpu.memory_space<vmem>>, vector<1x2x18xf32>
    %142 = vector.shape_cast %141 : vector<1x2x18xf32> to vector<2x18xf32>
    %cst_143 = arith.constant dense<0.000000e+00> : vector<2x64xf32>
    %143 = tpu.matmul %142, %125, %cst_143 {dimension_numbers = #tpu.dot_dimension_numbers<[1], [0], [0], [1], [0, 0, 1, 1], [], []>} : vector<2x18xf32>, vector<18x64xf32>, vector<2x64xf32> -> vector<2x64xf32>
    %c2_144 = arith.constant 2 : index
    %c0_145 = arith.constant 0 : index
    %c0_146 = arith.constant 0 : index
    %144 = vector.load %arg8[%c2_144, %c0_145, %c0_146] : memref<9x64x64xf32, #tpu.memory_space<vmem>>, vector<1x64x64xf32>
    %145 = vector.shape_cast %144 : vector<1x64x64xf32> to vector<64x64xf32>
    %cst_147 = arith.constant dense<0.000000e+00> : vector<2x64xf32>
    %146 = tpu.matmul %143, %145, %cst_147 {dimension_numbers = #tpu.dot_dimension_numbers<[1], [0], [0], [1], [0, 0, 1, 1], [], []>} : vector<2x64xf32>, vector<64x64xf32>, vector<2x64xf32> -> vector<2x64xf32>
    %147 = arith.addf %140, %146 : vector<2x64xf32>
    %c3_148 = arith.constant 3 : index
    %c0_149 = arith.constant 0 : index
    %c0_150 = arith.constant 0 : index
    %148 = vector.load %arg7[%c3_148, %c0_149, %c0_150] : memref<9x2x18xf32, #tpu.memory_space<vmem>>, vector<1x2x18xf32>
    %149 = vector.shape_cast %148 : vector<1x2x18xf32> to vector<2x18xf32>
    %cst_151 = arith.constant dense<0.000000e+00> : vector<2x64xf32>
    %150 = tpu.matmul %149, %125, %cst_151 {dimension_numbers = #tpu.dot_dimension_numbers<[1], [0], [0], [1], [0, 0, 1, 1], [], []>} : vector<2x18xf32>, vector<18x64xf32>, vector<2x64xf32> -> vector<2x64xf32>
    %c3_152 = arith.constant 3 : index
    %c0_153 = arith.constant 0 : index
    %c0_154 = arith.constant 0 : index
    %151 = vector.load %arg8[%c3_152, %c0_153, %c0_154] : memref<9x64x64xf32, #tpu.memory_space<vmem>>, vector<1x64x64xf32>
    %152 = vector.shape_cast %151 : vector<1x64x64xf32> to vector<64x64xf32>
    %cst_155 = arith.constant dense<0.000000e+00> : vector<2x64xf32>
    %153 = tpu.matmul %150, %152, %cst_155 {dimension_numbers = #tpu.dot_dimension_numbers<[1], [0], [0], [1], [0, 0, 1, 1], [], []>} : vector<2x64xf32>, vector<64x64xf32>, vector<2x64xf32> -> vector<2x64xf32>
    %154 = arith.addf %147, %153 : vector<2x64xf32>
    %c4_156 = arith.constant 4 : index
    %c0_157 = arith.constant 0 : index
    %c0_158 = arith.constant 0 : index
    %155 = vector.load %arg7[%c4_156, %c0_157, %c0_158] : memref<9x2x18xf32, #tpu.memory_space<vmem>>, vector<1x2x18xf32>
    %156 = vector.shape_cast %155 : vector<1x2x18xf32> to vector<2x18xf32>
    %cst_159 = arith.constant dense<0.000000e+00> : vector<2x64xf32>
    %157 = tpu.matmul %156, %125, %cst_159 {dimension_numbers = #tpu.dot_dimension_numbers<[1], [0], [0], [1], [0, 0, 1, 1], [], []>} : vector<2x18xf32>, vector<18x64xf32>, vector<2x64xf32> -> vector<2x64xf32>
    %c4_160 = arith.constant 4 : index
    %c0_161 = arith.constant 0 : index
    %c0_162 = arith.constant 0 : index
    %158 = vector.load %arg8[%c4_160, %c0_161, %c0_162] : memref<9x64x64xf32, #tpu.memory_space<vmem>>, vector<1x64x64xf32>
    %159 = vector.shape_cast %158 : vector<1x64x64xf32> to vector<64x64xf32>
    %cst_163 = arith.constant dense<0.000000e+00> : vector<2x64xf32>
    %160 = tpu.matmul %157, %159, %cst_163 {dimension_numbers = #tpu.dot_dimension_numbers<[1], [0], [0], [1], [0, 0, 1, 1], [], []>} : vector<2x64xf32>, vector<64x64xf32>, vector<2x64xf32> -> vector<2x64xf32>
    %161 = arith.addf %154, %160 : vector<2x64xf32>
    %c5_164 = arith.constant 5 : index
    %c0_165 = arith.constant 0 : index
    %c0_166 = arith.constant 0 : index
    %162 = vector.load %arg7[%c5_164, %c0_165, %c0_166] : memref<9x2x18xf32, #tpu.memory_space<vmem>>, vector<1x2x18xf32>
    %163 = vector.shape_cast %162 : vector<1x2x18xf32> to vector<2x18xf32>
    %cst_167 = arith.constant dense<0.000000e+00> : vector<2x64xf32>
    %164 = tpu.matmul %163, %125, %cst_167 {dimension_numbers = #tpu.dot_dimension_numbers<[1], [0], [0], [1], [0, 0, 1, 1], [], []>} : vector<2x18xf32>, vector<18x64xf32>, vector<2x64xf32> -> vector<2x64xf32>
    %c5_168 = arith.constant 5 : index
    %c0_169 = arith.constant 0 : index
    %c0_170 = arith.constant 0 : index
    %165 = vector.load %arg8[%c5_168, %c0_169, %c0_170] : memref<9x64x64xf32, #tpu.memory_space<vmem>>, vector<1x64x64xf32>
    %166 = vector.shape_cast %165 : vector<1x64x64xf32> to vector<64x64xf32>
    %cst_171 = arith.constant dense<0.000000e+00> : vector<2x64xf32>
    %167 = tpu.matmul %164, %166, %cst_171 {dimension_numbers = #tpu.dot_dimension_numbers<[1], [0], [0], [1], [0, 0, 1, 1], [], []>} : vector<2x64xf32>, vector<64x64xf32>, vector<2x64xf32> -> vector<2x64xf32>
    %168 = arith.addf %161, %167 : vector<2x64xf32>
    %c6_172 = arith.constant 6 : index
    %c0_173 = arith.constant 0 : index
    %c0_174 = arith.constant 0 : index
    %169 = vector.load %arg7[%c6_172, %c0_173, %c0_174] : memref<9x2x18xf32, #tpu.memory_space<vmem>>, vector<1x2x18xf32>
    %170 = vector.shape_cast %169 : vector<1x2x18xf32> to vector<2x18xf32>
    %cst_175 = arith.constant dense<0.000000e+00> : vector<2x64xf32>
    %171 = tpu.matmul %170, %125, %cst_175 {dimension_numbers = #tpu.dot_dimension_numbers<[1], [0], [0], [1], [0, 0, 1, 1], [], []>} : vector<2x18xf32>, vector<18x64xf32>, vector<2x64xf32> -> vector<2x64xf32>
    %c6_176 = arith.constant 6 : index
    %c0_177 = arith.constant 0 : index
    %c0_178 = arith.constant 0 : index
    %172 = vector.load %arg8[%c6_176, %c0_177, %c0_178] : memref<9x64x64xf32, #tpu.memory_space<vmem>>, vector<1x64x64xf32>
    %173 = vector.shape_cast %172 : vector<1x64x64xf32> to vector<64x64xf32>
    %cst_179 = arith.constant dense<0.000000e+00> : vector<2x64xf32>
    %174 = tpu.matmul %171, %173, %cst_179 {dimension_numbers = #tpu.dot_dimension_numbers<[1], [0], [0], [1], [0, 0, 1, 1], [], []>} : vector<2x64xf32>, vector<64x64xf32>, vector<2x64xf32> -> vector<2x64xf32>
    %175 = arith.addf %168, %174 : vector<2x64xf32>
    %c7_180 = arith.constant 7 : index
    %c0_181 = arith.constant 0 : index
    %c0_182 = arith.constant 0 : index
    %176 = vector.load %arg7[%c7_180, %c0_181, %c0_182] : memref<9x2x18xf32, #tpu.memory_space<vmem>>, vector<1x2x18xf32>
    %177 = vector.shape_cast %176 : vector<1x2x18xf32> to vector<2x18xf32>
    %cst_183 = arith.constant dense<0.000000e+00> : vector<2x64xf32>
    %178 = tpu.matmul %177, %125, %cst_183 {dimension_numbers = #tpu.dot_dimension_numbers<[1], [0], [0], [1], [0, 0, 1, 1], [], []>} : vector<2x18xf32>, vector<18x64xf32>, vector<2x64xf32> -> vector<2x64xf32>
    %c7_184 = arith.constant 7 : index
    %c0_185 = arith.constant 0 : index
    %c0_186 = arith.constant 0 : index
    %179 = vector.load %arg8[%c7_184, %c0_185, %c0_186] : memref<9x64x64xf32, #tpu.memory_space<vmem>>, vector<1x64x64xf32>
    %180 = vector.shape_cast %179 : vector<1x64x64xf32> to vector<64x64xf32>
    %cst_187 = arith.constant dense<0.000000e+00> : vector<2x64xf32>
    %181 = tpu.matmul %178, %180, %cst_187 {dimension_numbers = #tpu.dot_dimension_numbers<[1], [0], [0], [1], [0, 0, 1, 1], [], []>} : vector<2x64xf32>, vector<64x64xf32>, vector<2x64xf32> -> vector<2x64xf32>
    %182 = arith.addf %175, %181 : vector<2x64xf32>
    %c8_188 = arith.constant 8 : index
    %c0_189 = arith.constant 0 : index
    %c0_190 = arith.constant 0 : index
    %183 = vector.load %arg7[%c8_188, %c0_189, %c0_190] : memref<9x2x18xf32, #tpu.memory_space<vmem>>, vector<1x2x18xf32>
    %184 = vector.shape_cast %183 : vector<1x2x18xf32> to vector<2x18xf32>
    %cst_191 = arith.constant dense<0.000000e+00> : vector<2x64xf32>
    %185 = tpu.matmul %184, %125, %cst_191 {dimension_numbers = #tpu.dot_dimension_numbers<[1], [0], [0], [1], [0, 0, 1, 1], [], []>} : vector<2x18xf32>, vector<18x64xf32>, vector<2x64xf32> -> vector<2x64xf32>
    %c8_192 = arith.constant 8 : index
    %c0_193 = arith.constant 0 : index
    %c0_194 = arith.constant 0 : index
    %186 = vector.load %arg8[%c8_192, %c0_193, %c0_194] : memref<9x64x64xf32, #tpu.memory_space<vmem>>, vector<1x64x64xf32>
    %187 = vector.shape_cast %186 : vector<1x64x64xf32> to vector<64x64xf32>
    %cst_195 = arith.constant dense<0.000000e+00> : vector<2x64xf32>
    %188 = tpu.matmul %185, %187, %cst_195 {dimension_numbers = #tpu.dot_dimension_numbers<[1], [0], [0], [1], [0, 0, 1, 1], [], []>} : vector<2x64xf32>, vector<64x64xf32>, vector<2x64xf32> -> vector<2x64xf32>
    %189 = arith.addf %182, %188 : vector<2x64xf32>
    %c0_196 = arith.constant 0 : index
    %c0_197 = arith.constant 0 : index
    %190 = vector.load %arg9[%c0_196, %c0_197] : memref<1x64xf32, #tpu.memory_space<vmem>>, vector<1x64xf32>
    %191 = vector.broadcast %190 : vector<1x64xf32> to vector<2x64xf32>
    %192 = arith.addf %189, %191 : vector<2x64xf32>
    %cst_198 = arith.constant 0.000000e+00 : f32
    %193 = vector.broadcast %cst_198 : f32 to vector<2x64xf32>
    %194 = arith.maximumf %192, %193 : vector<2x64xf32>
    %c0_199 = arith.constant 0 : index
    %c0_200 = arith.constant 0 : index
    %195 = vector.load %arg10[%c0_199, %c0_200] : memref<64x1024xf32, #tpu.memory_space<vmem>>, vector<64x1024xf32>
    %cst_201 = arith.constant dense<0.000000e+00> : vector<2x1024xf32>
    %196 = tpu.matmul %194, %195, %cst_201 {dimension_numbers = #tpu.dot_dimension_numbers<[1], [0], [0], [1], [0, 0, 1, 1], [], []>} : vector<2x64xf32>, vector<64x1024xf32>, vector<2x1024xf32> -> vector<2x1024xf32>
    %c0_202 = arith.constant 0 : index
    %c0_203 = arith.constant 0 : index
    %197 = vector.load %arg11[%c0_202, %c0_203] : memref<1x1024xf32, #tpu.memory_space<vmem>>, vector<1x1024xf32>
    %198 = vector.broadcast %197 : vector<1x1024xf32> to vector<2x1024xf32>
    %199 = arith.addf %196, %198 : vector<2x1024xf32>
    %cst_204 = arith.constant 0.000000e+00 : f32
    %200 = vector.broadcast %cst_204 : f32 to vector<2x1024xf32>
    %201 = arith.maximumf %199, %200 : vector<2x1024xf32>
    %c0_205 = arith.constant 0 : index
    %c0_206 = arith.constant 0 : index
    %202 = vector.load %arg12[%c0_205, %c0_206] : memref<1024x7xf32, #tpu.memory_space<vmem>>, vector<1024x7xf32>
    %cst_207 = arith.constant dense<0.000000e+00> : vector<2x7xf32>
    %203 = tpu.matmul %201, %202, %cst_207 {dimension_numbers = #tpu.dot_dimension_numbers<[1], [0], [0], [1], [0, 0, 1, 1], [], []>} : vector<2x1024xf32>, vector<1024x7xf32>, vector<2x7xf32> -> vector<2x7xf32>
    %c0_208 = arith.constant 0 : index
    %c0_209 = arith.constant 0 : index
    %204 = vector.load %arg13[%c0_208, %c0_209] : memref<1x7xf32, #tpu.memory_space<vmem>>, vector<1x7xf32>
    %205 = vector.broadcast %204 : vector<1x7xf32> to vector<2x7xf32>
    %206 = arith.addf %203, %205 : vector<2x7xf32>
    %207 = vector.extract_strided_slice %206 {offsets = [0, 0], sizes = [2, 1], strides = [1, 1]} : vector<2x7xf32> to vector<2x1xf32>
    %208 = vector.extract_strided_slice %206 {offsets = [0, 1], sizes = [2, 6], strides = [1, 1]} : vector<2x7xf32> to vector<2x6xf32>
    %209 = vector.broadcast %207 : vector<2x1xf32> to vector<2x6xf32>
    %210 = arith.addf %209, %208 : vector<2x6xf32>
    %211 = vector.shape_cast %208 : vector<2x6xf32> to vector<1x2x6xf32>
    %cst_210 = arith.constant dense<0.000000e+00> : vector<1xf32>
    %212 = vector.multi_reduction <add>, %211, %cst_210 [1, 2] : vector<1x2x6xf32> to vector<1xf32>
    %213 = vector.shape_cast %212 : vector<1xf32> to vector<1x1x1xf32>
    %214 = vector.extract %213[0, 0, 0] : f32 from vector<1x1x1xf32>
    %cst_211 = arith.constant 1.200000e+01 : f32
    %215 = arith.divf %214, %cst_211 : f32
    %216 = vector.broadcast %215 : f32 to vector<2x6xf32>
    %217 = arith.subf %210, %216 : vector<2x6xf32>
    %c0_212 = arith.constant 0 : index
    %c0_213 = arith.constant 0 : index
    %218 = vector.load %arg14[%c0_212, %c0_213] : memref<2x6xf32, #tpu.memory_space<vmem>>, vector<2x6xf32>
    tpu.vector_store %arg14[%c0_212, %c0_213], %217 {strides = array<i32>} : memref<2x6xf32, #tpu.memory_space<vmem>>, vector<2x6xf32>,
    return
  }
  func.func @transform_0(%arg0: i32) -> (i32, i32) {
    %c0_i32 = arith.constant 0 : i32
    %c0_i32_0 = arith.constant 0 : i32
    %c0_i32_1 = arith.constant 0 : i32
    return %c0_i32, %c0_i32_0 : i32, i32
  }
  func.func @transform_1(%arg0: i32) -> (i32, i32) {
    %c0_i32 = arith.constant 0 : i32
    %c0_i32_0 = arith.constant 0 : i32
    %c0_i32_1 = arith.constant 0 : i32
    return %c0_i32, %c0_i32_0 : i32, i32
  }
  func.func @transform_2(%arg0: i32) -> (i32, i32) {
    %c0_i32 = arith.constant 0 : i32
    %c0_i32_0 = arith.constant 0 : i32
    %c0_i32_1 = arith.constant 0 : i32
    return %c0_i32, %c0_i32_0 : i32, i32
  }
  func.func @transform_3(%arg0: i32) -> (i32, i32, i32) {
    %c0_i32 = arith.constant 0 : i32
    %c0_i32_0 = arith.constant 0 : i32
    %c0_i32_1 = arith.constant 0 : i32
    %c0_i32_2 = arith.constant 0 : i32
    return %c0_i32, %c0_i32_0, %c0_i32_1 : i32, i32, i32
  }
  func.func @transform_4(%arg0: i32) -> (i32, i32, i32) {
    %c0_i32 = arith.constant 0 : i32
    %c0_i32_0 = arith.constant 0 : i32
    %c0_i32_1 = arith.constant 0 : i32
    %c0_i32_2 = arith.constant 0 : i32
    return %c0_i32, %c0_i32_0, %c0_i32_1 : i32, i32, i32
  }
  func.func @transform_5(%arg0: i32) -> (i32, i32) {
    %c0_i32 = arith.constant 0 : i32
    %c0_i32_0 = arith.constant 0 : i32
    %c0_i32_1 = arith.constant 0 : i32
    return %c0_i32, %c0_i32_0 : i32, i32
  }
  func.func @transform_6(%arg0: i32) -> (i32, i32, i32) {
    %c0_i32 = arith.constant 0 : i32
    %c0_i32_0 = arith.constant 0 : i32
    %c0_i32_1 = arith.constant 0 : i32
    %c0_i32_2 = arith.constant 0 : i32
    return %c0_i32, %c0_i32_0, %c0_i32_1 : i32, i32, i32
  }
  func.func @transform_7(%arg0: i32) -> (i32, i32, i32) {
    %c0_i32 = arith.constant 0 : i32
    %c0_i32_0 = arith.constant 0 : i32
    %c0_i32_1 = arith.constant 0 : i32
    %c0_i32_2 = arith.constant 0 : i32
    return %c0_i32, %c0_i32_0, %c0_i32_1 : i32, i32, i32
  }
  func.func @transform_8(%arg0: i32) -> (i32, i32) {
    %c0_i32 = arith.constant 0 : i32
    %c0_i32_0 = arith.constant 0 : i32
    %c0_i32_1 = arith.constant 0 : i32
    return %c0_i32, %c0_i32_0 : i32, i32
  }
  func.func @transform_9(%arg0: i32) -> (i32, i32) {
    %c0_i32 = arith.constant 0 : i32
    %c0_i32_0 = arith.constant 0 : i32
    %c0_i32_1 = arith.constant 0 : i32
    return %c0_i32, %c0_i32_0 : i32, i32
  }
  func.func @transform_10(%arg0: i32) -> (i32, i32) {
    %c0_i32 = arith.constant 0 : i32
    %c0_i32_0 = arith.constant 0 : i32
    %c0_i32_1 = arith.constant 0 : i32
    return %c0_i32, %c0_i32_0 : i32, i32
  }
  func.func @transform_11(%arg0: i32) -> (i32, i32) {
    %c0_i32 = arith.constant 0 : i32
    %c0_i32_0 = arith.constant 0 : i32
    %c0_i32_1 = arith.constant 0 : i32
    return %c0_i32, %c0_i32_0 : i32, i32
  }
  func.func @transform_12(%arg0: i32) -> (i32, i32) {
    %c0_i32 = arith.constant 0 : i32
    %c0_i32_0 = arith.constant 0 : i32
    %c0_i32_1 = arith.constant 0 : i32
    return %c0_i32, %c0_i32_0 : i32, i32
  }
  func.func @transform_13(%arg0: i32) -> (i32, i32) {
    %c0_i32 = arith.constant 0 : i32
    %c0_i32_0 = arith.constant 0 : i32
    %c0_i32_1 = arith.constant 0 : i32
    return %c0_i32, %c0_i32_0 : i32, i32
  }
}

</mosaic_0001>

<bundles_post_ra>
// kernel: network_forward.1
= control target key start
LH: loop header
LB: loop body
LE: loop exit
PB: predicated region body
PF: predicated region fallthrough
CT: control target
= control target key end

     0   :  { %s4835_s0 = inlined_call_operand.vmem [shape: f32[128,256], index: 0, kind: input, shape index: {}]   ;;  %s4836_s1 = inlined_call_operand.vmem [shape: f32[256,32], index: 1, kind: input, shape index: {}]   ;;  %s4837_s2 = inlined_call_operand.vmem [shape: f32[1,32], index: 2, kind: input, shape index: {}]   ;;  %s4838_s3 = inlined_call_operand.vmem [shape: f32[16,18,128], index: 3, kind: input, shape index: {}]   ;;  %s4839_s4 = inlined_call_operand.vmem [shape: f32[16,32,64], index: 4, kind: input, shape index: {}]   ;;  %s4840_s5 = inlined_call_operand.vmem [shape: f32[1,64], index: 5, kind: input, shape index: {}]   ;;  %s4841_s6 = inlined_call_operand.vmem [shape: f32[9,2,18], index: 6, kind: input, shape index: {}]   ;;  %s4842_s7 = inlined_call_operand.vmem [shape: f32[9,64,64], index: 7, kind: input, shape index: {}]   ;;  %s4843_s8 = inlined_call_operand.vmem [shape: f32[1,64], index: 8, kind: input, shape index: {}]   ;;  %s4844_s9 = inlined_call_operand.vmem [shape: f32[64,1024], index: 9, kind: input, shape index: {}]   ;;  %s4845_s10 = inlined_call_operand.vmem [shape: f32[1,1024], index: 10, kind: input, shape index: {}]   ;;  %s4846_s11 = inlined_call_operand.vmem [shape: f32[1024,7], index: 11, kind: input, shape index: {}]   ;;  %s4847_s12 = inlined_call_operand.vmem [shape: f32[1,7], index: 12, kind: input, shape index: {}]   ;;  %s4848_s13 = inlined_call_operand.hbm [shape: f32[2,6], index: 13, kind: output, shape index: {}]  }
   0x1   :  { %v92_v0 = vld [vmem:[%s4836_s1 + $0x78] sm:$0xff]  ;;  %v91_v1 = vld [vmem:[%s4836_s1 + $0x70] sm:$0xff]  ;;  %v90_v4 = vld [vmem:[%s4836_s1 + $0x68] sm:$0xff] }
   0x2   :  { %v108_v2 = vld [vmem:[%s4836_s1 + $0xf8] sm:$0xff]  ;;  %113 = vmatpush.msra.mxu0 %v92_v0  ;;  %v107_v3 = vld [vmem:[%s4836_s1 + $0xf0] sm:$0xff]  ;;  %v106_v5 = vld [vmem:[%s4836_s1 + $0xe8] sm:$0xff] }
   0x3   :  { %178 = vmatpush.msra.mxu1 %v108_v2  ;;  %v89_v6 = vld [vmem:[%s4836_s1 + $0x60] sm:$0xff]  ;;  %v88_v8 = vld [vmem:[%s4836_s1 + $0x58] sm:$0xff]  ;;  %v87_v10 = vld [vmem:[%s4836_s1 + $0x50] sm:$0xff] }
   0x4   :  { %114 = vmatpush.msra.mxu0 %v91_v1  ;;  %v105_v7 = vld [vmem:[%s4836_s1 + $0xe0] sm:$0xff]  ;;  %v104_v9 = vld [vmem:[%s4836_s1 + $0xd8] sm:$0xff]  ;;  %v103_v11 = vld [vmem:[%s4836_s1 + $0xd0] sm:$0xff] }
   0x5   :  { %179 = vmatpush.msra.mxu1 %v107_v3  ;;  %v86_v12 = vld [vmem:[%s4836_s1 + $0x48] sm:$0xff]  ;;  %v85_v14 = vld [vmem:[%s4836_s1 + $0x40] sm:$0xff] }
   0x6   :  { %115 = vmatpush.msra.mxu0 %v90_v4  ;;  %v102_v13 = vld [vmem:[%s4836_s1 + $0xc8] sm:$0xff]  ;;  %v101_v15 = vld [vmem:[%s4836_s1 + $0xc0] sm:$0xff] }
   0x7   :  { %180 = vmatpush.msra.mxu1 %v106_v5 }
   0x8   :  { %116 = vmatpush.msra.mxu0 %v89_v6 }
   0x9   :  { %181 = vmatpush.msra.mxu1 %v105_v7 }
   0xa   :  { %117 = vmatpush.msra.mxu0 %v88_v8 }
   0xb   :  { %182 = vmatpush.msra.mxu1 %v104_v9 }
   0xc   :  { %118 = vmatpush.msra.mxu0 %v87_v10 }
   0xd   :  { %183 = vmatpush.msra.mxu1 %v103_v11 }
   0xe   :  { %119 = vmatpush.msra.mxu0 %v86_v12 }
   0xf   :  { %184 = vmatpush.msra.mxu1 %v102_v13 }
  0x10   :  { %18 = vsyncpa [#allocation3], 0  ;;  %v84_v16 = vld [vmem:[%s4836_s1 + $0x38] sm:$0xff]  ;;  %120 = vmatpush.msra.mxu0 %v85_v14  ;;  %v83_v18 = vld [vmem:[%s4836_s1 + $0x30] sm:$0xff]  ;;  %vm327_vm0 = vcmask 261120   ;;  %vm1435_vm1 = vcmask 1041408  }
  0x11   :  { %v100_v17 = vld [vmem:[%s4836_s1 + $0xb8] sm:$0xff]  ;;  %185 = vmatpush.msra.mxu1 %v101_v15  ;;  %v99_v19 = vld [vmem:[%s4836_s1 + $0xb0] sm:$0xff]  ;;  %v82_v20 = vld [vmem:[%s4836_s1 + $0x28] sm:$0xff]  ;;  %vm1431_vm2 = vcmask 146432   ;;  %vm1501_vm3 = vcmask 523264   ;;  %vm2514_vm4 = vcmask 41984  }
  0x12   :  { %121 = vmatpush.msra.mxu0 %v84_v16  ;;  %v98_v21 = vld [vmem:[%s4836_s1 + $0xa8] sm:$0xff]  ;;  %v81_v22 = vld [vmem:[%s4836_s1 + $0x20] sm:$0xff]  ;;  %v80_v24 = vld [vmem:[%s4836_s1 + $0x18] sm:$0xff]  ;;  %s2862_s14 = smov [#allocation2]   ;;  %s2548_s17 = sshll.u32 %s4848_s13, 4  ;;  %s2549_s17 = int_to_ptr.hbm [resolvable:$true] %s2548_s17 }
  0x13   :  { %186 = vmatpush.msra.mxu1 %v100_v17  ;;  %v97_v23 = vld [vmem:[%s4836_s1 + $0xa0] sm:$0xff]  ;;  %v96_v25 = vld [vmem:[%s4836_s1 + $0x98] sm:$0xff]  ;;  %v79_v26 = vld [vmem:[%s4836_s1 + $0x10] sm:$0xff]  ;;  %s2546_s15 = sshll.u32 %s2862_s14, 4  ;;  %s2547_s15 = int_to_ptr.vmem [resolvable:$true] %s2546_s15 }
  0x14   :  { %122 = vmatpush.msra.mxu0 %v83_v18  ;;  %v95_v27 = vld [vmem:[%s4836_s1 + $0x90] sm:$0xff]  ;;  %v78_v28 = vld [vmem:[%s4836_s1 + $0x8] sm:$0xff]  ;;  %v77_v30 = vld [vmem:[%s4836_s1] sm:$0xff] }
  0x15   :  { %187 = vmatpush.msra.mxu1 %v99_v19  ;;  %v94_v29 = vld [vmem:[%s4836_s1 + $0x88] sm:$0xff]  ;;  %v93_v31 = vld [vmem:[%s4836_s1 + $0x80] sm:$0xff]  ;;  %v47_v34 = vld [vmem:[%s4835_s0 + $0x10] sm:$0xff] }
  0x16   :  { %123 = vmatpush.msra.mxu0 %v82_v20  ;;  %v45_v32 = vld [vmem:[%s4835_s0] sm:$0xff]  ;;  %v46_v33 = vld [vmem:[%s4835_s0 + $0x8] sm:$0xff]  ;;  %v48_v35 = vld [vmem:[%s4835_s0 + $0x18] sm:$0xff] }
  0x17   :  { %188 = vmatpush.msra.mxu1 %v98_v21  ;;  %v49_v36 = vld [vmem:[%s4835_s0 + $0x20] sm:$0xff]  ;;  %v50_v37 = vld [vmem:[%s4835_s0 + $0x28] sm:$0xff]  ;;  %v51_v38 = vld [vmem:[%s4835_s0 + $0x30] sm:$0xff] }
  0x18   :  { %124 = vmatpush.msra.mxu0 %v81_v22  ;;  %v52_v39 = vld [vmem:[%s4835_s0 + $0x38] sm:$0xff]  ;;  %v53_v40 = vld [vmem:[%s4835_s0 + $0x40] sm:$0xff]  ;;  %v54_v41 = vld [vmem:[%s4835_s0 + $0x48] sm:$0xff] }
  0x19   :  { %189 = vmatpush.msra.mxu1 %v97_v23  ;;  %v55_v42 = vld [vmem:[%s4835_s0 + $0x50] sm:$0xff]  ;;  %v56_v43 = vld [vmem:[%s4835_s0 + $0x58] sm:$0xff]  ;;  %v57_v44 = vld [vmem:[%s4835_s0 + $0x60] sm:$0xff] }
  0x1a   :  { %125 = vmatpush.msra.mxu0 %v80_v24  ;;  %v58_v45 = vld [vmem:[%s4835_s0 + $0x68] sm:$0xff]  ;;  %v59_v46 = vld [vmem:[%s4835_s0 + $0x70] sm:$0xff]  ;;  %v60_v47 = vld [vmem:[%s4835_s0 + $0x78] sm:$0xff] }
  0x1b   :  { %190 = vmatpush.msra.mxu1 %v96_v25  ;;  %v61_v48 = vld [vmem:[%s4835_s0 + $0x80] sm:$0xff]  ;;  %v62_v49 = vld [vmem:[%s4835_s0 + $0x88] sm:$0xff]  ;;  %v63_v50 = vld [vmem:[%s4835_s0 + $0x90] sm:$0xff] }
  0x1c   :  { %126 = vmatpush.msra.mxu0 %v79_v26  ;;  %v64_v51 = vld [vmem:[%s4835_s0 + $0x98] sm:$0xff]  ;;  %v65_v52 = vld [vmem:[%s4835_s0 + $0xa0] sm:$0xff]  ;;  %v66_v53 = vld [vmem:[%s4835_s0 + $0xa8] sm:$0xff] }
  0x1d   :  { %191 = vmatpush.msra.mxu1 %v95_v27  ;;  %v67_v54 = vld [vmem:[%s4835_s0 + $0xb0] sm:$0xff]  ;;  %v68_v55 = vld [vmem:[%s4835_s0 + $0xb8] sm:$0xff]  ;;  %v69_v56 = vld [vmem:[%s4835_s0 + $0xc0] sm:$0xff] }
  0x1e   :  { %127 = vmatpush.msra.mxu0 %v78_v28  ;;  %v70_v57 = vld [vmem:[%s4835_s0 + $0xc8] sm:$0xff]  ;;  %v71_v58 = vld [vmem:[%s4835_s0 + $0xd0] sm:$0xff]  ;;  %v72_v59 = vld [vmem:[%s4835_s0 + $0xd8] sm:$0xff] }
  0x1f   :  { %192 = vmatpush.msra.mxu1 %v94_v29  ;;  %v73_v60 = vld [vmem:[%s4835_s0 + $0xe0] sm:$0xff]  ;;  %v74_v61 = vld [vmem:[%s4835_s0 + $0xe8] sm:$0xff]  ;;  %v75_v62 = vld [vmem:[%s4835_s0 + $0xf0] sm:$0xff] }
  0x20   :  { %128 = vmatpush.msra.mxu0 %v77_v30  ;;  %v76_v63 = vld [vmem:[%s4835_s0 + $0xf8] sm:$0xff]  ;;  %v3152_v30 = vld [vmem:[%s4837_s2] ss:$0 sm:$0xff] }
  0x21   :  { %193 = vmatpush.msra.mxu1 %v93_v31  ;;  %129 = vmatmul.f32.vlgmr.msra.gmra.mxu0 %v45_v32 }
  0x22   :  { %194 = vmatmul.f32.vlgmr.msra.gmra.mxu1 %v46_v33 }
  0x29   :  { %132 = vmatmul.f32.gmra.mxu0 %v47_v34 }
  0x2a   :  { %197 = vmatmul.f32.gmra.mxu1 %v48_v35 }
  0x31   :  { %135 = vmatmul.f32.gmra.mxu0 %v49_v36 }
  0x32   :  { %200 = vmatmul.f32.gmra.mxu1 %v50_v37 }
  0x39   :  { %138 = vmatmul.f32.gmra.mxu0 %v51_v38 }
  0x3a   :  { %203 = vmatmul.f32.gmra.mxu1 %v52_v39 }
  0x41   :  { %141 = vmatmul.f32.gmra.mxu0 %v53_v40 }
  0x42   :  { %206 = vmatmul.f32.gmra.mxu1 %v54_v41 }
  0x49   :  { %144 = vmatmul.f32.gmra.mxu0 %v55_v42 }
  0x4a   :  { %209 = vmatmul.f32.gmra.mxu1 %v56_v43 }
  0x51   :  { %147 = vmatmul.f32.gmra.mxu0 %v57_v44 }
  0x52   :  { %212 = vmatmul.f32.gmra.mxu1 %v58_v45 }
  0x59   :  { %150 = vmatmul.f32.gmra.mxu0 %v59_v46 }
  0x5a   :  { %215 = vmatmul.f32.gmra.mxu1 %v60_v47 }
  0x61   :  { %153 = vmatmul.f32.gmra.mxu0 %v61_v48 }
  0x62   :  { %218 = vmatmul.f32.gmra.mxu1 %v62_v49 }
  0x69   :  { %156 = vmatmul.f32.gmra.mxu0 %v63_v50 }
  0x6a   :  { %221 = vmatmul.f32.gmra.mxu1 %v64_v51 }
  0x71   :  { %159 = vmatmul.f32.gmra.mxu0 %v65_v52 }
  0x72   :  { %224 = vmatmul.f32.gmra.mxu1 %v66_v53 }
  0x79   :  { %162 = vmatmul.f32.gmra.mxu0 %v67_v54 }
  0x7a   :  { %227 = vmatmul.f32.gmra.mxu1 %v68_v55 }
  0x81   :  { %165 = vmatmul.f32.gmra.mxu0 %v69_v56 }
  0x82   :  { %230 = vmatmul.f32.gmra.mxu1 %v70_v57 }
  0x89   :  { %168 = vmatmul.f32.gmra.mxu0 %v71_v58 }
  0x8a   :  { %233 = vmatmul.f32.gmra.mxu1 %v72_v59 }
  0x91   :  { %171 = vmatmul.f32.gmra.mxu0 %v73_v60 }
  0x92   :  { %236 = vmatmul.f32.gmra.mxu1 %v74_v61 }
  0x99   :  { %174 = vmatmul.f32.gmra.mxu0 %v75_v62 }
  0x9a   :  { %239 = vmatmul.f32.gmra.mxu1 %v76_v63 }
  0x9e   :  { %v3125_v0 = vpop.f32.mrf.mxu0 }
  0x9f   :  { %v3127_v1 = vpop.f32.mrf.mxu1 }
  0xa6   :  { %v3129_v2 = vpop.f32.mrf.mxu0 }
  0xa7   :  { %v3131_v3 = vpop.f32.mrf.mxu1 }
  0xae   :  { %v3133_v4 = vpop.f32.mrf.mxu0 }
  0xaf   :  { %v3135_v5 = vpop.f32.mrf.mxu1 }
  0xb6   :  { %v3137_v6 = vpop.f32.mrf.mxu0 }
  0xb7   :  { %v3139_v7 = vpop.f32.mrf.mxu1  ;;  %v140_v63 = vadd.f32 %v3152_v30, %v3137_v6  ;;  %v134_v6 = vadd.f32 %v3152_v30, %v3129_v2 }
  0xb9   :  { %v199_v2 = vadd.f32 %v3131_v3, %v134_v6 }
  0xbe   :  { %v3141_v8 = vpop.f32.mrf.mxu0 }
  0xbf   :  { %v3143_v9 = vpop.f32.mrf.mxu1  ;;  %v143_v60 = vadd.f32 %v3152_v30, %v3141_v8  ;;  %v137_v8 = vadd.f32 %v3152_v30, %v3133_v4  ;;  %v131_v4 = vadd.f32 %v3152_v30, %v3125_v0 }
  0xc1   :  { %v196_v0 = vadd.f32 %v3127_v1, %v131_v4  ;;  %v259_v1 = vld [vmem:[%s4838_s3] sm:$0xff] }
  0xc2   :  { %v2583_v4 = vld [vmem:[%s4839_s4 + $0x60] sm:$0xff] }
  0xc3   :  { %v3254_v3 = vmax.f32 %v196_v0, 0.0 }
  0xc6   :  { %v145_v10 = vpop.f32.mrf.mxu0 }
  0xc7   :  { %v3145_v11 = vpop.f32.mrf.mxu1  ;;  %v146_v57 = vadd.f32 %v3152_v30, %v145_v10 }
  0xc9   :  { %v211_v10 = vadd.f32 %v3145_v11, %v146_v57  ;;  %v205_v11 = vadd.f32 %v3139_v7, %v140_v63  ;;  %v2574_v57 = vld [vmem:[%s4839_s4 + $0x48] sm:$0xff]  ;;  %v2586_v63 = vld [vmem:[%s4839_s4 + $0x78] sm:$0xff] }
  0xcb   :  { %v3238_v7 = vmax.f32 %v205_v11, 0.0 }
  0xce   :  { %v148_v12 = vpop.f32.mrf.mxu0 }
  0xcf   :  { %v3147_v13 = vpop.f32.mrf.mxu1  ;;  %v149_v54 = vadd.f32 %v3152_v30, %v148_v12 }
  0xd1   :  { %v214_v61 = vadd.f32 %v3147_v13, %v149_v54  ;;  %v208_v13 = vadd.f32 %v3143_v9, %v143_v60  ;;  %v202_v9 = vadd.f32 %v3135_v5, %v137_v8  ;;  %v2623_v54 = vld [vmem:[%s4839_s4 + $0xe0] sm:$0xff]  ;;  %v2585_v8 = vld [vmem:[%s4839_s4 + $0x70] sm:$0xff] }
  0xd3   :  { %v3244_v5 = vmax.f32 %v202_v9, 0.0 }
  0xd6   :  { %v151_v14 = vpop.f32.mrf.mxu0 }
  0xd7   :  { %v216_v15 = vpop.f32.mrf.mxu1  ;;  %v152_v51 = vadd.f32 %v3152_v30, %v151_v14  ;;  %v3216_v14 = vmax.f32 %v214_v61, 0.0 }
  0xd9   :  { %v217_v58 = vadd.f32 %v216_v15, %v152_v51  ;;  %v3224_v15 = vmax.f32 %v211_v10, 0.0  ;;  %v2576_v51 = vld [vmem:[%s4839_s4 + $0x58] sm:$0xff] }
  0xdb   :  { %v3208_v12 = vmax.f32 %v217_v58, 0.0  ;;  %v2573_v58 = vld [vmem:[%s4839_s4 + $0x40] sm:$0xff] }
  0xde   :  { %v154_v16 = vpop.f32.mrf.mxu0 }
  0xdf   :  { %v219_v17 = vpop.f32.mrf.mxu1  ;;  %v155_v48 = vadd.f32 %v3152_v30, %v154_v16  ;;  %v3232_v16 = vmax.f32 %v208_v13, 0.0  ;;  %v2584_v13 = vld [vmem:[%s4839_s4 + $0x68] sm:$0xff] }
  0xe1   :  { %v220_v55 = vadd.f32 %v219_v17, %v155_v48  ;;  %v3249_v17 = vmax.f32 %v199_v2, 0.0  ;;  %v2625_v48 = vld [vmem:[%s4839_s4 + $0xf0] sm:$0xff] }
  0xe3   :  { %v3200_v62 = vmax.f32 %v220_v55, 0.0  ;;  %v2575_v55 = vld [vmem:[%s4839_s4 + $0x50] sm:$0xff] }
  0xe6   :  { %v157_v18 = vpop.f32.mrf.mxu0 }
  0xe7   :  { %v222_v19 = vpop.f32.mrf.mxu1  ;;  %v158_v45 = vadd.f32 %v3152_v30, %v157_v18  ;;  %v2557_v18 = vld [vmem:[%s4838_s3 + $0x18] sm:$0xff] }
  0xe9   :  { %v223_v52 = vadd.f32 %v222_v19, %v158_v45  ;;  %v2563_v19 = vld [vmem:[%s4839_s4 + $0x38] sm:$0xff] }
  0xea   :  { %v2626_v45 = vld [vmem:[%s4839_s4 + $0xf8] sm:$0xff] }
  0xeb   :  { %v3192_v59 = vmax.f32 %v223_v52, 0.0  ;;  %v2624_v52 = vld [vmem:[%s4839_s4 + $0xe8] sm:$0xff] }
  0xee   :  { %v160_v20 = vpop.f32.mrf.mxu0 }
  0xef   :  { %v225_v21 = vpop.f32.mrf.mxu1  ;;  %v161_v42 = vadd.f32 %v3152_v30, %v160_v20  ;;  %v2600_v20 = vld [vmem:[%s4838_s3 + $0x78] sm:$0xff] }
  0xf1   :  { %v226_v49 = vadd.f32 %v225_v21, %v161_v42  ;;  %v2562_v21 = vld [vmem:[%s4839_s4 + $0x30] sm:$0xff]  ;;  %v289_v42 = vld [vmem:[%s4839_s4 + $0x8] sm:$0xff] }
  0xf3   :  { %v3186_v56 = vmax.f32 %v226_v49, 0.0  ;;  %v2622_v49 = vld [vmem:[%s4838_s3 + $0xb8] sm:$0x3] }
  0xf6   :  { %v163_v22 = vpop.f32.mrf.mxu0 }
  0xf7   :  { %v228_v23 = vpop.f32.mrf.mxu1  ;;  %v164_v39 = vadd.f32 %v3152_v30, %v163_v22  ;;  %v2561_v22 = vld [vmem:[%s4839_s4 + $0x28] sm:$0xff] }
  0xf9   :  { %v229_v46 = vadd.f32 %v228_v23, %v164_v39  ;;  %v2560_v23 = vld [vmem:[%s4839_s4 + $0x20] sm:$0xff]  ;;  %v2604_v39 = vld [vmem:[%s4839_s4 + $0xa8] sm:$0xff] }
  0xfb   :  { %v3180_v53 = vmax.f32 %v229_v46, 0.0  ;;  %v288_v46 = vld [vmem:[%s4839_s4] sm:$0xff] }
  0xfe   :  { %v166_v24 = vpop.f32.mrf.mxu0 }
  0xff   :  { %v231_v25 = vpop.f32.mrf.mxu1  ;;  %v167_v36 = vadd.f32 %v3152_v30, %v166_v24  ;;  %v260_v24 = vld [vmem:[%s4838_s3 + $0x8] sm:$0xff] }
 0x101   :  { %v232_v43 = vadd.f32 %v231_v25, %v167_v36  ;;  %v2558_v25 = vld [vmem:[%s4838_s3 + $0x20] sm:$0xff]  ;;  %v2606_v36 = vld [vmem:[%s4839_s4 + $0xb8] sm:$0xff] }
 0x102   :  { %673 = vmatpush.msrb.mxu1 %v2606_v36 }
 0x103   :  { %v3174_v50 = vmax.f32 %v232_v43, 0.0  ;;  %v2603_v43 = vld [vmem:[%s4839_s4 + $0xa0] sm:$0xff] }
 0x106   :  { %v169_v26 = vpop.f32.mrf.mxu0 }
 0x107   :  { %v234_v27 = vpop.f32.mrf.mxu1  ;;  %v170_v34 = vadd.f32 %v3152_v30, %v169_v26  ;;  %v2601_v26 = vld [vmem:[%s4838_s3 + $0x80] sm:$0xff] }
 0x109   :  { %v235_v40 = vadd.f32 %v234_v27, %v170_v34  ;;  %v261_v27 = vld [vmem:[%s4838_s3 + $0x10] sm:$0x3]  ;;  %v2643_v34 = vld [vmem:[%s4839_s4 + $0x120] sm:$0xff] }
 0x10b   :  { %v3168_v47 = vmax.f32 %v235_v40, 0.0  ;;  %v290_v40 = vld [vmem:[%s4839_s4 + $0x10] sm:$0xff] }
 0x10e   :  { %v172_v28 = vpop.f32.mrf.mxu0 }
 0x10f   :  { %v237_v29 = vpop.f32.mrf.mxu1  ;;  %v173_v31 = vadd.f32 %v3152_v30, %v172_v28  ;;  %v2559_v28 = vld [vmem:[%s4838_s3 + $0x28] sm:$0x3] }
 0x111   :  { %v238_v37 = vadd.f32 %v237_v29, %v173_v31  ;;  %v2602_v29 = vld [vmem:[%s4838_s3 + $0x88] sm:$0x3]  ;;  %v2646_v31 = vld [vmem:[%s4839_s4 + $0x138] sm:$0xff] }
 0x113   :  { %v3162_v44 = vmax.f32 %v238_v37, 0.0  ;;  %v2605_v37 = vld [vmem:[%s4839_s4 + $0xb0] sm:$0xff] }
 0x114   :  { %674 = vmatpush.msrb.mxu1 %v2605_v37 }
 0x116   :  { %v175_v32 = vpop.f32.mrf.mxu0  ;;  %675 = vmatpush.msrb.mxu1 %v2604_v39 }
 0x117   :  { %v240_v33 = vpop.f32.mrf.mxu1  ;;  %v176_v35 = vadd.f32 %v3152_v30, %v175_v32  ;;  %v2620_v30 = vld [vmem:[%s4838_s3 + $0xa8] sm:$0xff]  ;;  %v2645_v32 = vld [vmem:[%s4839_s4 + $0x130] sm:$0xff] }
 0x118   :  { %676 = vmatpush.msrb.mxu1 %v2603_v43 }
 0x119   :  { %v241_v38 = vadd.f32 %v240_v33, %v176_v35  ;;  %v2644_v33 = vld [vmem:[%s4839_s4 + $0x128] sm:$0xff]  ;;  %v2621_v35 = vld [vmem:[%s4838_s3 + $0xb0] sm:$0xff] }
 0x11a   :  { %819 = vmatpush.msra.mxu1 %v2626_v45  ;;  %v2593_v45 = vld [vmem:[%s4839_s4 + $0x80] sm:$0xff] }
 0x11b   :  { %v3159_v41 = vmax.f32 %v241_v38, 0.0  ;;  %v291_v38 = vld [vmem:[%s4839_s4 + $0x18] sm:$0xff] }
 0x11c   :  { %820 = vmatpush.msra.mxu1 %v2625_v48 }
 0x11d   :  { %262 = vmatpush.msra.mxu2 %v3159_v41  ;;  %296 = vmatpush.msra.mxu3 %v3159_v41 }
 0x11e   :  { %621 = vmatpush.msrb.mxu0 %v3159_v41  ;;  %821 = vmatpush.msra.mxu1 %v2624_v52 }
 0x11f   :  { %263 = vmatpush.msra.mxu2 %v3162_v44  ;;  %297 = vmatpush.msra.mxu3 %v3162_v44 }
 0x120   :  { %622 = vmatpush.msrb.mxu0 %v3162_v44  ;;  %822 = vmatpush.msra.mxu1 %v2623_v54  ;;  %v2580_v54 = vld [vmem:[%s4838_s3 + $0x48] sm:$0xff] }
 0x121   :  { %264 = vmatpush.msra.mxu2 %v3168_v47  ;;  %298 = vmatpush.msra.mxu3 %v3168_v47 }
 0x122   :  { %623 = vmatpush.msrb.mxu0 %v3168_v47 }
 0x123   :  { %265 = vmatpush.msra.mxu2 %v3174_v50  ;;  %299 = vmatpush.msra.mxu3 %v3174_v50 }
 0x124   :  { %624 = vmatpush.msrb.mxu0 %v3174_v50 }
 0x125   :  { %266 = vmatpush.msra.mxu2 %v3180_v53  ;;  %300 = vmatpush.msra.mxu3 %v3180_v53 }
 0x126   :  { %625 = vmatpush.msrb.mxu0 %v3180_v53 }
 0x127   :  { %267 = vmatpush.msra.mxu2 %v3186_v56  ;;  %301 = vmatpush.msra.mxu3 %v3186_v56 }
 0x128   :  { %626 = vmatpush.msrb.mxu0 %v3186_v56 }
 0x129   :  { %268 = vmatpush.msra.mxu2 %v3192_v59  ;;  %302 = vmatpush.msra.mxu3 %v3192_v59 }
 0x12a   :  { %627 = vmatpush.msrb.mxu0 %v3192_v59 }
 0x12b   :  { %269 = vmatpush.msra.mxu2 %v3200_v62  ;;  %303 = vmatpush.msra.mxu3 %v3200_v62 }
 0x12c   :  { %628 = vmatpush.msrb.mxu0 %v3200_v62 }
 0x12d   :  { %270 = vmatpush.msra.mxu2 %v3208_v12  ;;  %304 = vmatpush.msra.mxu3 %v3208_v12 }
 0x12e   :  { %629 = vmatpush.msrb.mxu0 %v3208_v12 }
 0x12f   :  { %271 = vmatpush.msra.mxu2 %v3216_v14  ;;  %305 = vmatpush.msra.mxu3 %v3216_v14 }
 0x130   :  { %630 = vmatpush.msrb.mxu0 %v3216_v14 }
 0x131   :  { %272 = vmatpush.msra.mxu2 %v3224_v15  ;;  %306 = vmatpush.msra.mxu3 %v3224_v15 }
 0x132   :  { %631 = vmatpush.msrb.mxu0 %v3224_v15 }
 0x133   :  { %273 = vmatpush.msra.mxu2 %v3232_v16  ;;  %307 = vmatpush.msra.mxu3 %v3232_v16 }
 0x134   :  { %632 = vmatpush.msrb.mxu0 %v3232_v16 }
 0x135   :  { %274 = vmatpush.msra.mxu2 %v3238_v7  ;;  %308 = vmatpush.msra.mxu3 %v3238_v7 }
 0x136   :  { %633 = vmatpush.msrb.mxu0 %v3238_v7 }
 0x137   :  { %275 = vmatpush.msra.mxu2 %v3244_v5  ;;  %309 = vmatpush.msra.mxu3 %v3244_v5 }
 0x138   :  { %634 = vmatpush.msrb.mxu0 %v3244_v5 }
 0x139   :  { %276 = vmatpush.msra.mxu2 %v3249_v17  ;;  %310 = vmatpush.msra.mxu3 %v3249_v17 }
 0x13a   :  { %635 = vmatpush.msrb.mxu0 %v3249_v17 }
 0x13b   :  { %277 = vmatpush.msra.mxu2 %v3254_v3  ;;  %311 = vmatpush.msra.mxu3 %v3254_v3 }
 0x13c   :  { %636 = vmatpush.msrb.mxu0 %v3254_v3  ;;  %278 = vmatmul.f32.vlgmr.msra.gmra.mxu2 %v259_v1 }
 0x13d   :  { %312 = vmatmul.f32.vlgmr.msra.gmra.mxu3 %v2557_v18  ;;  %349 = vmatpush.msrb.mxu2 %v2563_v19  ;;  %v2570_v18 = vld [vmem:[%s4838_s3 + $0x30] sm:$0xff]  ;;  %v2666_v19 = vld [vmem:[%s4839_s4 + $0x178] sm:$0xff] }
 0x13e   :  { %637 = vmatmul.f32.vlgmr.msrb.gmra.mxu0 %v2600_v20  ;;  %384 = vmatpush.msrb.mxu3 %v291_v38  ;;  %v2596_v38 = vld [vmem:[%s4839_s4 + $0x98] sm:$0xff] }
 0x13f   :  { %767 = vmatpush.msra.mxu0 %v3159_v41  ;;  %350 = vmatpush.msrb.mxu2 %v2562_v21  ;;  %v2665_v21 = vld [vmem:[%s4839_s4 + $0x170] sm:$0xff] }
 0x140   :  { %385 = vmatpush.msrb.mxu3 %v290_v40  ;;  %v2595_v40 = vld [vmem:[%s4839_s4 + $0x90] sm:$0xff] }
 0x141   :  { %768 = vmatpush.msra.mxu0 %v3162_v44  ;;  %351 = vmatpush.msrb.mxu2 %v2561_v22  ;;  %v2664_v22 = vld [vmem:[%s4839_s4 + $0x168] sm:$0xff] }
 0x142   :  { %386 = vmatpush.msrb.mxu3 %v289_v42  ;;  %v2594_v42 = vld [vmem:[%s4839_s4 + $0x88] sm:$0xff] }
 0x143   :  { %769 = vmatpush.msra.mxu0 %v3168_v47  ;;  %352 = vmatpush.msrb.mxu2 %v2560_v23  ;;  %v2571_v23 = vld [vmem:[%s4838_s3 + $0x38] sm:$0xff] }
 0x144   :  { %281 = vmatmul.f32.gmra.mxu2 %v260_v24  ;;  %387 = vmatpush.msrb.mxu3 %v288_v46  ;;  %v2663_v24 = vld [vmem:[%s4839_s4 + $0x160] sm:$0xff] }
 0x145   :  { %402 = vmatpush.msra.mxu2 %v3159_v41  ;;  %770 = vmatpush.msra.mxu0 %v3174_v50 }
 0x146   :  { %315 = vmatmul.f32.gmra.mxu3 %v2558_v25  ;;  %640 = vmatmul.f32.gmra.mxu0 %v2601_v26  ;;  %v2572_v26 = vld [vmem:[%s4838_s3 + $0x40] sm:$0x3] }
 0x147   :  { %403 = vmatpush.msra.mxu2 %v3162_v44  ;;  %771 = vmatpush.msra.mxu0 %v3180_v53 }
 0x148   :  { %454 = vmatpush.msra.mxu3 %v2576_v51  ;;  %v2686_v51 = vld [vmem:[%s4839_s4 + $0x1b8] sm:$0xff] }
 0x149   :  { %404 = vmatpush.msra.mxu2 %v3168_v47  ;;  %772 = vmatpush.msra.mxu0 %v3186_v56 }
 0x14a   :  { %455 = vmatpush.msra.mxu3 %v2575_v55  ;;  %v2685_v55 = vld [vmem:[%s4839_s4 + $0x1b0] sm:$0xff] }
 0x14b   :  { %405 = vmatpush.msra.mxu2 %v3174_v50  ;;  %773 = vmatpush.msra.mxu0 %v3192_v59 }
 0x14c   :  { %284 = vmatmul.f32.gmra.mxu2 %v261_v27  ;;  %456 = vmatpush.msra.mxu3 %v2574_v57  ;;  %v2684_v57 = vld [vmem:[%s4839_s4 + $0x1a8] sm:$0xff] }
 0x14d   :  { %406 = vmatpush.msra.mxu2 %v3180_v53  ;;  %774 = vmatpush.msra.mxu0 %v3200_v62 }
 0x14e   :  { %318 = vmatmul.f32.gmra.mxu3 %v2559_v28  ;;  %643 = vmatmul.f32.gmra.mxu0 %v2602_v29  ;;  %v2640_v28 = vld [vmem:[%s4838_s3 + $0xd8] sm:$0xff]  ;;  %v2641_v29 = vld [vmem:[%s4838_s3 + $0xe0] sm:$0xff] }
 0x14f   :  { %407 = vmatpush.msra.mxu2 %v3186_v56  ;;  %775 = vmatpush.msra.mxu0 %v3208_v12 }
 0x150   :  { %457 = vmatpush.msra.mxu3 %v2573_v58  ;;  %v2683_v58 = vld [vmem:[%s4839_s4 + $0x1a0] sm:$0xff] }
 0x151   :  { %408 = vmatpush.msra.mxu2 %v3192_v59  ;;  %776 = vmatpush.msra.mxu0 %v3216_v14 }
 0x153   :  { %409 = vmatpush.msra.mxu2 %v3200_v62  ;;  %777 = vmatpush.msra.mxu0 %v3224_v15 }
 0x155   :  { %410 = vmatpush.msra.mxu2 %v3208_v12  ;;  %778 = vmatpush.msra.mxu0 %v3232_v16 }
 0x157   :  { %411 = vmatpush.msra.mxu2 %v3216_v14  ;;  %779 = vmatpush.msra.mxu0 %v3238_v7 }
 0x159   :  { %412 = vmatpush.msra.mxu2 %v3224_v15  ;;  %780 = vmatpush.msra.mxu0 %v3244_v5 }
 0x15b   :  { %413 = vmatpush.msra.mxu2 %v3232_v16  ;;  %781 = vmatpush.msra.mxu0 %v3249_v17 }
 0x15d   :  { %414 = vmatpush.msra.mxu2 %v3238_v7  ;;  %782 = vmatpush.msra.mxu0 %v3254_v3 }
 0x15e   :  { %783 = vmatmul.f32.vlgmr.msra.gmra.mxu0 %v2620_v30  ;;  %v2642_v30 = vld [vmem:[%s4838_s3 + $0xe8] sm:$0x3] }
 0x15f   :  { %415 = vmatpush.msra.mxu2 %v3244_v5  ;;  %965 = vmatpush.msrb.mxu0 %v2646_v31 }
 0x161   :  { %416 = vmatpush.msra.mxu2 %v3249_v17  ;;  %966 = vmatpush.msrb.mxu0 %v2645_v32 }
 0x163   :  { %417 = vmatpush.msra.mxu2 %v3254_v3  ;;  %967 = vmatpush.msrb.mxu0 %v2644_v33 }
 0x165   :  { %968 = vmatpush.msrb.mxu0 %v2643_v34 }
 0x166   :  { %786 = vmatmul.f32.gmra.mxu0 %v2621_v35 }
 0x167   :  { %1059 = vmatpush.msra.mxu0 %v3159_v41 }
 0x169   :  { %1060 = vmatpush.msra.mxu0 %v3162_v44 }
 0x16b   :  { %1061 = vmatpush.msra.mxu0 %v3168_v47 }
 0x16d   :  { %1062 = vmatpush.msra.mxu0 %v3174_v50 }
 0x16e   :  { %789 = vmatmul.f32.gmra.mxu0 %v2622_v49 }
 0x16f   :  { %1063 = vmatpush.msra.mxu0 %v3180_v53 }
 0x171   :  { %1064 = vmatpush.msra.mxu0 %v3186_v56 }
 0x173   :  { %1065 = vmatpush.msra.mxu0 %v3192_v59 }
 0x175   :  { %1066 = vmatpush.msra.mxu0 %v3200_v62 }
 0x177   :  { %1067 = vmatpush.msra.mxu0 %v3208_v12 }
 0x179   :  { %1068 = vmatpush.msra.mxu0 %v3216_v14 }
 0x17b   :  { %1069 = vmatpush.msra.mxu0 %v3224_v15 }
 0x17d   :  { %1070 = vmatpush.msra.mxu0 %v3232_v16 }
 0x17f   :  { %1071 = vmatpush.msra.mxu0 %v3238_v7 }
 0x181   :  { %1072 = vmatpush.msra.mxu0 %v3244_v5 }
 0x183   :  { %1073 = vmatpush.msra.mxu0 %v3249_v17 }
 0x185   :  { %1074 = vmatpush.msra.mxu0 %v3254_v3 }
 0x1bb   :  { %v638_v60 = vpop.f32.mrf.mxu0 }
 0x1bc   :  { %2607 = vmatmul.msk.f32.vlgmr.msrb.gmra.mxu1 %vm327_vm0, %v638_v60 }
 0x1bd   :  { %913 = vmatpush.msrb.mxu1 %v3159_v41 }
 0x1bf   :  { %914 = vmatpush.msrb.mxu1 %v3162_v44  ;;  %v279_v61 = vpop.f32.mrf.mxu2 }
 0x1c0   :  { %v313_v10 = vpop.f32.mrf.mxu3  ;;  %2567 = vmatmul.msk.f32.vlgmr.msrb.gmra.mxu3 %vm327_vm0, %v279_v61  ;;  %v2581_v61 = vld [vmem:[%s4838_s3 + $0x50] sm:$0xff] }
 0x1c1   :  { %915 = vmatpush.msrb.mxu1 %v3168_v47  ;;  %2564 = vmatmul.msk.f32.vlgmr.msrb.gmra.mxu2 %vm327_vm0, %v313_v10  ;;  %v2582_v10 = vld [vmem:[%s4838_s3 + $0x58] sm:$0x3] }
 0x1c2   :  { %475 = vmatpush.msrb.mxu3 %v3159_v41  ;;  %527 = vmatpush.msrb.mxu2 %v2586_v63 }
 0x1c3   :  { %916 = vmatpush.msrb.mxu1 %v3174_v50  ;;  %v641_v6 = vpop.f32.mrf.mxu0 }
 0x1c4   :  { %476 = vmatpush.msrb.mxu3 %v3162_v44  ;;  %528 = vmatpush.msrb.mxu2 %v2585_v8  ;;  %v2660_v8 = vld [vmem:[%s4838_s3 + $0x108] sm:$0xff] }
 0x1c5   :  { %917 = vmatpush.msrb.mxu1 %v3180_v53 }
 0x1c6   :  { %477 = vmatpush.msrb.mxu3 %v3168_v47  ;;  %2608 = vmatmul.msk.f32.gmra.mxu1 %vm327_vm0, %v641_v6 }
 0x1c7   :  { %918 = vmatpush.msrb.mxu1 %v3186_v56  ;;  %529 = vmatpush.msrb.mxu2 %v2584_v13  ;;  %v282_v11 = vpop.f32.mrf.mxu2 }
 0x1c8   :  { %478 = vmatpush.msrb.mxu3 %v3174_v50 }
 0x1c9   :  { %919 = vmatpush.msrb.mxu1 %v3192_v59  ;;  %v316_v9 = vpop.f32.mrf.mxu3  ;;  %2568 = vmatmul.msk.f32.gmra.mxu3 %vm327_vm0, %v282_v11 }
 0x1ca   :  { %2565 = vmatmul.msk.f32.gmra.mxu2 %vm327_vm0, %v316_v9  ;;  %479 = vmatpush.msrb.mxu3 %v3180_v53 }
 0x1cb   :  { %920 = vmatpush.msrb.mxu1 %v3200_v62  ;;  %530 = vmatpush.msrb.mxu2 %v2583_v4  ;;  %v644_v2 = vpop.f32.mrf.mxu0 }
 0x1cc   :  { %480 = vmatpush.msrb.mxu3 %v3186_v56 }
 0x1cd   :  { %921 = vmatpush.msrb.mxu1 %v3208_v12 }
 0x1ce   :  { %481 = vmatpush.msrb.mxu3 %v3192_v59  ;;  %2609 = vmatmul.msk.f32.gmra.mxu1 %vm327_vm0, %v644_v2 }
 0x1cf   :  { %922 = vmatpush.msrb.mxu1 %v3216_v14  ;;  %v285_v0 = vpop.f32.mrf.mxu2 }
 0x1d0   :  { %482 = vmatpush.msrb.mxu3 %v3200_v62 }
 0x1d1   :  { %923 = vmatpush.msrb.mxu1 %v3224_v15  ;;  %v319_v1 = vpop.f32.mrf.mxu3  ;;  %2569 = vmatmul.msk.f32.gmra.mxu3 %vm327_vm0, %v285_v0  ;;  %v2616_v0 = vld [vmem:[%s4839_s4 + $0xd8] sm:$0xff] }
 0x1d2   :  { %2566 = vmatmul.msk.f32.gmra.mxu2 %vm327_vm0, %v319_v1  ;;  %483 = vmatpush.msrb.mxu3 %v3208_v12 }
 0x1d3   :  { %924 = vmatpush.msrb.mxu1 %v3232_v16 }
 0x1d4   :  { %484 = vmatpush.msrb.mxu3 %v3216_v14 }
 0x1d5   :  { %925 = vmatpush.msrb.mxu1 %v3238_v7 }
 0x1d6   :  { %485 = vmatpush.msrb.mxu3 %v3224_v15 }
 0x1d7   :  { %926 = vmatpush.msrb.mxu1 %v3244_v5 }
 0x1d8   :  { %486 = vmatpush.msrb.mxu3 %v3232_v16 }
 0x1d9   :  { %927 = vmatpush.msrb.mxu1 %v3249_v17 }
 0x1da   :  { %418 = vmatmul.f32.vlgmr.msra.gmra.mxu2 %v2570_v18  ;;  %487 = vmatpush.msrb.mxu3 %v3238_v7  ;;  %v2615_v18 = vld [vmem:[%s4839_s4 + $0xd0] sm:$0xff] }
 0x1db   :  { %548 = vmatpush.msra.mxu2 %v3159_v41  ;;  %v784_v20 = vpop.f32.mrf.mxu0  ;;  %928 = vmatpush.msrb.mxu1 %v3254_v3 }
 0x1dc   :  { %2627 = vmatmul.msk.f32.vlgmr.msra.gmra.mxu1 %vm327_vm0, %v784_v20  ;;  %488 = vmatpush.msrb.mxu3 %v3244_v5  ;;  %v2613_v20 = vld [vmem:[%s4839_s4 + $0xc0] sm:$0xff] }
 0x1dd   :  { %549 = vmatpush.msra.mxu2 %v3162_v44  ;;  %1111 = vmatpush.msra.mxu1 %v2666_v19  ;;  %v2614_v19 = vld [vmem:[%s4839_s4 + $0xc8] sm:$0xff] }
 0x1de   :  { %489 = vmatpush.msrb.mxu3 %v3249_v17 }
 0x1df   :  { %550 = vmatpush.msra.mxu2 %v3168_v47  ;;  %1112 = vmatpush.msra.mxu1 %v2665_v21 }
 0x1e0   :  { %490 = vmatpush.msrb.mxu3 %v3254_v3 }
 0x1e1   :  { %551 = vmatpush.msra.mxu2 %v3174_v50  ;;  %1113 = vmatpush.msra.mxu1 %v2664_v22 }
 0x1e2   :  { %421 = vmatmul.f32.gmra.mxu2 %v2571_v23  ;;  %v2590_v23 = vld [vmem:[%s4838_s3 + $0x60] sm:$0xff] }
 0x1e3   :  { %552 = vmatpush.msra.mxu2 %v3180_v53  ;;  %1114 = vmatpush.msra.mxu1 %v2663_v24  ;;  %v787_v25 = vpop.f32.mrf.mxu0  ;;  %v2591_v24 = vld [vmem:[%s4838_s3 + $0x68] sm:$0xff] }
 0x1e4   :  { %2628 = vmatmul.msk.f32.gmra.mxu1 %vm327_vm0, %v787_v25  ;;  %v2592_v25 = vld [vmem:[%s4838_s3 + $0x70] sm:$0x3] }
 0x1e5   :  { %553 = vmatpush.msra.mxu2 %v3186_v56 }
 0x1e7   :  { %554 = vmatpush.msra.mxu2 %v3192_v59 }
 0x1e9   :  { %555 = vmatpush.msra.mxu2 %v3200_v62 }
 0x1ea   :  { %424 = vmatmul.f32.gmra.mxu2 %v2572_v26 }
 0x1eb   :  { %556 = vmatpush.msra.mxu2 %v3208_v12  ;;  %v790_v27 = vpop.f32.mrf.mxu0 }
 0x1ec   :  { %2629 = vmatmul.msk.f32.gmra.mxu1 %vm327_vm0, %v790_v27 }
 0x1ed   :  { %557 = vmatpush.msra.mxu2 %v3216_v14 }
 0x1ef   :  { %558 = vmatpush.msra.mxu2 %v3224_v15 }
 0x1f1   :  { %559 = vmatpush.msra.mxu2 %v3232_v16 }
 0x1f3   :  { %560 = vmatpush.msra.mxu2 %v3238_v7 }
 0x1f4   :  { %929 = vmatmul.f32.vlgmr.msrb.gmra.mxu1 %v2640_v28 }
 0x1f5   :  { %561 = vmatpush.msra.mxu2 %v3244_v5  ;;  %1205 = vmatpush.msrb.mxu1 %v3159_v41 }
 0x1f7   :  { %562 = vmatpush.msra.mxu2 %v3249_v17  ;;  %1206 = vmatpush.msrb.mxu1 %v3162_v44 }
 0x1f9   :  { %563 = vmatpush.msra.mxu2 %v3254_v3  ;;  %1207 = vmatpush.msrb.mxu1 %v3168_v47 }
 0x1fb   :  { %1208 = vmatpush.msrb.mxu1 %v3174_v50 }
 0x1fc   :  { %932 = vmatmul.f32.gmra.mxu1 %v2641_v29  ;;  %v2636_v29 = vld [vmem:[%s4839_s4 + $0x118] sm:$0xff] }
 0x1fd   :  { %1209 = vmatpush.msrb.mxu1 %v3180_v53 }
 0x1ff   :  { %1210 = vmatpush.msrb.mxu1 %v3186_v56 }
 0x201   :  { %1211 = vmatpush.msrb.mxu1 %v3192_v59 }
 0x203   :  { %1212 = vmatpush.msrb.mxu1 %v3200_v62 }
 0x204   :  { %935 = vmatmul.f32.gmra.mxu1 %v2642_v30 }
 0x205   :  { %1213 = vmatpush.msrb.mxu1 %v3208_v12 }
 0x207   :  { %1214 = vmatpush.msrb.mxu1 %v3216_v14 }
 0x209   :  { %1215 = vmatpush.msrb.mxu1 %v3224_v15 }
 0x20b   :  { %1216 = vmatpush.msrb.mxu1 %v3232_v16 }
 0x20d   :  { %1217 = vmatpush.msrb.mxu1 %v3238_v7 }
 0x20f   :  { %1218 = vmatpush.msrb.mxu1 %v3244_v5 }
 0x211   :  { %1219 = vmatpush.msrb.mxu1 %v3249_v17 }
 0x213   :  { %1220 = vmatpush.msrb.mxu1 %v3254_v3 }
 0x239   :  { %v3536_v31 = vpop.f32.mrf.mxu1 }
 0x243   :  { %v3540_v33 = vpop.f32.mrf.mxu1  ;;  %v3628_v13 = vpop.f32.mrf.mxu3 }
 0x244   :  { %v3538_v32 = vpop.f32.mrf.mxu2 }
 0x24b   :  { %v3544_v35 = vpop.f32.mrf.mxu1 }
 0x24c   :  { %v3630_v6 = vpop.f32.mrf.mxu3 }
 0x24d   :  { %v3542_v34 = vpop.f32.mrf.mxu2 }
 0x254   :  { %v3632_v11 = vpop.f32.mrf.mxu3 }
 0x255   :  { %v3546_v36 = vpop.f32.mrf.mxu2 }
 0x259   :  { %v3548_v37 = vpop.f32.mrf.mxu1 }
 0x25d   :  { %v419_v39 = vpop.f32.mrf.mxu2 }
 0x25e   :  { %2577 = vmatmul.msk.f32.vlgmr.msra.gmra.mxu3 %vm327_vm0, %v419_v39  ;;  %v2634_v39 = vld [vmem:[%s4839_s4 + $0x108] sm:$0xff] }
 0x25f   :  { %600 = vmatpush.msra.mxu3 %v2596_v38  ;;  %v2635_v38 = vld [vmem:[%s4839_s4 + $0x110] sm:$0xff] }
 0x261   :  { %601 = vmatpush.msra.mxu3 %v2595_v40  ;;  %v3560_v43 = vpop.f32.mrf.mxu1  ;;  %v2633_v40 = vld [vmem:[%s4839_s4 + $0x100] sm:$0xff] }
 0x263   :  { %602 = vmatpush.msra.mxu3 %v2594_v42 }
 0x265   :  { %v422_v46 = vpop.f32.mrf.mxu2  ;;  %603 = vmatpush.msra.mxu3 %v2593_v45 }
 0x266   :  { %2578 = vmatmul.msk.f32.gmra.mxu3 %vm327_vm0, %v422_v46  ;;  %v2610_v46 = vld [vmem:[%s4838_s3 + $0x90] sm:$0xff] }
 0x269   :  { %v3566_v48 = vpop.f32.mrf.mxu1 }
 0x26d   :  { %v425_v49 = vpop.f32.mrf.mxu2 }
 0x26e   :  { %2579 = vmatmul.msk.f32.gmra.mxu3 %vm327_vm0, %v425_v49  ;;  %v2611_v49 = vld [vmem:[%s4838_s3 + $0x98] sm:$0xff] }
 0x271   :  { %v930_v52 = vpop.f32.mrf.mxu1 }
 0x272   :  { %2647 = vmatmul.msk.f32.vlgmr.msrb.gmra.mxu0 %vm327_vm0, %v930_v52 }
 0x273   :  { %1257 = vmatpush.msrb.mxu0 %v2686_v51  ;;  %v2612_v51 = vld [vmem:[%s4838_s3 + $0xa0] sm:$0x3] }
 0x275   :  { %1258 = vmatpush.msrb.mxu0 %v2685_v55 }
 0x276   :  { %491 = vmatmul.f32.vlgmr.msrb.gmra.mxu3 %v2580_v54 }
 0x277   :  { %694 = vmatpush.msrb.mxu3 %v3159_v41  ;;  %1259 = vmatpush.msrb.mxu0 %v2684_v57  ;;  %v2656_v57 = vld [vmem:[%s4839_s4 + $0x158] sm:$0xff] }
 0x279   :  { %695 = vmatpush.msrb.mxu3 %v3162_v44  ;;  %v933_v60 = vpop.f32.mrf.mxu1  ;;  %1260 = vmatpush.msrb.mxu0 %v2683_v58 }
 0x27a   :  { %2648 = vmatmul.msk.f32.gmra.mxu0 %vm327_vm0, %v933_v60  ;;  %v2655_v60 = vld [vmem:[%s4839_s4 + $0x150] sm:$0xff] }
 0x27b   :  { %696 = vmatpush.msrb.mxu3 %v3168_v47 }
 0x27d   :  { %697 = vmatpush.msrb.mxu3 %v3174_v50 }
 0x27e   :  { %494 = vmatmul.f32.gmra.mxu3 %v2581_v61  ;;  %v2654_v61 = vld [vmem:[%s4839_s4 + $0x148] sm:$0xff] }
 0x27f   :  { %698 = vmatpush.msrb.mxu3 %v3180_v53 }
 0x281   :  { %699 = vmatpush.msrb.mxu3 %v3186_v56  ;;  %v936_v63 = vpop.f32.mrf.mxu1 }
 0x282   :  { %2649 = vmatmul.msk.f32.gmra.mxu0 %vm327_vm0, %v936_v63  ;;  %v2653_v63 = vld [vmem:[%s4839_s4 + $0x140] sm:$0xff] }
 0x283   :  { %700 = vmatpush.msrb.mxu3 %v3192_v59 }
 0x285   :  { %701 = vmatpush.msrb.mxu3 %v3200_v62 }
 0x286   :  { %497 = vmatmul.f32.gmra.mxu3 %v2582_v10 }
 0x287   :  { %702 = vmatpush.msrb.mxu3 %v3208_v12 }
 0x289   :  { %703 = vmatpush.msrb.mxu3 %v3216_v14 }
 0x28a   :  { %1075 = vmatmul.f32.vlgmr.msra.gmra.mxu0 %v2660_v8 }
 0x28b   :  { %704 = vmatpush.msrb.mxu3 %v3224_v15  ;;  %1351 = vmatpush.msra.mxu0 %v3159_v41 }
 0x28d   :  { %705 = vmatpush.msrb.mxu3 %v3232_v16  ;;  %1352 = vmatpush.msra.mxu0 %v3162_v44 }
 0x28f   :  { %706 = vmatpush.msrb.mxu3 %v3238_v7  ;;  %1353 = vmatpush.msra.mxu0 %v3168_v47 }
 0x291   :  { %707 = vmatpush.msrb.mxu3 %v3244_v5  ;;  %1354 = vmatpush.msra.mxu0 %v3174_v50 }
 0x293   :  { %708 = vmatpush.msrb.mxu3 %v3249_v17  ;;  %1355 = vmatpush.msra.mxu0 %v3180_v53 }
 0x295   :  { %709 = vmatpush.msrb.mxu3 %v3254_v3  ;;  %1356 = vmatpush.msra.mxu0 %v3186_v56 }
 0x297   :  { %1357 = vmatpush.msra.mxu0 %v3192_v59 }
 0x299   :  { %1358 = vmatpush.msra.mxu0 %v3200_v62 }
 0x29b   :  { %1359 = vmatpush.msra.mxu0 %v3208_v12 }
 0x29d   :  { %1360 = vmatpush.msra.mxu0 %v3216_v14 }
 0x29f   :  { %1361 = vmatpush.msra.mxu0 %v3224_v15 }
 0x2a1   :  { %1362 = vmatpush.msra.mxu0 %v3232_v16 }
 0x2a3   :  { %1363 = vmatpush.msra.mxu0 %v3238_v7 }
 0x2a5   :  { %1364 = vmatpush.msra.mxu0 %v3244_v5 }
 0x2a7   :  { %1365 = vmatpush.msra.mxu0 %v3249_v17 }
 0x2a9   :  { %1366 = vmatpush.msra.mxu0 %v3254_v3 }
 0x2e1   :  { %v3634_v4 = vpop.f32.mrf.mxu3 }
 0x2e9   :  { %v3636_v9 = vpop.f32.mrf.mxu3 }
 0x2f1   :  { %v3638_v2 = vpop.f32.mrf.mxu3 }
 0x2f9   :  { %v492_v1 = vpop.f32.mrf.mxu3 }
 0x2fa   :  { %2587 = vmatmul.msk.f32.vlgmr.msrb.gmra.mxu2 %vm327_vm0, %v492_v1  ;;  %v2631_v1 = vld [vmem:[%s4838_s3 + $0xc8] sm:$0xff] }
 0x2fb   :  { %746 = vmatpush.msrb.mxu2 %v2616_v0  ;;  %v2630_v0 = vld [vmem:[%s4838_s3 + $0xc0] sm:$0xff] }
 0x2fd   :  { %747 = vmatpush.msrb.mxu2 %v2615_v18  ;;  %v2632_v18 = vld [vmem:[%s4838_s3 + $0xd0] sm:$0x3] }
 0x2ff   :  { %748 = vmatpush.msrb.mxu2 %v2614_v19 }
 0x301   :  { %v495_v21 = vpop.f32.mrf.mxu3  ;;  %749 = vmatpush.msrb.mxu2 %v2613_v20 }
 0x302   :  { %2588 = vmatmul.msk.f32.gmra.mxu2 %vm327_vm0, %v495_v21 }
 0x309   :  { %v498_v22 = vpop.f32.mrf.mxu3 }
 0x30a   :  { %2589 = vmatmul.msk.f32.gmra.mxu2 %vm327_vm0, %v498_v22  ;;  %v2676_v22 = vld [vmem:[%s4839_s4 + $0x198] sm:$0xff] }
 0x312   :  { %564 = vmatmul.f32.vlgmr.msra.gmra.mxu2 %v2590_v23 }
 0x313   :  { %840 = vmatpush.msra.mxu2 %v3159_v41 }
 0x315   :  { %841 = vmatpush.msra.mxu2 %v3162_v44 }
 0x317   :  { %842 = vmatpush.msra.mxu2 %v3168_v47 }
 0x319   :  { %843 = vmatpush.msra.mxu2 %v3174_v50 }
 0x31a   :  { %567 = vmatmul.f32.gmra.mxu2 %v2591_v24  ;;  %v2675_v24 = vld [vmem:[%s4839_s4 + $0x190] sm:$0xff] }
 0x31b   :  { %844 = vmatpush.msra.mxu2 %v3180_v53 }
 0x31d   :  { %845 = vmatpush.msra.mxu2 %v3186_v56 }
 0x31f   :  { %846 = vmatpush.msra.mxu2 %v3192_v59 }
 0x321   :  { %847 = vmatpush.msra.mxu2 %v3200_v62 }
 0x322   :  { %570 = vmatmul.f32.gmra.mxu2 %v2592_v25  ;;  %v2674_v25 = vld [vmem:[%s4839_s4 + $0x188] sm:$0xff] }
 0x323   :  { %848 = vmatpush.msra.mxu2 %v3208_v12 }
 0x325   :  { %849 = vmatpush.msra.mxu2 %v3216_v14 }
 0x327   :  { %850 = vmatpush.msra.mxu2 %v3224_v15 }
 0x329   :  { %851 = vmatpush.msra.mxu2 %v3232_v16 }
 0x32b   :  { %852 = vmatpush.msra.mxu2 %v3238_v7 }
 0x32d   :  { %853 = vmatpush.msra.mxu2 %v3244_v5 }
 0x32f   :  { %854 = vmatpush.msra.mxu2 %v3249_v17 }
 0x331   :  { %855 = vmatpush.msra.mxu2 %v3254_v3 }
 0x37d   :  { %v3680_v26 = vpop.f32.mrf.mxu2 }
 0x385   :  { %v3682_v27 = vpop.f32.mrf.mxu2 }
 0x38d   :  { %v3684_v28 = vpop.f32.mrf.mxu2 }
 0x395   :  { %v565_v30 = vpop.f32.mrf.mxu2 }
 0x396   :  { %2597 = vmatmul.msk.f32.vlgmr.msra.gmra.mxu3 %vm327_vm0, %v565_v30 }
 0x397   :  { %892 = vmatpush.msra.mxu3 %v2636_v29  ;;  %v2673_v29 = vld [vmem:[%s4839_s4 + $0x180] sm:$0xff] }
 0x399   :  { %893 = vmatpush.msra.mxu3 %v2635_v38  ;;  %v2661_v38 = vld [vmem:[%s4838_s3 + $0x110] sm:$0xff] }
 0x39a   :  { %1078 = vmatmul.f32.gmra.mxu0 %v2661_v38 }
 0x39b   :  { %894 = vmatpush.msra.mxu3 %v2634_v39 }
 0x39d   :  { %v568_v42 = vpop.f32.mrf.mxu2  ;;  %895 = vmatpush.msra.mxu3 %v2633_v40  ;;  %v2650_v40 = vld [vmem:[%s4838_s3 + $0xf0] sm:$0xff] }
 0x39e   :  { %2598 = vmatmul.msk.f32.gmra.mxu3 %vm327_vm0, %v568_v42  ;;  %v2662_v42 = vld [vmem:[%s4838_s3 + $0x118] sm:$0x3] }
 0x3a2   :  { %1081 = vmatmul.f32.gmra.mxu0 %v2662_v42  ;;  %v2700_v42 = vld [vmem:[%s4838_s3 + $0x168] sm:$0xff] }
 0x3a5   :  { %v571_v45 = vpop.f32.mrf.mxu2 }
 0x3a6   :  { %2599 = vmatmul.msk.f32.gmra.mxu3 %vm327_vm0, %v571_v45  ;;  %v2651_v45 = vld [vmem:[%s4838_s3 + $0xf8] sm:$0xff] }
 0x3ae   :  { %710 = vmatmul.f32.vlgmr.msrb.gmra.mxu3 %v2610_v46 }
 0x3af   :  { %986 = vmatpush.msrb.mxu3 %v3159_v41 }
 0x3b1   :  { %987 = vmatpush.msrb.mxu3 %v3162_v44 }
 0x3b3   :  { %988 = vmatpush.msrb.mxu3 %v3168_v47 }
 0x3b5   :  { %989 = vmatpush.msrb.mxu3 %v3174_v50 }
 0x3b6   :  { %713 = vmatmul.f32.gmra.mxu3 %v2611_v49 }
 0x3b7   :  { %990 = vmatpush.msrb.mxu3 %v3180_v53 }
 0x3b9   :  { %991 = vmatpush.msrb.mxu3 %v3186_v56 }
 0x3bb   :  { %992 = vmatpush.msrb.mxu3 %v3192_v59 }
 0x3bd   :  { %993 = vmatpush.msrb.mxu3 %v3200_v62 }
 0x3be   :  { %716 = vmatmul.f32.gmra.mxu3 %v2612_v51 }
 0x3bf   :  { %994 = vmatpush.msrb.mxu3 %v3208_v12 }
 0x3c1   :  { %995 = vmatpush.msrb.mxu3 %v3216_v14 }
 0x3c3   :  { %996 = vmatpush.msrb.mxu3 %v3224_v15 }
 0x3c5   :  { %997 = vmatpush.msrb.mxu3 %v3232_v16 }
 0x3c7   :  { %998 = vmatpush.msrb.mxu3 %v3238_v7 }
 0x3c9   :  { %999 = vmatpush.msrb.mxu3 %v3244_v5 }
 0x3cb   :  { %1000 = vmatpush.msrb.mxu3 %v3249_v17 }
 0x3cd   :  { %1001 = vmatpush.msrb.mxu3 %v3254_v3 }
 0x419   :  { %v3726_v52 = vpop.f32.mrf.mxu3 }
 0x421   :  { %v3728_v54 = vpop.f32.mrf.mxu3 }
 0x429   :  { %v3730_v55 = vpop.f32.mrf.mxu3 }
 0x431   :  { %v711_v58 = vpop.f32.mrf.mxu3 }
 0x432   :  { %2617 = vmatmul.msk.f32.vlgmr.msrb.gmra.mxu2 %vm327_vm0, %v711_v58  ;;  %v2682_v58 = vld [vmem:[%s4838_s3 + $0x148] sm:$0x3] }
 0x433   :  { %1038 = vmatpush.msrb.mxu2 %v2656_v57 }
 0x435   :  { %1039 = vmatpush.msrb.mxu2 %v2655_v60 }
 0x437   :  { %1040 = vmatpush.msrb.mxu2 %v2654_v61  ;;  %v2670_v61 = vld [vmem:[%s4838_s3 + $0x120] sm:$0xff] }
 0x439   :  { %v714_v10 = vpop.f32.mrf.mxu3  ;;  %1041 = vmatpush.msrb.mxu2 %v2653_v63  ;;  %v2671_v63 = vld [vmem:[%s4838_s3 + $0x128] sm:$0xff] }
 0x43a   :  { %2618 = vmatmul.msk.f32.gmra.mxu2 %vm327_vm0, %v714_v10  ;;  %v2672_v10 = vld [vmem:[%s4838_s3 + $0x130] sm:$0x3] }
 0x441   :  { %v717_v8 = vpop.f32.mrf.mxu3 }
 0x442   :  { %2619 = vmatmul.msk.f32.gmra.mxu2 %vm327_vm0, %v717_v8 }
 0x44a   :  { %856 = vmatmul.f32.vlgmr.msra.gmra.mxu2 %v2630_v0 }
 0x44b   :  { %1132 = vmatpush.msra.mxu2 %v3159_v41 }
 0x44d   :  { %1133 = vmatpush.msra.mxu2 %v3162_v44 }
 0x44f   :  { %1134 = vmatpush.msra.mxu2 %v3168_v47 }
 0x451   :  { %1135 = vmatpush.msra.mxu2 %v3174_v50 }
 0x452   :  { %859 = vmatmul.f32.gmra.mxu2 %v2631_v1 }
 0x453   :  { %1136 = vmatpush.msra.mxu2 %v3180_v53 }
 0x455   :  { %1137 = vmatpush.msra.mxu2 %v3186_v56 }
 0x457   :  { %1138 = vmatpush.msra.mxu2 %v3192_v59 }
 0x459   :  { %1139 = vmatpush.msra.mxu2 %v3200_v62 }
 0x45a   :  { %862 = vmatmul.f32.gmra.mxu2 %v2632_v18 }
 0x45b   :  { %1140 = vmatpush.msra.mxu2 %v3208_v12 }
 0x45d   :  { %1141 = vmatpush.msra.mxu2 %v3216_v14 }
 0x45f   :  { %1142 = vmatpush.msra.mxu2 %v3224_v15 }
 0x461   :  { %1143 = vmatpush.msra.mxu2 %v3232_v16 }
 0x463   :  { %1144 = vmatpush.msra.mxu2 %v3238_v7 }
 0x465   :  { %1145 = vmatpush.msra.mxu2 %v3244_v5 }
 0x467   :  { %1146 = vmatpush.msra.mxu2 %v3249_v17 }
 0x469   :  { %1147 = vmatpush.msra.mxu2 %v3254_v3 }
 0x4b5   :  { %v751_v19 = vpop.f32.mrf.mxu2 }
 0x4bd   :  { %v3772_v20 = vpop.f32.mrf.mxu2 }
 0x4c5   :  { %v3774_v21 = vpop.f32.mrf.mxu2 }
 0x4cd   :  { %v857_v23 = vpop.f32.mrf.mxu2 }
 0x4ce   :  { %2637 = vmatmul.msk.f32.vlgmr.msra.gmra.mxu3 %vm327_vm0, %v857_v23 }
 0x4cf   :  { %1184 = vmatpush.msra.mxu3 %v2676_v22 }
 0x4d1   :  { %1185 = vmatpush.msra.mxu3 %v2675_v24 }
 0x4d3   :  { %1186 = vmatpush.msra.mxu3 %v2674_v25 }
 0x4d5   :  { %v860_v30 = vpop.f32.mrf.mxu2  ;;  %1187 = vmatpush.msra.mxu3 %v2673_v29 }
 0x4d6   :  { %2638 = vmatmul.msk.f32.gmra.mxu3 %vm327_vm0, %v860_v30 }
 0x4dd   :  { %v863_v39 = vpop.f32.mrf.mxu2 }
 0x4de   :  { %2639 = vmatmul.msk.f32.gmra.mxu3 %vm327_vm0, %v863_v39 }
 0x4e6   :  { %1002 = vmatmul.f32.vlgmr.msrb.gmra.mxu3 %v2650_v40 }
 0x4e7   :  { %1278 = vmatpush.msrb.mxu3 %v3159_v41  ;;  %v2652_v41 = vld [vmem:[%s4838_s3 + $0x100] sm:$0x3] }
 0x4e9   :  { %1279 = vmatpush.msrb.mxu3 %v3162_v44  ;;  %v970_v44 = vpop.f32.mrf.mxu0 }
 0x4eb   :  { %1280 = vmatpush.msrb.mxu3 %v3168_v47 }
 0x4ed   :  { %1281 = vmatpush.msrb.mxu3 %v3174_v50  ;;  %v390_v50 = vadd.f32 %v3628_v13, %v3538_v32 }
 0x4ee   :  { %1005 = vmatmul.f32.gmra.mxu3 %v2651_v45 }
 0x4ef   :  { %1282 = vmatpush.msrb.mxu3 %v3180_v53  ;;  %v468_v53 = vadd.f32 %v3634_v4, %v390_v50  ;;  %v2690_v50 = vld [vmem:[%s4838_s3 + $0x150] sm:$0xff] }
 0x4f1   :  { %1283 = vmatpush.msrb.mxu3 %v3186_v56  ;;  %v973_v47 = vpop.f32.mrf.mxu0  ;;  %v541_v56 = vadd.f32 %v3680_v26, %v468_v53  ;;  %v2691_v53 = vld [vmem:[%s4838_s3 + $0x158] sm:$0xff] }
 0x4f3   :  { %1284 = vmatpush.msrb.mxu3 %v3192_v59  ;;  %v614_v59 = vadd.f32 %v3726_v52, %v541_v56  ;;  %v2692_v56 = vld [vmem:[%s4838_s3 + $0x160] sm:$0x3] }
 0x4f5   :  { %1285 = vmatpush.msrb.mxu3 %v3200_v62  ;;  %v393_v62 = vadd.f32 %v3630_v6, %v3542_v34 }
 0x4f6   :  { %1008 = vmatmul.f32.gmra.mxu3 %v2652_v41  ;;  %v2701_v41 = vld [vmem:[%s4838_s3 + $0x170] sm:$0xff] }
 0x4f7   :  { %1286 = vmatpush.msrb.mxu3 %v3208_v12 }
 0x4f9   :  { %1287 = vmatpush.msrb.mxu3 %v3216_v14  ;;  %v976_v12 = vpop.f32.mrf.mxu0  ;;  %v469_v14 = vadd.f32 %v3636_v9, %v393_v62 }
 0x4fb   :  { %1288 = vmatpush.msrb.mxu3 %v3224_v15  ;;  %v687_v15 = vadd.f32 %v3536_v31, %v614_v59 }
 0x4fd   :  { %1289 = vmatpush.msrb.mxu3 %v3232_v16  ;;  %v542_v16 = vadd.f32 %v3682_v27, %v469_v14  ;;  %v2695_v14 = vld [vmem:[%s4839_s4 + $0x1d0] sm:$0xff] }
 0x4ff   :  { %1290 = vmatpush.msrb.mxu3 %v3238_v7  ;;  %v760_v7 = vadd.f32 %v751_v19, %v687_v15  ;;  %v2694_v15 = vld [vmem:[%s4839_s4 + $0x1c8] sm:$0xff] }
 0x501   :  { %1291 = vmatpush.msrb.mxu3 %v3244_v5  ;;  %v615_v5 = vadd.f32 %v3728_v54, %v542_v16  ;;  %v1076_v13 = vpop.f32.mrf.mxu0 }
 0x502   :  { %2667 = vmatmul.msk.f32.vlgmr.msra.gmra.mxu1 %vm327_vm0, %v1076_v13 }
 0x503   :  { %1292 = vmatpush.msrb.mxu3 %v3249_v17  ;;  %v396_v17 = vadd.f32 %v3632_v11, %v3546_v36  ;;  %v688_v34 = vadd.f32 %v3540_v33, %v615_v5  ;;  %v2706_v5 = vld [vmem:[%s4839_s4 + $0x1f8] sm:$0xff] }
 0x504   :  { %1403 = vmatpush.msra.mxu1 %v2706_v5  ;;  %v2737_v5 = vld [vmem:[%s4841_s6 + $0x6] sm:$0x3] }
 0x505   :  { %1293 = vmatpush.msrb.mxu3 %v3254_v3  ;;  %v833_v3 = vadd.f32 %v3548_v37, %v760_v7  ;;  %v470_v4 = vadd.f32 %v3638_v2, %v396_v17  ;;  %v761_v9 = vadd.f32 %v3772_v20, %v688_v34  ;;  %v2693_v7 = vld [vmem:[%s4839_s4 + $0x1c0] sm:$0xff]  ;;  %v2705_v17 = vld [vmem:[%s4839_s4 + $0x1f0] sm:$0xff] }
 0x506   :  { %1404 = vmatpush.msra.mxu1 %v2705_v17  ;;  %v2755_v17 = vld [vmem:[%s4842_s7 + $0x118] sm:$0xff] }
 0x507   :  { %v543_v31 = vadd.f32 %v3684_v28, %v470_v4  ;;  %v834_v36 = vadd.f32 %v3560_v43, %v761_v9  ;;  %v2703_v4 = vld [vmem:[%s4839_s4 + $0x1e0] sm:$0xff] }
 0x509   :  { %v616_v27 = vadd.f32 %v3730_v55, %v543_v31  ;;  %v1079_v37 = vpop.f32.mrf.mxu0 }
 0x50a   :  { %2668 = vmatmul.msk.f32.gmra.mxu1 %vm327_vm0, %v1079_v37 }
 0x50b   :  { %v689_v46 = vadd.f32 %v3544_v35, %v616_v27  ;;  %v2680_v35 = vld [vmem:[%s4838_s3 + $0x138] sm:$0xff] }
 0x50d   :  { %v762_v33 = vadd.f32 %v3774_v21, %v689_v46 }
 0x50f   :  { %v835_v51 = vadd.f32 %v3566_v48, %v762_v33  ;;  %v2681_v48 = vld [vmem:[%s4838_s3 + $0x140] sm:$0xff] }
 0x511   :  { %v1082_v52 = vpop.f32.mrf.mxu0 }
 0x512   :  { %2669 = vmatmul.msk.f32.gmra.mxu1 %vm327_vm0, %v1082_v52  ;;  %v2733_v52 = vld [vmem:[%s4842_s7 + $0xa8] sm:$0xff] }
 0x51a   :  { %1221 = vmatmul.f32.vlgmr.msrb.gmra.mxu1 %v2680_v35  ;;  %v2729_v35 = vld [vmem:[%s4842_s7 + $0x88] sm:$0xff] }
 0x522   :  { %1224 = vmatmul.f32.gmra.mxu1 %v2681_v48 }
 0x52a   :  { %1227 = vmatmul.f32.gmra.mxu1 %v2682_v58 }
 0x551   :  { %v897_v32 = vpop.f32.mrf.mxu3 }
 0x552   :  { %v906_v6 = vadd.f32 %v897_v32, %v833_v3  ;;  %v2704_v3 = vld [vmem:[%s4839_s4 + $0x1e8] sm:$0xff] }
 0x553   :  { %1405 = vmatpush.msra.mxu1 %v2704_v3  ;;  %v2754_v3 = vld [vmem:[%s4842_s7 + $0x110] sm:$0xff] }
 0x554   :  { %v979_v26 = vadd.f32 %v970_v44, %v906_v6  ;;  %v2702_v44 = vld [vmem:[%s4838_s3 + $0x178] sm:$0x3] }
 0x555   :  { %1406 = vmatpush.msra.mxu1 %v2703_v4  ;;  %v2719_v4 = vld [vmem:[%s4842_s7 + $0x60] sm:$0xff] }
 0x559   :  { %v900_v11 = vpop.f32.mrf.mxu3 }
 0x55a   :  { %v907_v49 = vadd.f32 %v900_v11, %v834_v36 }
 0x55c   :  { %v980_v2 = vadd.f32 %v973_v47, %v907_v49 }
 0x561   :  { %v903_v28 = vpop.f32.mrf.mxu3 }
 0x562   :  { %v908_v54 = vadd.f32 %v903_v28, %v835_v51  ;;  %v2735_v51 = vld [vmem:[%s4842_s7 + $0xb8] sm:$0xff]  ;;  %v2734_v28 = vld [vmem:[%s4842_s7 + $0xb0] sm:$0xff] }
 0x564   :  { %v981_v55 = vadd.f32 %v976_v12, %v908_v54  ;;  %v2696_v12 = vld [vmem:[%s4839_s4 + $0x1d8] sm:$0xff]  ;;  %v2732_v54 = vld [vmem:[%s4842_s7 + $0xa0] sm:$0xff] }
 0x569   :  { %v1003_v57 = vpop.f32.mrf.mxu3 }
 0x56a   :  { %2657 = vmatmul.msk.f32.vlgmr.msrb.gmra.mxu2 %vm327_vm0, %v1003_v57  ;;  %v2730_v57 = vld [vmem:[%s4842_s7 + $0x90] sm:$0xff] }
 0x56b   :  { %1330 = vmatpush.msrb.mxu2 %v2696_v12  ;;  %v1460_v12 = vld [vmem:[%s4842_s7 + $0x8] sm:$0xff] }
 0x56d   :  { %1331 = vmatpush.msrb.mxu2 %v2695_v14  ;;  %v2758_v14 = vld [vmem:[%s4842_s7 + $0x130] sm:$0xff] }
 0x56f   :  { %1332 = vmatpush.msrb.mxu2 %v2694_v15  ;;  %v1459_v15 = vld [vmem:[%s4842_s7] sm:$0xff] }
 0x571   :  { %v1006_v43 = vpop.f32.mrf.mxu3  ;;  %1333 = vmatpush.msrb.mxu2 %v2693_v7  ;;  %v2756_v7 = vld [vmem:[%s4842_s7 + $0x120] sm:$0xff] }
 0x572   :  { %2658 = vmatmul.msk.f32.gmra.mxu2 %vm327_vm0, %v1006_v43  ;;  %v2728_v43 = vld [vmem:[%s4842_s7 + $0x80] sm:$0xff] }
 0x579   :  { %v1009_v60 = vpop.f32.mrf.mxu3 }
 0x57a   :  { %2659 = vmatmul.msk.f32.gmra.mxu2 %vm327_vm0, %v1009_v60 }
 0x57f   :  { %v1116_v8 = vpop.f32.mrf.mxu1 }
 0x582   :  { %1148 = vmatmul.f32.vlgmr.msra.gmra.mxu2 %v2670_v61 }
 0x587   :  { %v1119_v0 = vpop.f32.mrf.mxu1 }
 0x58a   :  { %1151 = vmatmul.f32.gmra.mxu2 %v2671_v63 }
 0x58f   :  { %v1122_v1 = vpop.f32.mrf.mxu1 }
 0x592   :  { %1154 = vmatmul.f32.gmra.mxu2 %v2672_v10 }
 0x597   :  { %v1222_v19 = vpop.f32.mrf.mxu1 }
 0x598   :  { %2687 = vmatmul.msk.f32.vlgmr.msrb.gmra.mxu0 %vm327_vm0, %v1222_v19 }
 0x599   :  { %1593 = vmatpush.msrb.mxu0 %v2735_v51 }
 0x59b   :  { %1594 = vmatpush.msrb.mxu0 %v2734_v28 }
 0x59d   :  { %1595 = vmatpush.msrb.mxu0 %v2733_v52  ;;  %v2770_v52 = vld [vmem:[%s4842_s7 + $0x170] sm:$0xff] }
 0x59f   :  { %v1225_v23 = vpop.f32.mrf.mxu1  ;;  %1596 = vmatpush.msrb.mxu0 %v2732_v54  ;;  %v2769_v54 = vld [vmem:[%s4842_s7 + $0x168] sm:$0xff] }
 0x5a0   :  { %2688 = vmatmul.msk.f32.gmra.mxu0 %vm327_vm0, %v1225_v23 }
 0x5a7   :  { %v1228_v30 = vpop.f32.mrf.mxu1 }
 0x5a8   :  { %2689 = vmatmul.msk.f32.gmra.mxu0 %vm327_vm0, %v1228_v30 }
 0x5b0   :  { %1367 = vmatmul.f32.vlgmr.msra.gmra.mxu0 %v2700_v42  ;;  %v2722_v42 = vld [vmem:[%s4842_s7 + $0x78] sm:$0xff] }
 0x5b1   :  { %1513 = vmatpush.msrb.mxu1 %v2722_v42  ;;  %v2807_v42 = vld [vmem:[%s4842_s7 + $0x238] sm:$0xff] }
 0x5b8   :  { %1370 = vmatmul.f32.gmra.mxu0 %v2701_v41  ;;  %v2721_v41 = vld [vmem:[%s4842_s7 + $0x70] sm:$0xff] }
 0x5b9   :  { %1514 = vmatpush.msrb.mxu1 %v2721_v41  ;;  %v2806_v41 = vld [vmem:[%s4842_s7 + $0x230] sm:$0xff] }
 0x5c0   :  { %1373 = vmatmul.f32.gmra.mxu0 %v2702_v44  ;;  %v1464_v44 = vld [vmem:[%s4842_s7 + $0x28] sm:$0xff] }
 0x5ed   :  { %v1043_v18 = vpop.f32.mrf.mxu2 }
 0x5ee   :  { %v1052_v20 = vadd.f32 %v1043_v18, %v979_v26 }
 0x5f0   :  { %v1125_v21 = vadd.f32 %v1116_v8, %v1052_v20  ;;  %v2828_v20 = vld [vmem:[%s4840_s5] ss:$0 sm:$0xff]  ;;  %s2860_s5 = smov 127  }
 0x5f5   :  { %v1046_v22 = vpop.f32.mrf.mxu2 }
 0x5f6   :  { %v1053_v24 = vadd.f32 %v1046_v22, %v980_v2 }
 0x5f8   :  { %v1126_v25 = vadd.f32 %v1119_v0, %v1053_v24 }
 0x5fd   :  { %v1049_v29 = vpop.f32.mrf.mxu2 }
 0x5fe   :  { %v1054_v38 = vadd.f32 %v1049_v29, %v981_v55  ;;  %v2731_v55 = vld [vmem:[%s4842_s7 + $0x98] sm:$0xff] }
 0x5ff   :  { %1597 = vmatpush.msrb.mxu0 %v2731_v55  ;;  %v2768_v55 = vld [vmem:[%s4842_s7 + $0x160] sm:$0xff] }
 0x600   :  { %v1127_v39 = vadd.f32 %v1122_v1, %v1054_v38  ;;  %v1430_v38 = vld [vmem:[%s4841_s6] sm:$0x3] }
 0x601   :  { %1598 = vmatpush.msrb.mxu0 %v2730_v57  ;;  %v2749_v57 = vld [vmem:[%s4841_s6 + $0x8] sm:$0x3] }
 0x603   :  { %1599 = vmatpush.msrb.mxu0 %v2729_v35  ;;  %v2767_v35 = vld [vmem:[%s4842_s7 + $0x158] sm:$0xff] }
 0x605   :  { %v1149_v40 = vpop.f32.mrf.mxu2  ;;  %1600 = vmatpush.msrb.mxu0 %v2728_v43  ;;  %v2766_v43 = vld [vmem:[%s4842_s7 + $0x150] sm:$0xff] }
 0x606   :  { %2677 = vmatmul.msk.f32.vlgmr.msra.gmra.mxu3 %vm327_vm0, %v1149_v40  ;;  %v1466_v40 = vld [vmem:[%s4842_s7 + $0x38] sm:$0xff] }
 0x60d   :  { %v1152_v45 = vpop.f32.mrf.mxu2 }
 0x60e   :  { %2678 = vmatmul.msk.f32.gmra.mxu3 %vm327_vm0, %v1152_v45  ;;  %v1465_v45 = vld [vmem:[%s4842_s7 + $0x30] sm:$0xff] }
 0x615   :  { %v1155_v47 = vpop.f32.mrf.mxu2  ;;  %v1262_v59 = vpop.f32.mrf.mxu0 }
 0x616   :  { %2679 = vmatmul.msk.f32.gmra.mxu3 %vm327_vm0, %v1155_v47  ;;  %v2720_v47 = vld [vmem:[%s4842_s7 + $0x68] sm:$0xff] }
 0x617   :  { %1515 = vmatpush.msrb.mxu1 %v2720_v47  ;;  %v2785_v47 = vld [vmem:[%s4841_s6 + $0xe] sm:$0x3] }
 0x619   :  { %1516 = vmatpush.msrb.mxu1 %v2719_v4  ;;  %v2018_v4 = vld [vmem:[%s4844_s9 + $0x1d0] sm:$0xff] }
 0x61d   :  { %v1265_v62 = vpop.f32.mrf.mxu0 }
 0x61e   :  { %1294 = vmatmul.f32.vlgmr.msrb.gmra.mxu3 %v2690_v50  ;;  %v1463_v50 = vld [vmem:[%s4842_s7 + $0x20] sm:$0xff] }
 0x625   :  { %v1268_v16 = vpop.f32.mrf.mxu0 }
 0x626   :  { %1297 = vmatmul.f32.gmra.mxu3 %v2691_v53  ;;  %v1462_v53 = vld [vmem:[%s4842_s7 + $0x18] sm:$0xff] }
 0x62d   :  { %v1368_v13 = vpop.f32.mrf.mxu0 }
 0x62e   :  { %1300 = vmatmul.f32.gmra.mxu3 %v2692_v56  ;;  %2707 = vmatmul.msk.f32.vlgmr.msra.gmra.mxu1 %vm327_vm0, %v1368_v13  ;;  %v2725_v56 = vld [vmem:[%s4841_s6 + $0x4] sm:$0x3] }
 0x62f   :  { %v2752_v13 = vld [vmem:[%s4842_s7 + $0x100] sm:$0xff] }
 0x635   :  { %v1371_v9 = vpop.f32.mrf.mxu0 }
 0x636   :  { %2708 = vmatmul.msk.f32.gmra.mxu1 %vm327_vm0, %v1371_v9  ;;  %v2715_v9 = vld [vmem:[%s4842_s7 + $0x40] sm:$0xff] }
 0x63d   :  { %v1374_v11 = vpop.f32.mrf.mxu0 }
 0x63e   :  { %2709 = vmatmul.msk.f32.gmra.mxu1 %vm327_vm0, %v1374_v11  ;;  %v2744_v11 = vld [vmem:[%s4842_s7 + $0xe0] sm:$0xff] }
 0x689   :  { %v1189_v32 = vpop.f32.mrf.mxu3 }
 0x68a   :  { %v1198_v34 = vadd.f32 %v1189_v32, %v1125_v21  ;;  %v2753_v32 = vld [vmem:[%s4842_s7 + $0x108] sm:$0xff] }
 0x68c   :  { %v1271_v6 = vadd.f32 %v1262_v59, %v1198_v34  ;;  %v1461_v59 = vld [vmem:[%s4842_s7 + $0x10] sm:$0xff]  ;;  %v2718_v34 = vld [vmem:[%s4842_s7 + $0x58] sm:$0xff] }
 0x68d   :  { %1517 = vmatpush.msrb.mxu1 %v2718_v34  ;;  %v2019_v34 = vld [vmem:[%s4844_s9 + $0x1d8] sm:$0xff] }
 0x691   :  { %v1192_v31 = vpop.f32.mrf.mxu3 }
 0x692   :  { %v1199_v26 = vadd.f32 %v1192_v31, %v1126_v25  ;;  %v2716_v31 = vld [vmem:[%s4842_s7 + $0x48] sm:$0xff] }
 0x694   :  { %v1272_v27 = vadd.f32 %v1265_v62, %v1199_v26  ;;  %v2759_v62 = vld [vmem:[%s4842_s7 + $0x138] sm:$0xff] }
 0x695   :  { %v2747_v26 = vld [vmem:[%s4842_s7 + $0xf8] sm:$0xff] }
 0x699   :  { %v1195_v36 = vpop.f32.mrf.mxu3 }
 0x69a   :  { %v1200_v37 = vadd.f32 %v1195_v36, %v1127_v39  ;;  %v2712_v39 = vld [vmem:[%s4841_s6 + $0x2] sm:$0x3]  ;;  %v2745_v36 = vld [vmem:[%s4842_s7 + $0xe8] sm:$0xff] }
 0x69c   :  { %v1273_v46 = vadd.f32 %v1268_v16, %v1200_v37  ;;  %v2757_v16 = vld [vmem:[%s4842_s7 + $0x128] sm:$0xff]  ;;  %v2743_v37 = vld [vmem:[%s4842_s7 + $0xd8] sm:$0xff] }
 0x6a1   :  { %v1295_v49 = vpop.f32.mrf.mxu3 }
 0x6a2   :  { %2697 = vmatmul.msk.f32.vlgmr.msrb.gmra.mxu2 %vm327_vm0, %v1295_v49  ;;  %v2741_v49 = vld [vmem:[%s4842_s7 + $0xc8] sm:$0xff] }
 0x6a9   :  { %v1298_v33 = vpop.f32.mrf.mxu3 }
 0x6aa   :  { %2698 = vmatmul.msk.f32.gmra.mxu2 %vm327_vm0, %v1298_v33  ;;  %v2740_v33 = vld [vmem:[%s4842_s7 + $0xc0] sm:$0xff] }
 0x6ab   :  { %v1408_v48 = vpop.f32.mrf.mxu1 }
 0x6b1   :  { %v1301_v2 = vpop.f32.mrf.mxu3 }
 0x6b2   :  { %2699 = vmatmul.msk.f32.gmra.mxu2 %vm327_vm0, %v1301_v2  ;;  %v2771_v2 = vld [vmem:[%s4842_s7 + $0x178] sm:$0xff] }
 0x6b3   :  { %v1411_v60 = vpop.f32.mrf.mxu1 }
 0x6bb   :  { %v1414_v0 = vpop.f32.mrf.mxu1 }
 0x725   :  { %v1335_v58 = vpop.f32.mrf.mxu2 }
 0x726   :  { %v1344_v10 = vadd.f32 %v1335_v58, %v1271_v6  ;;  %v2717_v6 = vld [vmem:[%s4842_s7 + $0x50] sm:$0xff]  ;;  %v2765_v58 = vld [vmem:[%s4842_s7 + $0x148] sm:$0xff] }
 0x727   :  { %1518 = vmatpush.msrb.mxu1 %v2717_v6  ;;  %v2008_v6 = vld [vmem:[%s4844_s9 + $0x180] sm:$0xff] }
 0x728   :  { %v1417_v19 = vadd.f32 %v1408_v48, %v1344_v10  ;;  %v2773_v10 = vld [vmem:[%s4841_s6 + $0xc] sm:$0x3] }
 0x729   :  { %1519 = vmatpush.msrb.mxu1 %v2716_v31  ;;  %v2009_v31 = vld [vmem:[%s4844_s9 + $0x188] sm:$0xff] }
 0x72a   :  { %v1424_v24 = vadd.f32 %v2828_v20, %v1417_v19  ;;  %v2779_v19 = vld [vmem:[%s4842_s7 + $0x198] sm:$0xff] }
 0x72b   :  { %1520 = vmatpush.msrb.mxu1 %v2715_v9  ;;  %v2010_v9 = vld [vmem:[%s4844_s9 + $0x190] sm:$0xff] }
 0x72c   :  { %v3960_v30 = vmax.f32 %v1424_v24, 0.0  ;;  %v2794_v24 = vld [vmem:[%s4842_s7 + $0x1f0] sm:$0xff] }
 0x72d   :  { %v1338_v61 = vpop.f32.mrf.mxu2  ;;  %1651 = vmatpush.msra.mxu1 %v2747_v26  ;;  %v2011_v26 = vld [vmem:[%s4844_s9 + $0x198] sm:$0xff] }
 0x72e   :  { %v1345_v63 = vadd.f32 %v1338_v61, %v1272_v27  ;;  %v2746_v27 = vld [vmem:[%s4842_s7 + $0xf0] sm:$0xff]  ;;  %v2761_v61 = vld [vmem:[%s4841_s6 + $0xa] sm:$0x3] }
 0x72f   :  { %1652 = vmatpush.msra.mxu1 %v2746_v27  ;;  %v2000_v27 = vld [vmem:[%s4844_s9 + $0x140] sm:$0xff] }
 0x730   :  { %v1418_v1 = vadd.f32 %v1411_v60, %v1345_v63  ;;  %v2764_v60 = vld [vmem:[%s4842_s7 + $0x140] sm:$0xff] }
 0x731   :  { %1653 = vmatpush.msra.mxu1 %v2745_v36  ;;  %v2001_v36 = vld [vmem:[%s4844_s9 + $0x148] sm:$0xff] }
 0x732   :  { %v1425_v22 = vadd.f32 %v2828_v20, %v1418_v1  ;;  %v2781_v1 = vld [vmem:[%s4842_s7 + $0x1a8] sm:$0xff] }
 0x733   :  { %1654 = vmatpush.msra.mxu1 %v2744_v11  ;;  %v2002_v11 = vld [vmem:[%s4844_s9 + $0x150] sm:$0xff] }
 0x734   :  { %v3952_v29 = vmax.f32 %v1425_v22, 0.0  ;;  %v2776_v22 = vld [vmem:[%s4842_s7 + $0x180] sm:$0xff] }
 0x735   :  { %v1341_v8 = vpop.f32.mrf.mxu2  ;;  %1655 = vmatpush.msra.mxu1 %v2743_v37  ;;  %v2003_v37 = vld [vmem:[%s4844_s9 + $0x158] sm:$0xff] }
 0x736   :  { %v1346_v18 = vadd.f32 %v1341_v8, %v1273_v46  ;;  %v2742_v46 = vld [vmem:[%s4842_s7 + $0xd0] sm:$0xff]  ;;  %v2783_v8 = vld [vmem:[%s4842_s7 + $0x1b8] sm:$0xff] }
 0x737   :  { %1656 = vmatpush.msra.mxu1 %v2742_v46  ;;  %v1992_v46 = vld [vmem:[%s4844_s9 + $0x100] sm:$0xff] }
 0x738   :  { %v1419_v21 = vadd.f32 %v1414_v0, %v1346_v18  ;;  %v2782_v0 = vld [vmem:[%s4842_s7 + $0x1b0] sm:$0xff]  ;;  %v2780_v18 = vld [vmem:[%s4842_s7 + $0x1a0] sm:$0xff] }
 0x739   :  { %1657 = vmatpush.msra.mxu1 %v2741_v49  ;;  %v1993_v49 = vld [vmem:[%s4844_s9 + $0x108] sm:$0xff] }
 0x73a   :  { %v1426_v23 = vadd.f32 %v2828_v20, %v1419_v21  ;;  %v2778_v20 = vld [vmem:[%s4842_s7 + $0x190] sm:$0xff]  ;;  %v2777_v21 = vld [vmem:[%s4842_s7 + $0x188] sm:$0xff] }
 0x73b   :  { %1658 = vmatpush.msra.mxu1 %v2740_v33  ;;  %v1994_v33 = vld [vmem:[%s4844_s9 + $0x110] sm:$0xff] }
 0x73c   :  { %v3950_v25 = vmax.f32 %v1426_v23, 0.0  ;;  %v2795_v23 = vld [vmem:[%s4842_s7 + $0x1f8] sm:$0xff] }
 0x73e   :  { %2710 = vmatpush.msk.msra.mxu2 %vm1435_vm1, %v3950_v25  ;;  %2713 = vmatpush.msk.msra.mxu3 %vm1435_vm1, %v3950_v25 }
 0x73f   :  { %2762 = vmatpush.msk.msra.mxu0 %vm1435_vm1, %v3950_v25 }
 0x740   :  { %1453 = vmatpush.msra.mxu2 %v3952_v29  ;;  %1486 = vmatpush.msra.mxu3 %v3952_v29 }
 0x741   :  { %1741 = vmatpush.msra.mxu0 %v3952_v29 }
 0x742   :  { %1454 = vmatpush.msra.mxu2 %v3960_v30  ;;  %1487 = vmatpush.msra.mxu3 %v3960_v30 }
 0x743   :  { %1742 = vmatpush.msra.mxu0 %v3960_v30  ;;  %2711 = vmatmul.msk.f32.vlgmr.msra.gmra.mxu2 %vm1431_vm2, %v1430_v38 }
 0x744   :  { %2714 = vmatmul.msk.f32.vlgmr.msra.gmra.mxu3 %vm1431_vm2, %v2712_v39  ;;  %1536 = vmatpush.msrb.mxu2 %v1466_v40 }
 0x745   :  { %2726 = vmatpush.msk.msrb.mxu3 %vm1435_vm1, %v3950_v25 }
 0x746   :  { %1537 = vmatpush.msrb.mxu2 %v1465_v45 }
 0x747   :  { %1567 = vmatpush.msrb.mxu3 %v3952_v29 }
 0x748   :  { %1538 = vmatpush.msrb.mxu2 %v1464_v44 }
 0x749   :  { %1568 = vmatpush.msrb.mxu3 %v3960_v30 }
 0x74a   :  { %1539 = vmatpush.msrb.mxu2 %v1463_v50  ;;  %v2797_v50 = vld [vmem:[%s4841_s6 + $0x10] sm:$0x3] }
 0x74b   :  { %2738 = vmatpush.msk.msra.mxu3 %vm1435_vm1, %v3950_v25 }
 0x74c   :  { %1540 = vmatpush.msrb.mxu2 %v1462_v53  ;;  %2727 = vmatmul.msk.f32.vlgmr.msrb.gmra.mxu3 %vm1431_vm2, %v2725_v56  ;;  %v2792_v56 = vld [vmem:[%s4842_s7 + $0x1e0] sm:$0xff] }
 0x74d   :  { %1625 = vmatpush.msra.mxu3 %v3952_v29 }
 0x74e   :  { %1541 = vmatpush.msrb.mxu2 %v1461_v59  ;;  %v2805_v59 = vld [vmem:[%s4842_s7 + $0x228] sm:$0xff] }
 0x74f   :  { %1626 = vmatpush.msra.mxu3 %v3960_v30 }
 0x750   :  { %1542 = vmatpush.msrb.mxu2 %v1460_v12  ;;  %v2804_v12 = vld [vmem:[%s4842_s7 + $0x220] sm:$0xff] }
 0x751   :  { %1709 = vmatpush.msrb.mxu3 %v2759_v62  ;;  %v2791_v62 = vld [vmem:[%s4842_s7 + $0x1d8] sm:$0xff] }
 0x752   :  { %1543 = vmatpush.msrb.mxu2 %v1459_v15  ;;  %v2803_v15 = vld [vmem:[%s4842_s7 + $0x218] sm:$0xff] }
 0x753   :  { %1710 = vmatpush.msrb.mxu3 %v2758_v14  ;;  %v2790_v14 = vld [vmem:[%s4842_s7 + $0x1d0] sm:$0xff] }
 0x754   :  { %2750 = vmatpush.msk.msra.mxu2 %vm1435_vm1, %v3950_v25  ;;  %2739 = vmatmul.msk.f32.vlgmr.msra.gmra.mxu3 %vm1431_vm2, %v2737_v5  ;;  %v2788_v5 = vld [vmem:[%s4842_s7 + $0x1c0] sm:$0xff] }
 0x755   :  { %1711 = vmatpush.msrb.mxu3 %v2757_v16  ;;  %v2789_v16 = vld [vmem:[%s4842_s7 + $0x1c8] sm:$0xff] }
 0x756   :  { %1683 = vmatpush.msra.mxu2 %v3952_v29 }
 0x757   :  { %1712 = vmatpush.msrb.mxu3 %v2756_v7  ;;  %v2802_v7 = vld [vmem:[%s4842_s7 + $0x210] sm:$0xff] }
 0x758   :  { %1684 = vmatpush.msra.mxu2 %v3960_v30 }
 0x759   :  { %1713 = vmatpush.msrb.mxu3 %v2755_v17  ;;  %v2801_v17 = vld [vmem:[%s4842_s7 + $0x208] sm:$0xff] }
 0x75b   :  { %1714 = vmatpush.msrb.mxu3 %v2754_v3  ;;  %v2800_v3 = vld [vmem:[%s4842_s7 + $0x200] sm:$0xff] }
 0x75d   :  { %1715 = vmatpush.msrb.mxu3 %v2753_v32  ;;  %v2016_v32 = vld [vmem:[%s4844_s9 + $0x1c0] sm:$0xff] }
 0x75f   :  { %1716 = vmatpush.msrb.mxu3 %v2752_v13  ;;  %v2017_v13 = vld [vmem:[%s4844_s9 + $0x1c8] sm:$0xff] }
 0x761   :  { %2786 = vmatpush.msk.msra.mxu3 %vm1435_vm1, %v3950_v25 }
 0x763   :  { %1857 = vmatpush.msra.mxu3 %v3952_v29 }
 0x765   :  { %1858 = vmatpush.msra.mxu3 %v3960_v30 }
 0x7c6   :  { %v1456_v51 = vpop.f32.mrf.mxu2 }
 0x7c7   :  { %v1489_v28 = vpop.f32.mrf.mxu3  ;;  %2724 = vmatmul.msk.f32.vlgmr.msrb.gmra.mxu2 %vm1501_vm3, %v1456_v51 }
 0x7c8   :  { %1767 = vmatpush.msrb.mxu2 %v2771_v2  ;;  %2723 = vmatmul.msk.f32.vlgmr.msrb.gmra.mxu1 %vm1501_vm3, %v1489_v28  ;;  %v1995_v2 = vld [vmem:[%s4844_s9 + $0x118] sm:$0xff] }
 0x7c9   :  { %1825 = vmatpush.msrb.mxu1 %v2783_v8  ;;  %v1978_v8 = vld [vmem:[%s4844_s9 + $0x90] sm:$0xff] }
 0x7ca   :  { %1768 = vmatpush.msrb.mxu2 %v2770_v52 }
 0x7cb   :  { %1826 = vmatpush.msrb.mxu1 %v2782_v0  ;;  %v1979_v0 = vld [vmem:[%s4844_s9 + $0x98] sm:$0xff] }
 0x7cc   :  { %1769 = vmatpush.msrb.mxu2 %v2769_v54 }
 0x7cd   :  { %1827 = vmatpush.msrb.mxu1 %v2781_v1  ;;  %v1968_v1 = vld [vmem:[%s4844_s9 + $0x40] sm:$0xff] }
 0x7ce   :  { %1770 = vmatpush.msrb.mxu2 %v2768_v55 }
 0x7cf   :  { %2751 = vmatmul.msk.f32.vlgmr.msra.gmra.mxu2 %vm1431_vm2, %v2749_v57  ;;  %v1570_v48 = vpop.f32.mrf.mxu3  ;;  %1828 = vmatpush.msrb.mxu1 %v2780_v18  ;;  %v1969_v18 = vld [vmem:[%s4844_s9 + $0x48] sm:$0xff] }
 0x7d0   :  { %1771 = vmatpush.msrb.mxu2 %v2767_v35  ;;  %2736 = vmatmul.msk.f32.vlgmr.msrb.gmra.mxu0 %vm1501_vm3, %v1570_v48  ;;  %v1984_v48 = vld [vmem:[%s4844_s9 + $0xc0] sm:$0xff] }
 0x7d1   :  { %2774 = vmatpush.msk.msrb.mxu0 %vm1435_vm1, %v3950_v25  ;;  %1829 = vmatpush.msrb.mxu1 %v2779_v19  ;;  %v1970_v19 = vld [vmem:[%s4844_s9 + $0x50] sm:$0xff] }
 0x7d2   :  { %1772 = vmatpush.msrb.mxu2 %v2766_v43 }
 0x7d3   :  { %1799 = vmatpush.msrb.mxu0 %v3952_v29  ;;  %1830 = vmatpush.msrb.mxu1 %v2778_v20  ;;  %v1971_v20 = vld [vmem:[%s4844_s9 + $0x58] sm:$0xff] }
 0x7d4   :  { %1773 = vmatpush.msrb.mxu2 %v2765_v58  ;;  %v1985_v58 = vld [vmem:[%s4844_s9 + $0xc8] sm:$0xff] }
 0x7d5   :  { %1800 = vmatpush.msrb.mxu0 %v3960_v30  ;;  %1831 = vmatpush.msrb.mxu1 %v2777_v21  ;;  %v1960_v21 = vld [vmem:[%s4844_s9] sm:$0xff] }
 0x7d6   :  { %1774 = vmatpush.msrb.mxu2 %v2764_v60  ;;  %v1986_v60 = vld [vmem:[%s4844_s9 + $0xd0] sm:$0xff] }
 0x7d7   :  { %v1628_v63 = vpop.f32.mrf.mxu3  ;;  %1832 = vmatpush.msrb.mxu1 %v2776_v22  ;;  %v1961_v22 = vld [vmem:[%s4844_s9 + $0x8] sm:$0xff] }
 0x7d8   :  { %2798 = vmatpush.msk.msra.mxu2 %vm1435_vm1, %v3950_v25  ;;  %2763 = vmatmul.msk.f32.vlgmr.msra.gmra.mxu0 %vm1431_vm2, %v2761_v61  ;;  %v2793_v25 = vld [vmem:[%s4842_s7 + $0x1e8] sm:$0xff]  ;;  %v1987_v61 = vld [vmem:[%s4844_s9 + $0xd8] sm:$0xff] }
 0x7d9   :  { %2748 = vmatmul.msk.f32.vlgmr.msra.gmra.mxu1 %vm1501_vm3, %v1628_v63  ;;  %1883 = vmatpush.msra.mxu0 %v2795_v23  ;;  %v1976_v63 = vld [vmem:[%s4844_s9 + $0x80] sm:$0xff]  ;;  %v1962_v23 = vld [vmem:[%s4844_s9 + $0x10] sm:$0xff] }
 0x7da   :  { %1915 = vmatpush.msra.mxu2 %v3952_v29  ;;  %2053 = vmatpush.msra.mxu1 %v2016_v32  ;;  %v1972_v32 = vld [vmem:[%s4844_s9 + $0x60] sm:$0xff] }
 0x7db   :  { %1884 = vmatpush.msra.mxu0 %v2794_v24  ;;  %v1963_v24 = vld [vmem:[%s4844_s9 + $0x18] sm:$0xff] }
 0x7dc   :  { %1916 = vmatpush.msra.mxu2 %v3960_v30  ;;  %2054 = vmatpush.msra.mxu1 %v2008_v6  ;;  %v1964_v6 = vld [vmem:[%s4844_s9 + $0x20] sm:$0xff] }
 0x7dd   :  { %1885 = vmatpush.msra.mxu0 %v2793_v25  ;;  %v2020_v25 = vld [vmem:[%s4844_s9 + $0x1e0] sm:$0xff] }
 0x7de   :  { %2055 = vmatpush.msra.mxu1 %v2000_v27 }
 0x7df   :  { %1886 = vmatpush.msra.mxu0 %v2792_v56  ;;  %v1997_v56 = vld [vmem:[%s4844_s9 + $0x128] sm:$0xff] }
 0x7e0   :  { %2775 = vmatmul.msk.f32.vlgmr.msrb.gmra.mxu0 %vm1431_vm2, %v2773_v10  ;;  %2056 = vmatpush.msra.mxu1 %v1992_v46  ;;  %v1977_v10 = vld [vmem:[%s4844_s9 + $0x88] sm:$0xff]  ;;  %v2829_v46 = vld [vmem:[%s4843_s8] ss:$0 sm:$0xff] }
 0x7e1   :  { %1887 = vmatpush.msra.mxu0 %v2791_v62  ;;  %v1999_v62 = vld [vmem:[%s4844_s9 + $0x138] sm:$0xff] }
 0x7e2   :  { %2057 = vmatpush.msra.mxu1 %v1984_v48  ;;  %v2275_v48 = vld [vmem:[%s4846_s11 + $0x1f0] sm:$0xff] }
 0x7e3   :  { %1888 = vmatpush.msra.mxu0 %v2790_v14  ;;  %v1989_v14 = vld [vmem:[%s4844_s9 + $0xe8] sm:$0xff] }
 0x7e4   :  { %2058 = vmatpush.msra.mxu1 %v1976_v63  ;;  %v2274_v63 = vld [vmem:[%s4846_s11 + $0x1e8] sm:$0xff] }
 0x7e5   :  { %1889 = vmatpush.msra.mxu0 %v2789_v16  ;;  %v1991_v16 = vld [vmem:[%s4844_s9 + $0xf8] sm:$0xff] }
 0x7e6   :  { %2059 = vmatpush.msra.mxu1 %v1968_v1  ;;  %v2273_v1 = vld [vmem:[%s4846_s11 + $0x1e0] sm:$0xff] }
 0x7e7   :  { %1890 = vmatpush.msra.mxu0 %v2788_v5  ;;  %v1981_v5 = vld [vmem:[%s4844_s9 + $0xa8] sm:$0xff] }
 0x7e8   :  { %2060 = vmatpush.msra.mxu1 %v1960_v21  ;;  %v2272_v21 = vld [vmem:[%s4846_s11 + $0x1d8] sm:$0xff] }
 0x7e9   :  { %2093 = vmatpush.msrb.mxu0 %v2018_v4  ;;  %v1974_v4 = vld [vmem:[%s4844_s9 + $0x70] sm:$0xff] }
 0x7eb   :  { %2094 = vmatpush.msrb.mxu0 %v2010_v9  ;;  %v1966_v9 = vld [vmem:[%s4844_s9 + $0x30] sm:$0xff] }
 0x7ed   :  { %2095 = vmatpush.msrb.mxu0 %v2002_v11 }
 0x7ef   :  { %2096 = vmatpush.msrb.mxu0 %v1994_v33 }
 0x7f1   :  { %2097 = vmatpush.msrb.mxu0 %v1986_v60  ;;  %v2258_v60 = vld [vmem:[%s4846_s11 + $0x168] sm:$0xff] }
 0x7f3   :  { %2098 = vmatpush.msrb.mxu0 %v1978_v8  ;;  %v2257_v8 = vld [vmem:[%s4846_s11 + $0x160] sm:$0xff] }
 0x7f5   :  { %2099 = vmatpush.msrb.mxu0 %v1970_v19  ;;  %v2256_v19 = vld [vmem:[%s4846_s11 + $0x158] sm:$0xff] }
 0x7f7   :  { %2100 = vmatpush.msrb.mxu0 %v1962_v23  ;;  %v2255_v23 = vld [vmem:[%s4846_s11 + $0x150] sm:$0xff] }
 0x845   :  { %v1522_v30 = vpop.f32.mrf.mxu1 }
 0x84a   :  { %v1545_v29 = vpop.f32.mrf.mxu2 }
 0x84b   :  { %v1546_v38 = vadd.f32 %v1545_v29, %v1522_v30  ;;  %v2021_v29 = vld [vmem:[%s4844_s9 + $0x1e8] sm:$0xff]  ;;  %v2022_v30 = vld [vmem:[%s4844_s9 + $0x1f0] sm:$0xff] }
 0x84d   :  { %v1602_v39 = vpop.f32.mrf.mxu0 }
 0x84e   :  { %v4177_v40 = vadd.f32 %v1602_v39, %v1546_v38  ;;  %v2023_v38 = vld [vmem:[%s4844_s9 + $0x1f8] sm:$0xff]  ;;  %v2012_v39 = vld [vmem:[%s4844_s9 + $0x1a0] sm:$0xff] }
 0x852   :  { %v1686_v45 = vpop.f32.mrf.mxu2 }
 0x853   :  { %2760 = vmatmul.msk.f32.vlgmr.msrb.gmra.mxu3 %vm1501_vm3, %v1686_v45  ;;  %v2015_v45 = vld [vmem:[%s4844_s9 + $0x1b8] sm:$0xff] }
 0x854   :  { %1941 = vmatpush.msrb.mxu3 %v2807_v42  ;;  %v2014_v42 = vld [vmem:[%s4844_s9 + $0x1b0] sm:$0xff] }
 0x855   :  { %v1744_v44 = vpop.f32.mrf.mxu0 }
 0x856   :  { %1942 = vmatpush.msrb.mxu3 %v2806_v41  ;;  %2772 = vmatmul.msk.f32.vlgmr.msrb.gmra.mxu2 %vm1501_vm3, %v1744_v44  ;;  %v1660_v51 = vpop.f32.mrf.mxu1  ;;  %v2004_v41 = vld [vmem:[%s4844_s9 + $0x160] sm:$0xff]  ;;  %v2005_v44 = vld [vmem:[%s4844_s9 + $0x168] sm:$0xff] }
 0x857   :  { %2073 = vmatpush.msrb.mxu2 %v2017_v13  ;;  %v1663_v28 = vadd.f32 %v1660_v51, %v4177_v40  ;;  %v2013_v40 = vld [vmem:[%s4844_s9 + $0x1a8] sm:$0xff] }
 0x858   :  { %1943 = vmatpush.msrb.mxu3 %v2805_v59  ;;  %v1998_v59 = vld [vmem:[%s4844_s9 + $0x130] sm:$0xff]  ;;  %v1973_v13 = vld [vmem:[%s4844_s9 + $0x68] sm:$0xff] }
 0x859   :  { %2074 = vmatpush.msrb.mxu2 %v2009_v31  ;;  %v1965_v31 = vld [vmem:[%s4844_s9 + $0x28] sm:$0xff] }
 0x85a   :  { %1944 = vmatpush.msrb.mxu3 %v2804_v12  ;;  %v1988_v12 = vld [vmem:[%s4844_s9 + $0xe0] sm:$0xff] }
 0x85b   :  { %2787 = vmatmul.msk.f32.vlgmr.msra.gmra.mxu3 %vm1431_vm2, %v2785_v47  ;;  %2075 = vmatpush.msrb.mxu2 %v2001_v36  ;;  %v2006_v47 = vld [vmem:[%s4844_s9 + $0x170] sm:$0xff] }
 0x85c   :  { %1945 = vmatpush.msrb.mxu3 %v2803_v15  ;;  %v1990_v15 = vld [vmem:[%s4844_s9 + $0xf0] sm:$0xff] }
 0x85d   :  { %v1802_v53 = vpop.f32.mrf.mxu0  ;;  %2076 = vmatpush.msrb.mxu2 %v1993_v49 }
 0x85e   :  { %2784 = vmatmul.msk.f32.vlgmr.msrb.gmra.mxu1 %vm1501_vm3, %v1802_v53  ;;  %2799 = vmatmul.msk.f32.vlgmr.msra.gmra.mxu2 %vm1431_vm2, %v2797_v50  ;;  %v2007_v50 = vld [vmem:[%s4844_s9 + $0x178] sm:$0xff]  ;;  %v1996_v53 = vld [vmem:[%s4844_s9 + $0x120] sm:$0xff] }
 0x85f   :  { %1946 = vmatpush.msrb.mxu3 %v2802_v7  ;;  %2077 = vmatpush.msrb.mxu2 %v1985_v58  ;;  %v1980_v7 = vld [vmem:[%s4844_s9 + $0xa0] sm:$0xff]  ;;  %v2226_v58 = vld [vmem:[%s4846_s11 + $0x68] sm:$0xff] }
 0x860   :  { %2133 = vmatpush.msrb.mxu1 %v2020_v25  ;;  %v2271_v25 = vld [vmem:[%s4846_s11 + $0x1d0] sm:$0xff] }
 0x861   :  { %1947 = vmatpush.msrb.mxu3 %v2801_v17  ;;  %2078 = vmatpush.msrb.mxu2 %v1977_v10  ;;  %v1982_v17 = vld [vmem:[%s4844_s9 + $0xb0] sm:$0xff]  ;;  %v2225_v10 = vld [vmem:[%s4846_s11 + $0x60] sm:$0xff] }
 0x862   :  { %2134 = vmatpush.msrb.mxu1 %v2012_v39  ;;  %v2270_v39 = vld [vmem:[%s4846_s11 + $0x1c8] sm:$0xff] }
 0x863   :  { %1948 = vmatpush.msrb.mxu3 %v2800_v3  ;;  %2079 = vmatpush.msrb.mxu2 %v1969_v18  ;;  %v1983_v3 = vld [vmem:[%s4844_s9 + $0xb8] sm:$0xff] }
 0x864   :  { %2135 = vmatpush.msrb.mxu1 %v2004_v41  ;;  %v2224_v18 = vld [vmem:[%s4846_s11 + $0x58] sm:$0xff]  ;;  %v2269_v41 = vld [vmem:[%s4846_s11 + $0x1c0] sm:$0xff] }
 0x865   :  { %2113 = vmatpush.msra.mxu3 %v2019_v34  ;;  %2080 = vmatpush.msrb.mxu2 %v1961_v22  ;;  %v1975_v34 = vld [vmem:[%s4844_s9 + $0x78] sm:$0xff]  ;;  %v2223_v22 = vld [vmem:[%s4846_s11 + $0x50] sm:$0xff] }
 0x866   :  { %2136 = vmatpush.msrb.mxu1 %v1996_v53  ;;  %v2268_v53 = vld [vmem:[%s4846_s11 + $0x1b8] sm:$0xff] }
 0x867   :  { %2114 = vmatpush.msra.mxu3 %v2011_v26  ;;  %2153 = vmatpush.msra.mxu2 %v2021_v29  ;;  %v1967_v26 = vld [vmem:[%s4844_s9 + $0x38] sm:$0xff]  ;;  %v2222_v29 = vld [vmem:[%s4846_s11 + $0x48] sm:$0xff] }
 0x868   :  { %2137 = vmatpush.msrb.mxu1 %v1988_v12  ;;  %v2267_v12 = vld [vmem:[%s4846_s11 + $0x1b0] sm:$0xff] }
 0x869   :  { %2115 = vmatpush.msra.mxu3 %v2003_v37  ;;  %2154 = vmatpush.msra.mxu2 %v2013_v40  ;;  %v2221_v40 = vld [vmem:[%s4846_s11 + $0x40] sm:$0xff] }
 0x86a   :  { %2138 = vmatpush.msrb.mxu1 %v1980_v7  ;;  %v2266_v7 = vld [vmem:[%s4846_s11 + $0x1a8] sm:$0xff] }
 0x86b   :  { %2116 = vmatpush.msra.mxu3 %v1995_v2  ;;  %2155 = vmatpush.msra.mxu2 %v2005_v44  ;;  %v2220_v44 = vld [vmem:[%s4846_s11 + $0x38] sm:$0xff] }
 0x86c   :  { %2139 = vmatpush.msrb.mxu1 %v1972_v32  ;;  %v2265_v32 = vld [vmem:[%s4846_s11 + $0x1a0] sm:$0xff] }
 0x86d   :  { %2117 = vmatpush.msra.mxu3 %v1987_v61  ;;  %2156 = vmatpush.msra.mxu2 %v1997_v56  ;;  %v2242_v61 = vld [vmem:[%s4846_s11 + $0xe8] sm:$0xff]  ;;  %v2219_v56 = vld [vmem:[%s4846_s11 + $0x30] sm:$0xff] }
 0x86e   :  { %2140 = vmatpush.msrb.mxu1 %v1964_v6  ;;  %v2264_v6 = vld [vmem:[%s4846_s11 + $0x198] sm:$0xff] }
 0x86f   :  { %2118 = vmatpush.msra.mxu3 %v1979_v0  ;;  %2157 = vmatpush.msra.mxu2 %v1989_v14  ;;  %v2241_v0 = vld [vmem:[%s4846_s11 + $0xe0] sm:$0xff]  ;;  %v2218_v14 = vld [vmem:[%s4846_s11 + $0x28] sm:$0xff] }
 0x871   :  { %2119 = vmatpush.msra.mxu3 %v1971_v20  ;;  %2158 = vmatpush.msra.mxu2 %v1981_v5  ;;  %v2240_v20 = vld [vmem:[%s4846_s11 + $0xd8] sm:$0xff]  ;;  %v2217_v5 = vld [vmem:[%s4846_s11 + $0x20] sm:$0xff] }
 0x873   :  { %2120 = vmatpush.msra.mxu3 %v1963_v24  ;;  %2159 = vmatpush.msra.mxu2 %v1973_v13  ;;  %v2239_v24 = vld [vmem:[%s4846_s11 + $0xd0] sm:$0xff]  ;;  %v2216_v13 = vld [vmem:[%s4846_s11 + $0x18] sm:$0xff] }
 0x875   :  { %2160 = vmatpush.msra.mxu2 %v1965_v31  ;;  %v2215_v31 = vld [vmem:[%s4846_s11 + $0x10] sm:$0xff] }
 0x8d6   :  { %v1718_v52 = vpop.f32.mrf.mxu3 }
 0x8d7   :  { %v1721_v54 = vadd.f32 %v1718_v52, %v1663_v28  ;;  %v2228_v28 = vld [vmem:[%s4846_s11 + $0x78] sm:$0xff] }
 0x8d8   :  { %v2260_v52 = vld [vmem:[%s4846_s11 + $0x178] sm:$0xff] }
 0x8d9   :  { %v1776_v55 = vpop.f32.mrf.mxu2 }
 0x8da   :  { %v4278_v57 = vadd.f32 %v1776_v55, %v1721_v54  ;;  %v2244_v54 = vld [vmem:[%s4846_s11 + $0xf8] sm:$0xff] }
 0x8db   :  { %v1834_v27 = vpop.f32.mrf.mxu1  ;;  %v2276_v55 = vld [vmem:[%s4846_s11 + $0x1f8] sm:$0xff] }
 0x8dc   :  { %v1837_v11 = vadd.f32 %v1834_v27, %v4278_v57  ;;  %v2227_v57 = vld [vmem:[%s4846_s11 + $0x70] sm:$0xff] }
 0x8dd   :  { %v2263_v27 = vld [vmem:[%s4846_s11 + $0x190] sm:$0xff] }
 0x8de   :  { %v1860_v35 = vpop.f32.mrf.mxu3 }
 0x8df   :  { %2796 = vmatmul.msk.f32.vlgmr.msra.gmra.mxu0 %vm1501_vm3, %v1860_v35  ;;  %v2259_v35 = vld [vmem:[%s4846_s11 + $0x170] sm:$0xff] }
 0x8e0   :  { %2173 = vmatpush.msra.mxu0 %v2022_v30  ;;  %v2254_v30 = vld [vmem:[%s4846_s11 + $0x148] sm:$0xff] }
 0x8e1   :  { %v1918_v43 = vpop.f32.mrf.mxu2 }
 0x8e2   :  { %2808 = vmatmul.msk.f32.vlgmr.msrb.gmra.mxu3 %vm1501_vm3, %v1918_v43  ;;  %2174 = vmatpush.msra.mxu0 %v2014_v42  ;;  %v2243_v43 = vld [vmem:[%s4846_s11 + $0xf0] sm:$0xff]  ;;  %v2253_v42 = vld [vmem:[%s4846_s11 + $0x140] sm:$0xff] }
 0x8e3   :  { %2193 = vmatpush.msrb.mxu3 %v2023_v38  ;;  %v2238_v38 = vld [vmem:[%s4846_s11 + $0xc8] sm:$0xff] }
 0x8e4   :  { %2175 = vmatpush.msra.mxu0 %v2006_v47  ;;  %v2252_v47 = vld [vmem:[%s4846_s11 + $0x138] sm:$0xff] }
 0x8e5   :  { %2194 = vmatpush.msrb.mxu3 %v2015_v45  ;;  %v2237_v45 = vld [vmem:[%s4846_s11 + $0xc0] sm:$0xff] }
 0x8e6   :  { %2176 = vmatpush.msra.mxu0 %v1998_v59  ;;  %v2251_v59 = vld [vmem:[%s4846_s11 + $0x130] sm:$0xff] }
 0x8e7   :  { %2195 = vmatpush.msrb.mxu3 %v2007_v50  ;;  %v2236_v50 = vld [vmem:[%s4846_s11 + $0xb8] sm:$0xff] }
 0x8e8   :  { %2177 = vmatpush.msra.mxu0 %v1990_v15  ;;  %v2250_v15 = vld [vmem:[%s4846_s11 + $0x128] sm:$0xff] }
 0x8e9   :  { %2196 = vmatpush.msrb.mxu3 %v1999_v62  ;;  %v2235_v62 = vld [vmem:[%s4846_s11 + $0xb0] sm:$0xff] }
 0x8ea   :  { %2178 = vmatpush.msra.mxu0 %v1982_v17  ;;  %v2249_v17 = vld [vmem:[%s4846_s11 + $0x120] sm:$0xff] }
 0x8eb   :  { %2197 = vmatpush.msrb.mxu3 %v1991_v16  ;;  %v2234_v16 = vld [vmem:[%s4846_s11 + $0xa8] sm:$0xff] }
 0x8ec   :  { %2179 = vmatpush.msra.mxu0 %v1974_v4  ;;  %v2248_v4 = vld [vmem:[%s4846_s11 + $0x118] sm:$0xff] }
 0x8ed   :  { %2198 = vmatpush.msrb.mxu3 %v1983_v3  ;;  %v2233_v3 = vld [vmem:[%s4846_s11 + $0xa0] sm:$0xff] }
 0x8ee   :  { %2180 = vmatpush.msra.mxu0 %v1966_v9  ;;  %v2247_v9 = vld [vmem:[%s4846_s11 + $0x110] sm:$0xff] }
 0x8ef   :  { %2199 = vmatpush.msrb.mxu3 %v1975_v34  ;;  %v2232_v34 = vld [vmem:[%s4846_s11 + $0x98] sm:$0xff] }
 0x8f1   :  { %2200 = vmatpush.msrb.mxu3 %v1967_v26  ;;  %v2231_v26 = vld [vmem:[%s4846_s11 + $0x90] sm:$0xff] }
 0x95c   :  { %v1892_v36 = vpop.f32.mrf.mxu0 }
 0x95d   :  { %v1895_v37 = vadd.f32 %v1892_v36, %v1837_v11  ;;  %v2214_v36 = vld [vmem:[%s4846_s11 + $0x8] sm:$0xff] }
 0x95e   :  { %v2246_v11 = vld [vmem:[%s4846_s11 + $0x108] sm:$0xff] }
 0x965   :  { %v1950_v49 = vpop.f32.mrf.mxu3 }
 0x966   :  { %v1953_v33 = vadd.f32 %v1950_v49, %v1895_v37  ;;  %v2230_v37 = vld [vmem:[%s4846_s11 + $0x88] sm:$0xff]  ;;  %v2213_v49 = vld [vmem:[%s4846_s11] sm:$0xff] }
 0x968   :  { %v1958_v2 = vadd.f32 %v2829_v46, %v1953_v33  ;;  %v2262_v46 = vld [vmem:[%s4846_s11 + $0x188] sm:$0xff]  ;;  %v2245_v33 = vld [vmem:[%s4846_s11 + $0x100] sm:$0xff] }
 0x96a   :  { %v1959_v51 = vmax.f32 %v1958_v2, 0.0  ;;  %v2292_v2 = vld [vmem:[%s4846_s11 + $0x278] sm:$0xff] }
 0x96c   :  { %2809 = vmatmul.msk.f32.vlgmr.msra.gmra.mxu1 %vm1501_vm3, %v1959_v51  ;;  %2810 = vmatmul.msk.f32.vlgmr.msrb.gmra.mxu2 %vm1501_vm3, %v1959_v51 }
 0x96d   :  { %2811 = vmatmul.msk.f32.vlgmr.msrb.gmra.mxu0 %vm1501_vm3, %v1959_v51  ;;  %2812 = vmatmul.msk.f32.vlgmr.msra.gmra.mxu3 %vm1501_vm3, %v1959_v51 }
 0x96e   :  { %2345 = vmatpush.msra.mxu1 %v2228_v28  ;;  %2385 = vmatpush.msrb.mxu0 %v2260_v52  ;;  %v2229_v28 = vld [vmem:[%s4846_s11 + $0x80] sm:$0xff] }
 0x96f   :  { %2365 = vmatpush.msrb.mxu2 %v2244_v54  ;;  %2405 = vmatpush.msra.mxu3 %v2276_v55  ;;  %v2261_v52 = vld [vmem:[%s4846_s11 + $0x180] sm:$0xff]  ;;  %v2291_v54 = vld [vmem:[%s4846_s11 + $0x270] sm:$0xff] }
 0x970   :  { %2346 = vmatpush.msra.mxu1 %v2227_v57  ;;  %2386 = vmatpush.msrb.mxu0 %v2259_v35  ;;  %v2323_v55 = vld [vmem:[%s4846_s11 + $0x370] sm:$0xff]  ;;  %v2308_v57 = vld [vmem:[%s4846_s11 + $0x2f8] sm:$0xff] }
 0x971   :  { %2366 = vmatpush.msrb.mxu2 %v2243_v43  ;;  %2406 = vmatpush.msra.mxu3 %v2275_v48  ;;  %v2340_v35 = vld [vmem:[%s4846_s11 + $0x3f8] sm:$0xff]  ;;  %v2290_v43 = vld [vmem:[%s4846_s11 + $0x268] sm:$0xff] }
 0x972   :  { %2347 = vmatpush.msra.mxu1 %v2226_v58  ;;  %2387 = vmatpush.msrb.mxu0 %v2258_v60  ;;  %v2322_v48 = vld [vmem:[%s4846_s11 + $0x368] sm:$0xff]  ;;  %v2307_v58 = vld [vmem:[%s4846_s11 + $0x2f0] sm:$0xff] }
 0x973   :  { %2367 = vmatpush.msrb.mxu2 %v2242_v61  ;;  %2407 = vmatpush.msra.mxu3 %v2274_v63  ;;  %v2339_v60 = vld [vmem:[%s4846_s11 + $0x3f0] sm:$0xff]  ;;  %v2289_v61 = vld [vmem:[%s4846_s11 + $0x260] sm:$0xff] }
 0x974   :  { %2813 = vmatmul.msk.f32.vlgmr.msrb.gmra.mxu1 %vm1501_vm3, %v1959_v51  ;;  %2814 = vmatmul.msk.f32.vlgmr.msra.gmra.mxu2 %vm1501_vm3, %v1959_v51  ;;  %v2321_v63 = vld [vmem:[%s4846_s11 + $0x360] sm:$0xff] }
 0x975   :  { %2815 = vmatmul.msk.f32.vlgmr.msra.gmra.mxu0 %vm1501_vm3, %v1959_v51  ;;  %2816 = vmatmul.msk.f32.vlgmr.msrb.gmra.mxu3 %vm1501_vm3, %v1959_v51  ;;  %v2324_v51 = vld [vmem:[%s4846_s11 + $0x378] sm:$0xff] }
 0x976   :  { %2348 = vmatpush.msra.mxu1 %v2225_v10  ;;  %2388 = vmatpush.msrb.mxu0 %v2257_v8  ;;  %v2306_v10 = vld [vmem:[%s4846_s11 + $0x2e8] sm:$0xff] }
 0x977   :  { %2368 = vmatpush.msrb.mxu2 %v2241_v0  ;;  %2408 = vmatpush.msra.mxu3 %v2273_v1  ;;  %v2338_v8 = vld [vmem:[%s4846_s11 + $0x3e8] sm:$0xff]  ;;  %v2288_v0 = vld [vmem:[%s4846_s11 + $0x258] sm:$0xff] }
 0x978   :  { %2349 = vmatpush.msra.mxu1 %v2224_v18  ;;  %2389 = vmatpush.msrb.mxu0 %v2256_v19  ;;  %v2320_v1 = vld [vmem:[%s4846_s11 + $0x358] sm:$0xff]  ;;  %v2305_v18 = vld [vmem:[%s4846_s11 + $0x2e0] sm:$0xff] }
 0x979   :  { %2369 = vmatpush.msrb.mxu2 %v2240_v20  ;;  %2409 = vmatpush.msra.mxu3 %v2272_v21  ;;  %v2337_v19 = vld [vmem:[%s4846_s11 + $0x3e0] sm:$0xff]  ;;  %v2287_v20 = vld [vmem:[%s4846_s11 + $0x250] sm:$0xff] }
 0x97a   :  { %2350 = vmatpush.msra.mxu1 %v2223_v22  ;;  %2390 = vmatpush.msrb.mxu0 %v2255_v23  ;;  %v2319_v21 = vld [vmem:[%s4846_s11 + $0x350] sm:$0xff]  ;;  %v2304_v22 = vld [vmem:[%s4846_s11 + $0x2d8] sm:$0xff] }
 0x97b   :  { %2370 = vmatpush.msrb.mxu2 %v2239_v24  ;;  %2410 = vmatpush.msra.mxu3 %v2271_v25  ;;  %v2336_v23 = vld [vmem:[%s4846_s11 + $0x3d8] sm:$0xff]  ;;  %v2286_v24 = vld [vmem:[%s4846_s11 + $0x248] sm:$0xff] }
 0x97c   :  { %2351 = vmatpush.msra.mxu1 %v2222_v29  ;;  %2391 = vmatpush.msrb.mxu0 %v2254_v30  ;;  %v2318_v25 = vld [vmem:[%s4846_s11 + $0x348] sm:$0xff]  ;;  %v2303_v29 = vld [vmem:[%s4846_s11 + $0x2d0] sm:$0xff] }
 0x97d   :  { %2371 = vmatpush.msrb.mxu2 %v2238_v38  ;;  %2411 = vmatpush.msra.mxu3 %v2270_v39  ;;  %v2335_v30 = vld [vmem:[%s4846_s11 + $0x3d0] sm:$0xff]  ;;  %v2285_v38 = vld [vmem:[%s4846_s11 + $0x240] sm:$0xff] }
 0x97e   :  { %2352 = vmatpush.msra.mxu1 %v2221_v40  ;;  %2392 = vmatpush.msrb.mxu0 %v2253_v42  ;;  %v2317_v39 = vld [vmem:[%s4846_s11 + $0x340] sm:$0xff]  ;;  %v2284_v40 = vld [vmem:[%s4846_s11 + $0x238] sm:$0xff] }
 0x97f   :  { %2372 = vmatpush.msrb.mxu2 %v2237_v45  ;;  %2412 = vmatpush.msra.mxu3 %v2269_v41  ;;  %v2316_v42 = vld [vmem:[%s4846_s11 + $0x338] sm:$0xff]  ;;  %v2283_v45 = vld [vmem:[%s4846_s11 + $0x230] sm:$0xff]  ;;  %v2302_v41 = vld [vmem:[%s4846_s11 + $0x2c8] sm:$0xff] }
 0x980   :  { %2353 = vmatpush.msra.mxu1 %v2220_v44  ;;  %2393 = vmatpush.msrb.mxu0 %v2252_v47  ;;  %v2315_v44 = vld [vmem:[%s4846_s11 + $0x330] sm:$0xff]  ;;  %v2334_v47 = vld [vmem:[%s4846_s11 + $0x3c8] sm:$0xff] }
 0x981   :  { %2373 = vmatpush.msrb.mxu2 %v2236_v50  ;;  %2413 = vmatpush.msra.mxu3 %v2268_v53  ;;  %v2282_v50 = vld [vmem:[%s4846_s11 + $0x228] sm:$0xff]  ;;  %v2301_v53 = vld [vmem:[%s4846_s11 + $0x2c0] sm:$0xff] }
 0x982   :  { %2354 = vmatpush.msra.mxu1 %v2219_v56  ;;  %2394 = vmatpush.msrb.mxu0 %v2251_v59  ;;  %v2314_v56 = vld [vmem:[%s4846_s11 + $0x328] sm:$0xff]  ;;  %v2333_v59 = vld [vmem:[%s4846_s11 + $0x3c0] sm:$0xff] }
 0x983   :  { %2374 = vmatpush.msrb.mxu2 %v2235_v62  ;;  %2414 = vmatpush.msra.mxu3 %v2267_v12  ;;  %v2281_v62 = vld [vmem:[%s4846_s11 + $0x220] sm:$0xff]  ;;  %v2300_v12 = vld [vmem:[%s4846_s11 + $0x2b8] sm:$0xff] }
 0x984   :  { %2355 = vmatpush.msra.mxu1 %v2218_v14  ;;  %2395 = vmatpush.msrb.mxu0 %v2250_v15  ;;  %v2313_v14 = vld [vmem:[%s4846_s11 + $0x320] sm:$0xff]  ;;  %v2332_v15 = vld [vmem:[%s4846_s11 + $0x3b8] sm:$0xff] }
 0x985   :  { %2375 = vmatpush.msrb.mxu2 %v2234_v16  ;;  %2415 = vmatpush.msra.mxu3 %v2266_v7  ;;  %v2280_v16 = vld [vmem:[%s4846_s11 + $0x218] sm:$0xff]  ;;  %v2299_v7 = vld [vmem:[%s4846_s11 + $0x2b0] sm:$0xff] }
 0x986   :  { %2356 = vmatpush.msra.mxu1 %v2217_v5  ;;  %2396 = vmatpush.msrb.mxu0 %v2249_v17  ;;  %v2312_v5 = vld [vmem:[%s4846_s11 + $0x318] sm:$0xff]  ;;  %v2331_v17 = vld [vmem:[%s4846_s11 + $0x3b0] sm:$0xff] }
 0x987   :  { %2376 = vmatpush.msrb.mxu2 %v2233_v3  ;;  %2416 = vmatpush.msra.mxu3 %v2265_v32  ;;  %v2279_v3 = vld [vmem:[%s4846_s11 + $0x210] sm:$0xff]  ;;  %v2298_v32 = vld [vmem:[%s4846_s11 + $0x2a8] sm:$0xff] }
 0x988   :  { %2357 = vmatpush.msra.mxu1 %v2216_v13  ;;  %2397 = vmatpush.msrb.mxu0 %v2248_v4  ;;  %v2311_v13 = vld [vmem:[%s4846_s11 + $0x310] sm:$0xff]  ;;  %v2330_v4 = vld [vmem:[%s4846_s11 + $0x3a8] sm:$0xff] }
 0x989   :  { %2377 = vmatpush.msrb.mxu2 %v2232_v34  ;;  %2417 = vmatpush.msra.mxu3 %v2264_v6  ;;  %v2278_v34 = vld [vmem:[%s4846_s11 + $0x208] sm:$0xff]  ;;  %v2297_v6 = vld [vmem:[%s4846_s11 + $0x2a0] sm:$0xff] }
 0x98a   :  { %2358 = vmatpush.msra.mxu1 %v2215_v31  ;;  %2398 = vmatpush.msrb.mxu0 %v2247_v9  ;;  %v2310_v31 = vld [vmem:[%s4846_s11 + $0x308] sm:$0xff]  ;;  %v2329_v9 = vld [vmem:[%s4846_s11 + $0x3a0] sm:$0xff] }
 0x98b   :  { %2378 = vmatpush.msrb.mxu2 %v2231_v26  ;;  %2418 = vmatpush.msra.mxu3 %v2263_v27  ;;  %v2277_v26 = vld [vmem:[%s4846_s11 + $0x200] sm:$0xff]  ;;  %v2296_v27 = vld [vmem:[%s4846_s11 + $0x298] sm:$0xff] }
 0x98c   :  { %2359 = vmatpush.msra.mxu1 %v2214_v36  ;;  %2399 = vmatpush.msrb.mxu0 %v2246_v11  ;;  %v2309_v36 = vld [vmem:[%s4846_s11 + $0x300] sm:$0xff]  ;;  %v2328_v11 = vld [vmem:[%s4846_s11 + $0x398] sm:$0xff] }
 0x98d   :  { %2379 = vmatpush.msrb.mxu2 %v2230_v37  ;;  %2419 = vmatpush.msra.mxu3 %v2262_v46  ;;  %v2295_v37 = vld [vmem:[%s4846_s11 + $0x290] sm:$0xff] }
 0x98e   :  { %2360 = vmatpush.msra.mxu1 %v2213_v49  ;;  %2400 = vmatpush.msrb.mxu0 %v2245_v33  ;;  %v2327_v46 = vld [vmem:[%s4846_s11 + $0x390] sm:$0xff]  ;;  %v2294_v49 = vld [vmem:[%s4846_s11 + $0x288] sm:$0xff] }
 0x98f   :  { %2380 = vmatpush.msrb.mxu2 %v2229_v28  ;;  %2420 = vmatpush.msra.mxu3 %v2261_v52  ;;  %v2326_v33 = vld [vmem:[%s4846_s11 + $0x388] sm:$0xff]  ;;  %v2024_v28 = vld [vmem:[%s4845_s10] sm:$0xff] }
 0x990   :  { %2425 = vmatpush.msrb.mxu1 %v2292_v2  ;;  %2465 = vmatpush.msra.mxu0 %v2324_v51  ;;  %v2293_v2 = vld [vmem:[%s4846_s11 + $0x280] sm:$0xff]  ;;  %v2026_v52 = vperm.slane %v2024_v28, 0 }
 0x991   :  { %2445 = vmatpush.msra.mxu2 %v2308_v57  ;;  %2485 = vmatpush.msrb.mxu3 %v2340_v35  ;;  %v2325_v51 = vld [vmem:[%s4846_s11 + $0x380] sm:$0xff] }
 0x992   :  { %2426 = vmatpush.msrb.mxu1 %v2291_v54  ;;  %2466 = vmatpush.msra.mxu0 %v2323_v55  ;;  %v2028_v54 = vperm.slane %v2024_v28, 2 }
 0x993   :  { %2446 = vmatpush.msra.mxu2 %v2307_v58  ;;  %2486 = vmatpush.msrb.mxu3 %v2339_v60  ;;  %v2027_v58 = vperm.slane %v2024_v28, 1 }
 0x994   :  { %2427 = vmatpush.msrb.mxu1 %v2290_v43  ;;  %2467 = vmatpush.msra.mxu0 %v2322_v48 }
 0x995   :  { %2447 = vmatpush.msra.mxu2 %v2306_v10  ;;  %2487 = vmatpush.msrb.mxu3 %v2338_v8  ;;  %v2032_v8 = vperm.slane %v2024_v28, 6 }
 0x996   :  { %2428 = vmatpush.msrb.mxu1 %v2289_v61  ;;  %2468 = vmatpush.msra.mxu0 %v2321_v63  ;;  %v2029_v61 = vperm.slane %v2024_v28, 3  ;;  %v2030_v63 = vperm.slane %v2024_v28, 4 }
 0x997   :  { %2448 = vmatpush.msra.mxu2 %v2305_v18  ;;  %2488 = vmatpush.msrb.mxu3 %v2337_v19 }
 0x998   :  { %2429 = vmatpush.msrb.mxu1 %v2288_v0  ;;  %2469 = vmatpush.msra.mxu0 %v2320_v1 }
 0x999   :  { %2449 = vmatpush.msra.mxu2 %v2304_v22  ;;  %2489 = vmatpush.msrb.mxu3 %v2336_v23 }
 0x99a   :  { %2430 = vmatpush.msrb.mxu1 %v2287_v20  ;;  %2470 = vmatpush.msra.mxu0 %v2319_v21 }
 0x99b   :  { %2450 = vmatpush.msra.mxu2 %v2303_v29  ;;  %2490 = vmatpush.msrb.mxu3 %v2335_v30  ;;  %v2031_v29 = vperm.slane %v2024_v28, 5 }
 0x99c   :  { %2431 = vmatpush.msrb.mxu1 %v2286_v24  ;;  %2471 = vmatpush.msra.mxu0 %v2318_v25 }
 0x99d   :  { %2451 = vmatpush.msra.mxu2 %v2302_v41  ;;  %2491 = vmatpush.msrb.mxu3 %v2334_v47  ;;  %v2859_v47 = vmov 0  }
 0x99e   :  { %2432 = vmatpush.msrb.mxu1 %v2285_v38  ;;  %2472 = vmatpush.msra.mxu0 %v2317_v39  ;;  %v2033_v38 = vperm.slane %v2024_v28, 7 }
 0x99f   :  { %2452 = vmatpush.msra.mxu2 %v2301_v53  ;;  %2492 = vmatpush.msrb.mxu3 %v2333_v59 }
 0x9a0   :  { %2433 = vmatpush.msrb.mxu1 %v2284_v40  ;;  %2473 = vmatpush.msra.mxu0 %v2316_v42 }
 0x9a1   :  { %2453 = vmatpush.msra.mxu2 %v2300_v12  ;;  %2493 = vmatpush.msrb.mxu3 %v2332_v15 }
 0x9a2   :  { %2434 = vmatpush.msrb.mxu1 %v2283_v45  ;;  %2474 = vmatpush.msra.mxu0 %v2315_v44 }
 0x9a3   :  { %2454 = vmatpush.msra.mxu2 %v2299_v7  ;;  %2494 = vmatpush.msrb.mxu3 %v2331_v17 }
 0x9a4   :  { %2435 = vmatpush.msrb.mxu1 %v2282_v50  ;;  %2475 = vmatpush.msra.mxu0 %v2314_v56  ;;  %v2830_v50 = vld [vmem:[%s4847_s12] ss:$0 sm:$0xff] }
 0x9a5   :  { %2455 = vmatpush.msra.mxu2 %v2298_v32  ;;  %2495 = vmatpush.msrb.mxu3 %v2330_v4 }
 0x9a6   :  { %2436 = vmatpush.msrb.mxu1 %v2281_v62  ;;  %2476 = vmatpush.msra.mxu0 %v2313_v14 }
 0x9a7   :  { %2456 = vmatpush.msra.mxu2 %v2297_v6  ;;  %2496 = vmatpush.msrb.mxu3 %v2329_v9  ;;  %v2861_v9 = vmov 12.0  }
 0x9a8   :  { %2437 = vmatpush.msrb.mxu1 %v2280_v16  ;;  %2477 = vmatpush.msra.mxu0 %v2312_v5  ;;  %2831 = vrcp.f32 %v2861_v9 }
 0x9a9   :  { %2457 = vmatpush.msra.mxu2 %v2296_v27  ;;  %2497 = vmatpush.msrb.mxu3 %v2328_v11 }
 0x9aa   :  { %2438 = vmatpush.msrb.mxu1 %v2279_v3  ;;  %2478 = vmatpush.msra.mxu0 %v2311_v13 }
 0x9ab   :  { %2458 = vmatpush.msra.mxu2 %v2295_v37  ;;  %2498 = vmatpush.msrb.mxu3 %v2327_v46 }
 0x9ac   :  { %2439 = vmatpush.msrb.mxu1 %v2278_v34  ;;  %2479 = vmatpush.msra.mxu0 %v2310_v31 }
 0x9ad   :  { %2459 = vmatpush.msra.mxu2 %v2294_v49  ;;  %2499 = vmatpush.msrb.mxu3 %v2326_v33 }
 0x9ae   :  { %2440 = vmatpush.msrb.mxu1 %v2277_v26  ;;  %2480 = vmatpush.msra.mxu0 %v2309_v36  ;;  %v2832_v26 = vpop.eup %2831 }
 0x9af   :  { %2460 = vmatpush.msra.mxu2 %v2293_v2  ;;  %2500 = vmatpush.msrb.mxu3 %v2325_v51  ;;  %v2526_v27 = vmul.f32 12.0, %v2832_v26  ;;  %vm2530_vm5 = vweird.f32 %v2832_v26 }
 0x9b0   :  { %2825 = vset.pattern.permute.xlu1 %v2859_v47  ;;  %2826 = vset.pattern.permute.xlu0 %v2859_v47 }
 0x9b1   :  { %v2527_v36 = vsub.f32 1.0, %v2526_v27 }
 0x9b3   :  { %v2528_v49 = vmul.f32 %v2832_v26, %v2527_v36 }
 0x9b5   :  { %v2529_v51 = vadd.f32 %v2832_v26, %v2528_v49 }
 0x9e9   :  { %v2062_v55 = vpop.f32.mrf.mxu1 }
 0x9ea   :  { %v2063_v57 = vadd.f32 %v2062_v55, %v2026_v52  ;;  %v2102_v35 = vpop.f32.mrf.mxu0 }
 0x9eb   :  { %v2103_v43 = vadd.f32 %v2102_v35, %v2028_v54  ;;  %v2531_v54 = vsel %vm2530_vm5, %v2832_v26, %v2529_v51 }
 0x9ec   :  { %v2205_v48 = vmax.f32 %v2063_v57, 0.0 }
 0x9ed   :  { %v2207_v60 = vmax.f32 %v2103_v43, 0.0 }
 0x9ee   :  { %2361 = vmatmul.f32.vlgmr.msra.gmra.mxu1 %v2205_v48 }
 0x9ef   :  { %2401 = vmatmul.f32.vlgmr.msrb.gmra.mxu0 %v2207_v60  ;;  %v2082_v10 = vpop.f32.mrf.mxu2 }
 0x9f0   :  { %v2083_v0 = vadd.f32 %v2082_v10, %v2027_v58  ;;  %v2122_v1 = vpop.f32.mrf.mxu3 }
 0x9f1   :  { %v2123_v18 = vadd.f32 %v2122_v1, %v2029_v61  ;;  %v2142_v19 = vpop.f32.mrf.mxu1 }
 0x9f2   :  { %v2206_v20 = vmax.f32 %v2083_v0, 0.0  ;;  %v2143_v21 = vadd.f32 %v2142_v19, %v2030_v63  ;;  %v2182_v22 = vpop.f32.mrf.mxu0 }
 0x9f3   :  { %v2208_v23 = vmax.f32 %v2123_v18, 0.0  ;;  %v2183_v24 = vadd.f32 %v2182_v22, %v2032_v8 }
 0x9f4   :  { %v2209_v25 = vmax.f32 %v2143_v21, 0.0  ;;  %2381 = vmatmul.f32.vlgmr.msrb.gmra.mxu2 %v2206_v20 }
 0x9f5   :  { %v2211_v30 = vmax.f32 %v2183_v24, 0.0  ;;  %2421 = vmatmul.f32.vlgmr.msra.gmra.mxu3 %v2208_v23 }
 0x9f6   :  { %2441 = vmatmul.f32.vlgmr.msrb.gmra.mxu1 %v2209_v25 }
 0x9f7   :  { %2481 = vmatmul.f32.vlgmr.msra.gmra.mxu0 %v2211_v30  ;;  %v2162_v39 = vpop.f32.mrf.mxu2 }
 0x9f8   :  { %v2163_v40 = vadd.f32 %v2162_v39, %v2031_v29  ;;  %v2202_v42 = vpop.f32.mrf.mxu3 }
 0x9f9   :  { %v2203_v45 = vadd.f32 %v2202_v42, %v2033_v38 }
 0x9fa   :  { %v2210_v41 = vmax.f32 %v2163_v40, 0.0 }
 0x9fb   :  { %v2212_v44 = vmax.f32 %v2203_v45, 0.0 }
 0x9fc   :  { %2461 = vmatmul.f32.vlgmr.msra.gmra.mxu2 %v2210_v41 }
 0x9fd   :  { %2501 = vmatmul.f32.vlgmr.msrb.gmra.mxu3 %v2212_v44 }
 0xa6b   :  { %v2362_v53 = vpop.f32.mrf.mxu1 }
 0xa6c   :  { %v2363_v56 = vadd.f32 %v2830_v50, %v2362_v53  ;;  %v2402_v59 = vpop.f32.mrf.mxu0 }
 0xa73   :  { %v2442_v7 = vpop.f32.mrf.mxu1 }
 0xa74   :  { %v2482_v32 = vpop.f32.mrf.mxu0 }
 0xa77   :  { %v2382_v62 = vpop.f32.mrf.mxu2 }
 0xa78   :  { %v2383_v12 = vadd.f32 %v2382_v62, %v2363_v56  ;;  %v2422_v14 = vpop.f32.mrf.mxu3 }
 0xa7a   :  { %v2403_v15 = vadd.f32 %v2402_v59, %v2383_v12 }
 0xa7c   :  { %v2423_v16 = vadd.f32 %v2422_v14, %v2403_v15 }
 0xa7e   :  { %v2443_v5 = vadd.f32 %v2442_v7, %v2423_v16 }
 0xa7f   :  { %v2462_v17 = vpop.f32.mrf.mxu2 }
 0xa80   :  { %v2463_v3 = vadd.f32 %v2462_v17, %v2443_v5  ;;  %v2502_v4 = vpop.f32.mrf.mxu3 }
 0xa82   :  { %v2483_v13 = vadd.f32 %v2482_v32, %v2463_v3 }
 0xa84   :  { %v2503_v34 = vadd.f32 %v2502_v4, %v2483_v13 }
 0xa86   :  { %2507 = vperm.xlu1 %2825, %v2503_v34   ;;  %2511 = vrot.lane.b32.xlu0 %v2503_v34, %s2860_s5 }
 0xaf8   :  { %v2512_v6 = vpop.permute.xlu0 %2511  ;;  %v2508_v55 = vpop.permute.xlu1 %2507 }
 0xaf9   :  { %v2515_v31 = vsel %vm2514_vm4, %v2512_v6, 0.0  ;;  %v2510_v57 = vadd.f32 %v2508_v55, %v2503_v34 }
 0xafa   :  { %2516 = vadd.xlane.f32.xlu0 %v2515_v31 }
 0xb6d   :  { %v2517_v11 = vpop.xlane.xlu0 %2516 }
 0xb6e   :  { %v2518_v37 = vrot.slane %v2517_v11, 4 }
 0xb70   :  { %v2519_v46 = vadd.f32 %v2518_v37, %v2517_v11 }
 0xb72   :  { %v2520_v33 = vrot.slane %v2519_v46, 2 }
 0xb74   :  { %v2521_v2 = vadd.f32 %v2520_v33, %v2519_v46 }
 0xb76   :  { %v2522_v28 = vrot.slane %v2521_v2, 1 }
 0xb78   :  { %v2523_v52 = vadd.f32 %v2522_v28, %v2521_v2 }
 0xb7a   :  { %2817 = vpush %v2523_v52 }
 0xb7b   :  { %2819 = vpush %v2531_v54 }
 0xbab   :  { %s2818_s12 = spop %2817 }
 0xbac   :  { %s2820_s30 = spop %2819 }
 0xbad   :  { %s2533_s2 = smul.f32 %s2820_s30, %s2818_s12 }
 0xbaf   :  { %v2534_v35 = vstv %s2533_s2 }
 0xbb0   :  { %v2535_v43 = vsub.f32 %v2510_v57, %v2534_v35 }
 0xbb2   :  { %2537 = vrot.lane.b32.xlu1 %v2535_v43, %s2860_s5 }
 0xc24   :  { %v2538_v48 = vpop.permute.xlu1 %2537 }
 0xc25   :  { %2540 = vst.msk [vmem:[#allocation2] sm:$0x3] %vm2514_vm4, %v2538_v48 }
 0xc26   :  { %2551 = dma.vmem_to_hbm [thread:$0]  %s2547_s15, 32, %s2549_s17, [#allocation3]  }
 0xc27   :  { %2857 = dma.done.wait [#allocation3], 32  }
 0xc28   :  { %2858 = vsyncadd [#allocation3], 4294967264 }
 0xc29   :  { %2556 = vsyncpa [#allocation3], 1 }

</bundles_post_ra>
